<compile_context>
chip_gen: v5e
topology: v5e:2x2
jax: 0.10.0
libtpu: 0.0.40
codegen_flags: <defaults>
</compile_context>

<pallas_src>
import jax
import jax.numpy as jnp
from jax.experimental import pallas as pl
from jax.experimental.pallas import tpu as pltpu

_BN_EPS = 1e-5
_L = 255            # conv sequence length (255 -> maxpool(3,3) -> 85)
_LP = 85            # pooled length == Linear in_features
_OFF = 128          # lane offset of activation column 0 inside the slab
_SLAB = (56, 512)   # zero-padded activation scratch slab (bf16)

# (Cout, Cin, K) of the four conv blocks and their padded channel counts.
_CONV_CFG = ((50, 20, 9), (50, 50, 9), (10, 50, 7), (1, 10, 7))
_CIN_PAD = (24, 56, 56, 16)
_COUT_PAD = (56, 56, 16, 8)


# ----------------------------------------------------------------------------
# Fused whole-network kernel (one grid step == one batch element).
# ----------------------------------------------------------------------------
def _fused_forward_kernel(x_ref,
                          w1_ref, s1_ref, w2_ref, s2_ref,
                          w3_ref, s3_ref, w4_ref, s4_ref,
                          pick_ref, lw1_ref, lb1_ref, lw2_ref, lb2_ref,
                          o_ref, slab_ref):

    def conv_bn_relu(cin_p, k, width, w_ref, s_ref):
        # One (Cout_p, Cin_p) @ (Cin_p, width) bf16 MXU matmul per tap, reading
        # a statically shifted window of the zero-padded activation slab.
        pad = (k - 1) // 2
        acc = None
        for t in range(k):                                    # static unroll
            win = slab_ref[pl.ds(0, cin_p), pl.ds(_OFF - pad + t, width)]
            part = jnp.dot(w_ref[t], win, preferred_element_type=jnp.float32)
            acc = part if acc is None else acc + part
        return jnp.maximum(acc + s_ref[...], 0.0)             # BN shift + ReLU

    # Zero the slab once per sample (~14 bf16 vreg stores).  This realises the
    # 'same' padding halo AND guarantees padded rows/columns are truly zero.
    slab_ref[...] = jnp.zeros_like(slab_ref)

    # Conv blocks 1 & 2 at full 256-lane width (the extra column 255 is a
    # harmless "as-if-longer" value and is trimmed when storing).
    slab_ref[pl.ds(0, 24), pl.ds(_OFF, 256)] = x_ref[0].astype(jnp.bfloat16)
    y = conv_bn_relu(24, 9, 256, w1_ref, s1_ref)              # (56, 256)
    slab_ref[pl.ds(0, 56), pl.ds(_OFF, _L)] = y[:, :_L].astype(jnp.bfloat16)
    y = conv_bn_relu(56, 9, 256, w2_ref, s2_ref)              # (56, 256)

    # MaxPool1d(3, 3): three precomputed stride-3 one-hot pick matmuls + max.
    yb = y.astype(jnp.bfloat16)
    p0 = jnp.dot(yb, pick_ref[0], preferred_element_type=jnp.float32)
    p1 = jnp.dot(yb, pick_ref[1], preferred_element_type=jnp.float32)
    p2 = jnp.dot(yb, pick_ref[2], preferred_element_type=jnp.float32)
    pooled = jnp.maximum(jnp.maximum(p0, p1), p2)             # (56, 96); cols 85.. == 0
    # Writing all 96 columns also lays down the zero right-halo for conv3/4.
    slab_ref[pl.ds(0, 56), pl.ds(_OFF, 96)] = pooled.astype(jnp.bfloat16)

    y = conv_bn_relu(56, 7, _LP, w3_ref, s3_ref)              # (16, 85)
    slab_ref[pl.ds(0, 16), pl.ds(_OFF, _LP)] = y.astype(jnp.bfloat16)
    y = conv_bn_relu(16, 7, _LP, w4_ref, s4_ref)              # (8, 85); row 0 == Flatten

    # MLP head: Linear(85->10) + ReLU + Linear(10->1) + Sigmoid (all f32).
    h = jnp.dot(y[0:1, :], lw1_ref[...],
                preferred_element_type=jnp.float32) + lb1_ref[...]
    h = jnp.maximum(h, 0.0)                                   # (1, 10)
    z = jnp.dot(h, lw2_ref[...],
                preferred_element_type=jnp.float32) + lb2_ref[...]
    sig = pl.reciprocal(1.0 + jnp.exp(-z), approx=True)       # sigmoid via EUP
    o_ref[0] = sig.astype(o_ref.dtype)                        # (1, 1)


# ----------------------------------------------------------------------------
# Wrapper.
# ----------------------------------------------------------------------------
def model_ext_forward(x, packed):
    (w1, s1, w2, s2, w3, s3, w4, s4, pick, lw1, lb1, lw2, lb2) = packed
    batch = x.shape[0]
    # Pad channels 20->24 and length 255->256 with zeros: sublane-aligned
    # stores in-kernel, and the extra zero column doubles as the right halo.
    xp = jnp.pad(x, ((0, 0), (0, 24 - x.shape[1]), (0, 256 - _L)))

    def resident(a):
        nd = a.ndim
        return pl.BlockSpec(a.shape, lambda b, _nd=nd: (0,) * _nd)

    out = pl.pallas_call(
        _fused_forward_kernel,
        out_shape=jax.ShapeDtypeStruct((batch, 1, 1), jnp.float32),
        grid=(batch,),
        in_specs=[pl.BlockSpec((1, 24, 256), lambda b: (b, 0, 0))]
                 + [resident(a) for a in
                    (w1, s1, w2, s2, w3, s3, w4, s4, pick, lw1, lb1, lw2, lb2)],
        out_specs=pl.BlockSpec((1, 1, 1), lambda b: (b, 0, 0)),
        scratch_shapes=[pltpu.VMEM(_SLAB, jnp.bfloat16)],
        compiler_params=pltpu.CompilerParams(
            dimension_semantics=("parallel",)),   # v7x: B=2 across both TCs
    )(xp, w1, s1, w2, s2, w3, s3, w4, s4, pick, lw1, lb1, lw2, lb2)
    return out.reshape(batch, 1)


model_ext_forward_jit = jax.jit(model_ext_forward)


# ----------------------------------------------------------------------------
# Host-side parameter init (PyTorch-style), BN folding and kernel layout.
# ----------------------------------------------------------------------------
def init_raw_params(key):
    """Raw (unfolded, unpadded) parameters, PyTorch-style ranges."""
    keys = jax.random.split(key, 6)
    convs = []
    for kk, (cout, cin, k) in zip(keys[:4], _CONV_CFG):
        kw, kb, kg, kbe, km, kv = jax.random.split(kk, 6)
        bound = 1.0 / jnp.sqrt(float(cin * k))
        convs.append(dict(
            w=jax.random.uniform(kw, (cout, cin, k), jnp.float32, -bound, bound),
            b=jax.random.uniform(kb, (cout,), jnp.float32, -bound, bound),
            gamma=jax.random.uniform(kg, (cout,), jnp.float32, 0.8, 1.2),
            beta=jax.random.uniform(kbe, (cout,), jnp.float32, -0.1, 0.1),
            mean=jax.random.uniform(km, (cout,), jnp.float32, -0.1, 0.1),
            var=jax.random.uniform(kv, (cout,), jnp.float32, 0.5, 1.5)))
    k1a, k1b = jax.random.split(keys[4])
    k2a, k2b = jax.random.split(keys[5])
    b1 = 1.0 / jnp.sqrt(float(_LP))
    b2 = 1.0 / jnp.sqrt(10.0)
    lin = dict(
        lw1=jax.random.uniform(k1a, (_LP, 10), jnp.float32, -b1, b1),
        lb1=jax.random.uniform(k1b, (1, 10), jnp.float32, -b1, b1),
        lw2=jax.random.uniform(k2a, (10, 1), jnp.float32, -b2, b2),
        lb2=jax.random.uniform(k2b, (1, 1), jnp.float32, -b2, b2))
    return convs, lin


def _fold_conv(p, cout_p, cin_p):
    # Fold inference BatchNorm (+ conv bias) into (weights, shift); pad the
    # channel dims to sublane multiples; tap-major bf16 layout so each tap is
    # one clean (Cout_p, Cin_p) MXU operand.
    scale = p["gamma"] / jnp.sqrt(p["var"] + _BN_EPS)
    shift = p["beta"] + scale * (p["b"] - p["mean"])
    wf = p["w"] * scale[:, None, None]
    cout, cin, _ = p["w"].shape
    wf = jnp.pad(wf, ((0, cout_p - cout), (0, cin_p - cin), (0, 0)))
    w_taps = jnp.transpose(wf, (2, 0, 1)).astype(jnp.bfloat16)   # (K, Cout_p, Cin_p)
    shift_p = jnp.pad(shift, (0, cout_p - cout))[:, None].astype(jnp.float32)
    return w_taps, shift_p


def _make_pick():
    # pick[r, 3g + r, g] = 1 for g in 0..84; output cols 85..95 stay zero so
    # the pooled store also writes the zero right-halo used by conv3/conv4.
    g = jnp.arange(_LP)
    p = jnp.zeros((3, 256, 96), jnp.float32)
    for r in range(3):
        p = p.at[r, 3 * g + r, g].set(1.0)
    return p.astype(jnp.bfloat16)


def pack_params(raw):
    convs, lin = raw
    packed = []
    for p, cip, cop in zip(convs, _CIN_PAD, _COUT_PAD):
        packed.extend(_fold_conv(p, cop, cip))
    packed.append(_make_pick())
    packed.extend([lin["lw1"], lin["lb1"], lin["lw2"], lin["lb2"]])
    return tuple(packed)


# ----------------------------------------------------------------------------
# Pure-JAX reference (unfused, unfolded) for correctness checking.
# ----------------------------------------------------------------------------
def reference_forward(x, raw):
    convs, lin = raw

    def conv_bn_relu(y, p, pad):
        y = jax.lax.conv_general_dilated(
            y, p["w"], window_strides=(1,), padding=[(pad, pad)],
            dimension_numbers=("NCH", "OIH", "NCH"))
        y = y + p["b"][None, :, None]
        y = (p["gamma"][None, :, None] * (y - p["mean"][None, :, None])
             / jnp.sqrt(p["var"][None, :, None] + _BN_EPS)
             + p["beta"][None, :, None])
        return jnp.maximum(y, 0.0)

    y = conv_bn_relu(x, convs[0], 4)
    y = conv_bn_relu(y, convs[1], 4)
    b, c, l = y.shape
    y = y[:, :, :(l // 3) * 3].reshape(b, c, l // 3, 3).max(axis=-1)  # MaxPool1d(3,3)
    y = conv_bn_relu(y, convs[2], 3)
    y = conv_bn_relu(y, convs[3], 3)
    flat = y.reshape(b, -1)                                           # (B, 85)
    h = jnp.maximum(flat @ lin["lw1"] + lin["lb1"], 0.0)
    z = h @ lin["lw2"] + lin["lb2"]
    return jax.nn.sigmoid(z)


if __name__ == "__main__":
    key = jax.random.PRNGKey(0)
    k_param, k_x = jax.random.split(key)
    raw = init_raw_params(k_param)
    packed = pack_params(raw)
    # 20 input channels, length 255 so 255 // 3 == 85 == Linear in_features.
    x = jax.random.normal(k_x, (2, 20, _L), jnp.float32)

    out = jax.block_until_ready(model_ext_forward_jit(x, packed))

    assert out.shape == (2, 1), out.shape
    assert bool(jnp.all(jnp.isfinite(out)))
    assert bool(jnp.all((out >= 0.0) & (out <= 1.0)))

    # Correctness vs. the pure-JAX reference (bf16 matmul tolerance).
    ref = reference_forward(x, raw)
    err = float(jnp.max(jnp.abs(out - ref.reshape(out.shape))))
    assert err < 5e-2, f"kernel vs reference max |err| = {err}"
    print("KERNEL_OK")
</pallas_src>

<mosaic_0001>
module attributes {stable_mosaic.version = 11 : i64} {
  func.func @_fused_forward_kernel(%arg0: i32, %arg1: memref<1x24x256xf32, #tpu.memory_space<vmem>>, %arg2: memref<9x56x24xbf16, #tpu.memory_space<vmem>>, %arg3: memref<56x1xf32, #tpu.memory_space<vmem>>, %arg4: memref<9x56x56xbf16, #tpu.memory_space<vmem>>, %arg5: memref<56x1xf32, #tpu.memory_space<vmem>>, %arg6: memref<7x16x56xbf16, #tpu.memory_space<vmem>>, %arg7: memref<16x1xf32, #tpu.memory_space<vmem>>, %arg8: memref<7x8x16xbf16, #tpu.memory_space<vmem>>, %arg9: memref<8x1xf32, #tpu.memory_space<vmem>>, %arg10: memref<3x256x96xbf16, #tpu.memory_space<vmem>>, %arg11: memref<85x10xf32, #tpu.memory_space<vmem>>, %arg12: memref<1x10xf32, #tpu.memory_space<vmem>>, %arg13: memref<10x1xf32, #tpu.memory_space<vmem>>, %arg14: memref<1x1xf32, #tpu.memory_space<vmem>>, %arg15: memref<1x1x1xf32, #tpu.memory_space<vmem>>, %arg16: memref<56x512xbf16, #tpu.memory_space<vmem>>) attributes {dimension_semantics = [#tpu.dimension_semantics<parallel>], iteration_bounds = array<i64: 2>, scalar_prefetch = 0 : i64, scratch_operands = 1 : i64, tpu.core_type = #tpu.core_type<tc>, window_params = [{transform_indices = @transform_0, window_bounds = array<i64: 1, 24, 256>}, {pipeline_mode = #tpu.pipeline_mode<synchronous>, transform_indices = @transform_1, window_bounds = array<i64: 9, 56, 24>}, {pipeline_mode = #tpu.pipeline_mode<synchronous>, transform_indices = @transform_2, window_bounds = array<i64: 56, 1>}, {pipeline_mode = #tpu.pipeline_mode<synchronous>, transform_indices = @transform_3, window_bounds = array<i64: 9, 56, 56>}, {pipeline_mode = #tpu.pipeline_mode<synchronous>, transform_indices = @transform_4, window_bounds = array<i64: 56, 1>}, {pipeline_mode = #tpu.pipeline_mode<synchronous>, transform_indices = @transform_5, window_bounds = array<i64: 7, 16, 56>}, {pipeline_mode = #tpu.pipeline_mode<synchronous>, transform_indices = @transform_6, window_bounds = array<i64: 16, 1>}, {pipeline_mode = #tpu.pipeline_mode<synchronous>, transform_indices = @transform_7, window_bounds = array<i64: 7, 8, 16>}, {pipeline_mode = #tpu.pipeline_mode<synchronous>, transform_indices = @transform_8, window_bounds = array<i64: 8, 1>}, {pipeline_mode = #tpu.pipeline_mode<synchronous>, transform_indices = @transform_9, window_bounds = array<i64: 3, 256, 96>}, {pipeline_mode = #tpu.pipeline_mode<synchronous>, transform_indices = @transform_10, window_bounds = array<i64: 85, 10>}, {pipeline_mode = #tpu.pipeline_mode<synchronous>, transform_indices = @transform_11, window_bounds = array<i64: 1, 10>}, {pipeline_mode = #tpu.pipeline_mode<synchronous>, transform_indices = @transform_12, window_bounds = array<i64: 10, 1>}, {pipeline_mode = #tpu.pipeline_mode<synchronous>, transform_indices = @transform_13, window_bounds = array<i64: 1, 1>}, {transform_indices = @transform_14, window_bounds = array<i64: 1, 1, 1>}]} {
    %cst = arith.constant 0.000000e+00 : bf16
    %0 = vector.broadcast %cst : bf16 to vector<56x512xbf16>
    %c0 = arith.constant 0 : index
    %c0_0 = arith.constant 0 : index
    %1 = vector.load %arg16[%c0, %c0_0] : memref<56x512xbf16, #tpu.memory_space<vmem>>, vector<56x512xbf16>
    tpu.vector_store %arg16[%c0, %c0_0], %0 {strides = array<i32>} : memref<56x512xbf16, #tpu.memory_space<vmem>>, vector<56x512xbf16>,
    %c0_1 = arith.constant 0 : index
    %c0_2 = arith.constant 0 : index
    %c0_3 = arith.constant 0 : index
    %2 = vector.load %arg1[%c0_1, %c0_2, %c0_3] : memref<1x24x256xf32, #tpu.memory_space<vmem>>, vector<1x24x256xf32>
    %3 = vector.shape_cast %2 : vector<1x24x256xf32> to vector<24x256xf32>
    %4 = arith.truncf %3 : vector<24x256xf32> to vector<24x256xbf16>
    %c0_4 = arith.constant 0 : index
    %c128 = arith.constant 128 : index
    %5 = vector.load %arg16[%c0_4, %c128] : memref<56x512xbf16, #tpu.memory_space<vmem>>, vector<24x256xbf16>
    tpu.vector_store %arg16[%c0_4, %c128], %4 {strides = array<i32>} : memref<56x512xbf16, #tpu.memory_space<vmem>>, vector<24x256xbf16>,
    %c0_5 = arith.constant 0 : index
    %c124 = arith.constant 124 : index
    %6 = vector.load %arg16[%c0_5, %c124] : memref<56x512xbf16, #tpu.memory_space<vmem>>, vector<24x256xbf16>
    %c0_6 = arith.constant 0 : index
    %c0_7 = arith.constant 0 : index
    %c0_8 = arith.constant 0 : index
    %7 = vector.load %arg2[%c0_6, %c0_7, %c0_8] : memref<9x56x24xbf16, #tpu.memory_space<vmem>>, vector<1x56x24xbf16>
    %8 = vector.shape_cast %7 : vector<1x56x24xbf16> to vector<56x24xbf16>
    %cst_9 = arith.constant dense<0.000000e+00> : vector<56x256xf32>
    %9 = tpu.matmul %8, %6, %cst_9 {dimension_numbers = #tpu.dot_dimension_numbers<[1], [0], [0], [1], [0, 0, 1, 1], [], []>} : vector<56x24xbf16>, vector<24x256xbf16>, vector<56x256xf32> -> vector<56x256xf32>
    %c0_10 = arith.constant 0 : index
    %c125 = arith.constant 125 : index
    %10 = vector.load %arg16[%c0_10, %c125] : memref<56x512xbf16, #tpu.memory_space<vmem>>, vector<24x256xbf16>
    %c1 = arith.constant 1 : index
    %c0_11 = arith.constant 0 : index
    %c0_12 = arith.constant 0 : index
    %11 = vector.load %arg2[%c1, %c0_11, %c0_12] : memref<9x56x24xbf16, #tpu.memory_space<vmem>>, vector<1x56x24xbf16>
    %12 = vector.shape_cast %11 : vector<1x56x24xbf16> to vector<56x24xbf16>
    %cst_13 = arith.constant dense<0.000000e+00> : vector<56x256xf32>
    %13 = tpu.matmul %12, %10, %cst_13 {dimension_numbers = #tpu.dot_dimension_numbers<[1], [0], [0], [1], [0, 0, 1, 1], [], []>} : vector<56x24xbf16>, vector<24x256xbf16>, vector<56x256xf32> -> vector<56x256xf32>
    %14 = arith.addf %9, %13 : vector<56x256xf32>
    %c0_14 = arith.constant 0 : index
    %c126 = arith.constant 126 : index
    %15 = vector.load %arg16[%c0_14, %c126] : memref<56x512xbf16, #tpu.memory_space<vmem>>, vector<24x256xbf16>
    %c2 = arith.constant 2 : index
    %c0_15 = arith.constant 0 : index
    %c0_16 = arith.constant 0 : index
    %16 = vector.load %arg2[%c2, %c0_15, %c0_16] : memref<9x56x24xbf16, #tpu.memory_space<vmem>>, vector<1x56x24xbf16>
    %17 = vector.shape_cast %16 : vector<1x56x24xbf16> to vector<56x24xbf16>
    %cst_17 = arith.constant dense<0.000000e+00> : vector<56x256xf32>
    %18 = tpu.matmul %17, %15, %cst_17 {dimension_numbers = #tpu.dot_dimension_numbers<[1], [0], [0], [1], [0, 0, 1, 1], [], []>} : vector<56x24xbf16>, vector<24x256xbf16>, vector<56x256xf32> -> vector<56x256xf32>
    %19 = arith.addf %14, %18 : vector<56x256xf32>
    %c0_18 = arith.constant 0 : index
    %c127 = arith.constant 127 : index
    %20 = vector.load %arg16[%c0_18, %c127] : memref<56x512xbf16, #tpu.memory_space<vmem>>, vector<24x256xbf16>
    %c3 = arith.constant 3 : index
    %c0_19 = arith.constant 0 : index
    %c0_20 = arith.constant 0 : index
    %21 = vector.load %arg2[%c3, %c0_19, %c0_20] : memref<9x56x24xbf16, #tpu.memory_space<vmem>>, vector<1x56x24xbf16>
    %22 = vector.shape_cast %21 : vector<1x56x24xbf16> to vector<56x24xbf16>
    %cst_21 = arith.constant dense<0.000000e+00> : vector<56x256xf32>
    %23 = tpu.matmul %22, %20, %cst_21 {dimension_numbers = #tpu.dot_dimension_numbers<[1], [0], [0], [1], [0, 0, 1, 1], [], []>} : vector<56x24xbf16>, vector<24x256xbf16>, vector<56x256xf32> -> vector<56x256xf32>
    %24 = arith.addf %19, %23 : vector<56x256xf32>
    %c0_22 = arith.constant 0 : index
    %c128_23 = arith.constant 128 : index
    %25 = vector.load %arg16[%c0_22, %c128_23] : memref<56x512xbf16, #tpu.memory_space<vmem>>, vector<24x256xbf16>
    %c4 = arith.constant 4 : index
    %c0_24 = arith.constant 0 : index
    %c0_25 = arith.constant 0 : index
    %26 = vector.load %arg2[%c4, %c0_24, %c0_25] : memref<9x56x24xbf16, #tpu.memory_space<vmem>>, vector<1x56x24xbf16>
    %27 = vector.shape_cast %26 : vector<1x56x24xbf16> to vector<56x24xbf16>
    %cst_26 = arith.constant dense<0.000000e+00> : vector<56x256xf32>
    %28 = tpu.matmul %27, %25, %cst_26 {dimension_numbers = #tpu.dot_dimension_numbers<[1], [0], [0], [1], [0, 0, 1, 1], [], []>} : vector<56x24xbf16>, vector<24x256xbf16>, vector<56x256xf32> -> vector<56x256xf32>
    %29 = arith.addf %24, %28 : vector<56x256xf32>
    %c0_27 = arith.constant 0 : index
    %c129 = arith.constant 129 : index
    %30 = vector.load %arg16[%c0_27, %c129] : memref<56x512xbf16, #tpu.memory_space<vmem>>, vector<24x256xbf16>
    %c5 = arith.constant 5 : index
    %c0_28 = arith.constant 0 : index
    %c0_29 = arith.constant 0 : index
    %31 = vector.load %arg2[%c5, %c0_28, %c0_29] : memref<9x56x24xbf16, #tpu.memory_space<vmem>>, vector<1x56x24xbf16>
    %32 = vector.shape_cast %31 : vector<1x56x24xbf16> to vector<56x24xbf16>
    %cst_30 = arith.constant dense<0.000000e+00> : vector<56x256xf32>
    %33 = tpu.matmul %32, %30, %cst_30 {dimension_numbers = #tpu.dot_dimension_numbers<[1], [0], [0], [1], [0, 0, 1, 1], [], []>} : vector<56x24xbf16>, vector<24x256xbf16>, vector<56x256xf32> -> vector<56x256xf32>
    %34 = arith.addf %29, %33 : vector<56x256xf32>
    %c0_31 = arith.constant 0 : index
    %c130 = arith.constant 130 : index
    %35 = vector.load %arg16[%c0_31, %c130] : memref<56x512xbf16, #tpu.memory_space<vmem>>, vector<24x256xbf16>
    %c6 = arith.constant 6 : index
    %c0_32 = arith.constant 0 : index
    %c0_33 = arith.constant 0 : index
    %36 = vector.load %arg2[%c6, %c0_32, %c0_33] : memref<9x56x24xbf16, #tpu.memory_space<vmem>>, vector<1x56x24xbf16>
    %37 = vector.shape_cast %36 : vector<1x56x24xbf16> to vector<56x24xbf16>
    %cst_34 = arith.constant dense<0.000000e+00> : vector<56x256xf32>
    %38 = tpu.matmul %37, %35, %cst_34 {dimension_numbers = #tpu.dot_dimension_numbers<[1], [0], [0], [1], [0, 0, 1, 1], [], []>} : vector<56x24xbf16>, vector<24x256xbf16>, vector<56x256xf32> -> vector<56x256xf32>
    %39 = arith.addf %34, %38 : vector<56x256xf32>
    %c0_35 = arith.constant 0 : index
    %c131 = arith.constant 131 : index
    %40 = vector.load %arg16[%c0_35, %c131] : memref<56x512xbf16, #tpu.memory_space<vmem>>, vector<24x256xbf16>
    %c7 = arith.constant 7 : index
    %c0_36 = arith.constant 0 : index
    %c0_37 = arith.constant 0 : index
    %41 = vector.load %arg2[%c7, %c0_36, %c0_37] : memref<9x56x24xbf16, #tpu.memory_space<vmem>>, vector<1x56x24xbf16>
    %42 = vector.shape_cast %41 : vector<1x56x24xbf16> to vector<56x24xbf16>
    %cst_38 = arith.constant dense<0.000000e+00> : vector<56x256xf32>
    %43 = tpu.matmul %42, %40, %cst_38 {dimension_numbers = #tpu.dot_dimension_numbers<[1], [0], [0], [1], [0, 0, 1, 1], [], []>} : vector<56x24xbf16>, vector<24x256xbf16>, vector<56x256xf32> -> vector<56x256xf32>
    %44 = arith.addf %39, %43 : vector<56x256xf32>
    %c0_39 = arith.constant 0 : index
    %c132 = arith.constant 132 : index
    %45 = vector.load %arg16[%c0_39, %c132] : memref<56x512xbf16, #tpu.memory_space<vmem>>, vector<24x256xbf16>
    %c8 = arith.constant 8 : index
    %c0_40 = arith.constant 0 : index
    %c0_41 = arith.constant 0 : index
    %46 = vector.load %arg2[%c8, %c0_40, %c0_41] : memref<9x56x24xbf16, #tpu.memory_space<vmem>>, vector<1x56x24xbf16>
    %47 = vector.shape_cast %46 : vector<1x56x24xbf16> to vector<56x24xbf16>
    %cst_42 = arith.constant dense<0.000000e+00> : vector<56x256xf32>
    %48 = tpu.matmul %47, %45, %cst_42 {dimension_numbers = #tpu.dot_dimension_numbers<[1], [0], [0], [1], [0, 0, 1, 1], [], []>} : vector<56x24xbf16>, vector<24x256xbf16>, vector<56x256xf32> -> vector<56x256xf32>
    %49 = arith.addf %44, %48 : vector<56x256xf32>
    %c0_43 = arith.constant 0 : index
    %c0_44 = arith.constant 0 : index
    %50 = vector.load %arg3[%c0_43, %c0_44] : memref<56x1xf32, #tpu.memory_space<vmem>>, vector<56x1xf32>
    %51 = vector.broadcast %50 : vector<56x1xf32> to vector<56x256xf32>
    %52 = arith.addf %49, %51 : vector<56x256xf32>
    %cst_45 = arith.constant 0.000000e+00 : f32
    %53 = vector.broadcast %cst_45 : f32 to vector<56x256xf32>
    %54 = arith.maximumf %52, %53 : vector<56x256xf32>
    %55 = vector.extract_strided_slice %54 {offsets = [0, 0], sizes = [56, 255], strides = [1, 1]} : vector<56x256xf32> to vector<56x255xf32>
    %56 = arith.truncf %55 : vector<56x255xf32> to vector<56x255xbf16>
    %c0_46 = arith.constant 0 : index
    %c128_47 = arith.constant 128 : index
    %57 = vector.load %arg16[%c0_46, %c128_47] : memref<56x512xbf16, #tpu.memory_space<vmem>>, vector<56x255xbf16>
    tpu.vector_store %arg16[%c0_46, %c128_47], %56 {strides = array<i32>} : memref<56x512xbf16, #tpu.memory_space<vmem>>, vector<56x255xbf16>,
    %c0_48 = arith.constant 0 : index
    %c124_49 = arith.constant 124 : index
    %58 = vector.load %arg16[%c0_48, %c124_49] : memref<56x512xbf16, #tpu.memory_space<vmem>>, vector<56x256xbf16>
    %c0_50 = arith.constant 0 : index
    %c0_51 = arith.constant 0 : index
    %c0_52 = arith.constant 0 : index
    %59 = vector.load %arg4[%c0_50, %c0_51, %c0_52] : memref<9x56x56xbf16, #tpu.memory_space<vmem>>, vector<1x56x56xbf16>
    %60 = vector.shape_cast %59 : vector<1x56x56xbf16> to vector<56x56xbf16>
    %cst_53 = arith.constant dense<0.000000e+00> : vector<56x256xf32>
    %61 = tpu.matmul %60, %58, %cst_53 {dimension_numbers = #tpu.dot_dimension_numbers<[1], [0], [0], [1], [0, 0, 1, 1], [], []>} : vector<56x56xbf16>, vector<56x256xbf16>, vector<56x256xf32> -> vector<56x256xf32>
    %c0_54 = arith.constant 0 : index
    %c125_55 = arith.constant 125 : index
    %62 = vector.load %arg16[%c0_54, %c125_55] : memref<56x512xbf16, #tpu.memory_space<vmem>>, vector<56x256xbf16>
    %c1_56 = arith.constant 1 : index
    %c0_57 = arith.constant 0 : index
    %c0_58 = arith.constant 0 : index
    %63 = vector.load %arg4[%c1_56, %c0_57, %c0_58] : memref<9x56x56xbf16, #tpu.memory_space<vmem>>, vector<1x56x56xbf16>
    %64 = vector.shape_cast %63 : vector<1x56x56xbf16> to vector<56x56xbf16>
    %cst_59 = arith.constant dense<0.000000e+00> : vector<56x256xf32>
    %65 = tpu.matmul %64, %62, %cst_59 {dimension_numbers = #tpu.dot_dimension_numbers<[1], [0], [0], [1], [0, 0, 1, 1], [], []>} : vector<56x56xbf16>, vector<56x256xbf16>, vector<56x256xf32> -> vector<56x256xf32>
    %66 = arith.addf %61, %65 : vector<56x256xf32>
    %c0_60 = arith.constant 0 : index
    %c126_61 = arith.constant 126 : index
    %67 = vector.load %arg16[%c0_60, %c126_61] : memref<56x512xbf16, #tpu.memory_space<vmem>>, vector<56x256xbf16>
    %c2_62 = arith.constant 2 : index
    %c0_63 = arith.constant 0 : index
    %c0_64 = arith.constant 0 : index
    %68 = vector.load %arg4[%c2_62, %c0_63, %c0_64] : memref<9x56x56xbf16, #tpu.memory_space<vmem>>, vector<1x56x56xbf16>
    %69 = vector.shape_cast %68 : vector<1x56x56xbf16> to vector<56x56xbf16>
    %cst_65 = arith.constant dense<0.000000e+00> : vector<56x256xf32>
    %70 = tpu.matmul %69, %67, %cst_65 {dimension_numbers = #tpu.dot_dimension_numbers<[1], [0], [0], [1], [0, 0, 1, 1], [], []>} : vector<56x56xbf16>, vector<56x256xbf16>, vector<56x256xf32> -> vector<56x256xf32>
    %71 = arith.addf %66, %70 : vector<56x256xf32>
    %c0_66 = arith.constant 0 : index
    %c127_67 = arith.constant 127 : index
    %72 = vector.load %arg16[%c0_66, %c127_67] : memref<56x512xbf16, #tpu.memory_space<vmem>>, vector<56x256xbf16>
    %c3_68 = arith.constant 3 : index
    %c0_69 = arith.constant 0 : index
    %c0_70 = arith.constant 0 : index
    %73 = vector.load %arg4[%c3_68, %c0_69, %c0_70] : memref<9x56x56xbf16, #tpu.memory_space<vmem>>, vector<1x56x56xbf16>
    %74 = vector.shape_cast %73 : vector<1x56x56xbf16> to vector<56x56xbf16>
    %cst_71 = arith.constant dense<0.000000e+00> : vector<56x256xf32>
    %75 = tpu.matmul %74, %72, %cst_71 {dimension_numbers = #tpu.dot_dimension_numbers<[1], [0], [0], [1], [0, 0, 1, 1], [], []>} : vector<56x56xbf16>, vector<56x256xbf16>, vector<56x256xf32> -> vector<56x256xf32>
    %76 = arith.addf %71, %75 : vector<56x256xf32>
    %c0_72 = arith.constant 0 : index
    %c128_73 = arith.constant 128 : index
    %77 = vector.load %arg16[%c0_72, %c128_73] : memref<56x512xbf16, #tpu.memory_space<vmem>>, vector<56x256xbf16>
    %c4_74 = arith.constant 4 : index
    %c0_75 = arith.constant 0 : index
    %c0_76 = arith.constant 0 : index
    %78 = vector.load %arg4[%c4_74, %c0_75, %c0_76] : memref<9x56x56xbf16, #tpu.memory_space<vmem>>, vector<1x56x56xbf16>
    %79 = vector.shape_cast %78 : vector<1x56x56xbf16> to vector<56x56xbf16>
    %cst_77 = arith.constant dense<0.000000e+00> : vector<56x256xf32>
    %80 = tpu.matmul %79, %77, %cst_77 {dimension_numbers = #tpu.dot_dimension_numbers<[1], [0], [0], [1], [0, 0, 1, 1], [], []>} : vector<56x56xbf16>, vector<56x256xbf16>, vector<56x256xf32> -> vector<56x256xf32>
    %81 = arith.addf %76, %80 : vector<56x256xf32>
    %c0_78 = arith.constant 0 : index
    %c129_79 = arith.constant 129 : index
    %82 = vector.load %arg16[%c0_78, %c129_79] : memref<56x512xbf16, #tpu.memory_space<vmem>>, vector<56x256xbf16>
    %c5_80 = arith.constant 5 : index
    %c0_81 = arith.constant 0 : index
    %c0_82 = arith.constant 0 : index
    %83 = vector.load %arg4[%c5_80, %c0_81, %c0_82] : memref<9x56x56xbf16, #tpu.memory_space<vmem>>, vector<1x56x56xbf16>
    %84 = vector.shape_cast %83 : vector<1x56x56xbf16> to vector<56x56xbf16>
    %cst_83 = arith.constant dense<0.000000e+00> : vector<56x256xf32>
    %85 = tpu.matmul %84, %82, %cst_83 {dimension_numbers = #tpu.dot_dimension_numbers<[1], [0], [0], [1], [0, 0, 1, 1], [], []>} : vector<56x56xbf16>, vector<56x256xbf16>, vector<56x256xf32> -> vector<56x256xf32>
    %86 = arith.addf %81, %85 : vector<56x256xf32>
    %c0_84 = arith.constant 0 : index
    %c130_85 = arith.constant 130 : index
    %87 = vector.load %arg16[%c0_84, %c130_85] : memref<56x512xbf16, #tpu.memory_space<vmem>>, vector<56x256xbf16>
    %c6_86 = arith.constant 6 : index
    %c0_87 = arith.constant 0 : index
    %c0_88 = arith.constant 0 : index
    %88 = vector.load %arg4[%c6_86, %c0_87, %c0_88] : memref<9x56x56xbf16, #tpu.memory_space<vmem>>, vector<1x56x56xbf16>
    %89 = vector.shape_cast %88 : vector<1x56x56xbf16> to vector<56x56xbf16>
    %cst_89 = arith.constant dense<0.000000e+00> : vector<56x256xf32>
    %90 = tpu.matmul %89, %87, %cst_89 {dimension_numbers = #tpu.dot_dimension_numbers<[1], [0], [0], [1], [0, 0, 1, 1], [], []>} : vector<56x56xbf16>, vector<56x256xbf16>, vector<56x256xf32> -> vector<56x256xf32>
    %91 = arith.addf %86, %90 : vector<56x256xf32>
    %c0_90 = arith.constant 0 : index
    %c131_91 = arith.constant 131 : index
    %92 = vector.load %arg16[%c0_90, %c131_91] : memref<56x512xbf16, #tpu.memory_space<vmem>>, vector<56x256xbf16>
    %c7_92 = arith.constant 7 : index
    %c0_93 = arith.constant 0 : index
    %c0_94 = arith.constant 0 : index
    %93 = vector.load %arg4[%c7_92, %c0_93, %c0_94] : memref<9x56x56xbf16, #tpu.memory_space<vmem>>, vector<1x56x56xbf16>
    %94 = vector.shape_cast %93 : vector<1x56x56xbf16> to vector<56x56xbf16>
    %cst_95 = arith.constant dense<0.000000e+00> : vector<56x256xf32>
    %95 = tpu.matmul %94, %92, %cst_95 {dimension_numbers = #tpu.dot_dimension_numbers<[1], [0], [0], [1], [0, 0, 1, 1], [], []>} : vector<56x56xbf16>, vector<56x256xbf16>, vector<56x256xf32> -> vector<56x256xf32>
    %96 = arith.addf %91, %95 : vector<56x256xf32>
    %c0_96 = arith.constant 0 : index
    %c132_97 = arith.constant 132 : index
    %97 = vector.load %arg16[%c0_96, %c132_97] : memref<56x512xbf16, #tpu.memory_space<vmem>>, vector<56x256xbf16>
    %c8_98 = arith.constant 8 : index
    %c0_99 = arith.constant 0 : index
    %c0_100 = arith.constant 0 : index
    %98 = vector.load %arg4[%c8_98, %c0_99, %c0_100] : memref<9x56x56xbf16, #tpu.memory_space<vmem>>, vector<1x56x56xbf16>
    %99 = vector.shape_cast %98 : vector<1x56x56xbf16> to vector<56x56xbf16>
    %cst_101 = arith.constant dense<0.000000e+00> : vector<56x256xf32>
    %100 = tpu.matmul %99, %97, %cst_101 {dimension_numbers = #tpu.dot_dimension_numbers<[1], [0], [0], [1], [0, 0, 1, 1], [], []>} : vector<56x56xbf16>, vector<56x256xbf16>, vector<56x256xf32> -> vector<56x256xf32>
    %101 = arith.addf %96, %100 : vector<56x256xf32>
    %c0_102 = arith.constant 0 : index
    %c0_103 = arith.constant 0 : index
    %102 = vector.load %arg5[%c0_102, %c0_103] : memref<56x1xf32, #tpu.memory_space<vmem>>, vector<56x1xf32>
    %103 = vector.broadcast %102 : vector<56x1xf32> to vector<56x256xf32>
    %104 = arith.addf %101, %103 : vector<56x256xf32>
    %cst_104 = arith.constant 0.000000e+00 : f32
    %105 = vector.broadcast %cst_104 : f32 to vector<56x256xf32>
    %106 = arith.maximumf %104, %105 : vector<56x256xf32>
    %107 = arith.truncf %106 : vector<56x256xf32> to vector<56x256xbf16>
    %c0_105 = arith.constant 0 : index
    %c0_106 = arith.constant 0 : index
    %c0_107 = arith.constant 0 : index
    %108 = vector.load %arg10[%c0_105, %c0_106, %c0_107] : memref<3x256x96xbf16, #tpu.memory_space<vmem>>, vector<1x256x96xbf16>
    %109 = vector.shape_cast %108 : vector<1x256x96xbf16> to vector<256x96xbf16>
    %cst_108 = arith.constant dense<0.000000e+00> : vector<56x96xf32>
    %110 = tpu.matmul %107, %109, %cst_108 {dimension_numbers = #tpu.dot_dimension_numbers<[1], [0], [0], [1], [0, 0, 1, 1], [], []>} : vector<56x256xbf16>, vector<256x96xbf16>, vector<56x96xf32> -> vector<56x96xf32>
    %c1_109 = arith.constant 1 : index
    %c0_110 = arith.constant 0 : index
    %c0_111 = arith.constant 0 : index
    %111 = vector.load %arg10[%c1_109, %c0_110, %c0_111] : memref<3x256x96xbf16, #tpu.memory_space<vmem>>, vector<1x256x96xbf16>
    %112 = vector.shape_cast %111 : vector<1x256x96xbf16> to vector<256x96xbf16>
    %cst_112 = arith.constant dense<0.000000e+00> : vector<56x96xf32>
    %113 = tpu.matmul %107, %112, %cst_112 {dimension_numbers = #tpu.dot_dimension_numbers<[1], [0], [0], [1], [0, 0, 1, 1], [], []>} : vector<56x256xbf16>, vector<256x96xbf16>, vector<56x96xf32> -> vector<56x96xf32>
    %c2_113 = arith.constant 2 : index
    %c0_114 = arith.constant 0 : index
    %c0_115 = arith.constant 0 : index
    %114 = vector.load %arg10[%c2_113, %c0_114, %c0_115] : memref<3x256x96xbf16, #tpu.memory_space<vmem>>, vector<1x256x96xbf16>
    %115 = vector.shape_cast %114 : vector<1x256x96xbf16> to vector<256x96xbf16>
    %cst_116 = arith.constant dense<0.000000e+00> : vector<56x96xf32>
    %116 = tpu.matmul %107, %115, %cst_116 {dimension_numbers = #tpu.dot_dimension_numbers<[1], [0], [0], [1], [0, 0, 1, 1], [], []>} : vector<56x256xbf16>, vector<256x96xbf16>, vector<56x96xf32> -> vector<56x96xf32>
    %117 = arith.maximumf %110, %113 : vector<56x96xf32>
    %118 = arith.maximumf %117, %116 : vector<56x96xf32>
    %119 = arith.truncf %118 : vector<56x96xf32> to vector<56x96xbf16>
    %c0_117 = arith.constant 0 : index
    %c128_118 = arith.constant 128 : index
    %120 = vector.load %arg16[%c0_117, %c128_118] : memref<56x512xbf16, #tpu.memory_space<vmem>>, vector<56x96xbf16>
    tpu.vector_store %arg16[%c0_117, %c128_118], %119 {strides = array<i32>} : memref<56x512xbf16, #tpu.memory_space<vmem>>, vector<56x96xbf16>,
    %c0_119 = arith.constant 0 : index
    %c125_120 = arith.constant 125 : index
    %121 = vector.load %arg16[%c0_119, %c125_120] : memref<56x512xbf16, #tpu.memory_space<vmem>>, vector<56x85xbf16>
    %c0_121 = arith.constant 0 : index
    %c0_122 = arith.constant 0 : index
    %c0_123 = arith.constant 0 : index
    %122 = vector.load %arg6[%c0_121, %c0_122, %c0_123] : memref<7x16x56xbf16, #tpu.memory_space<vmem>>, vector<1x16x56xbf16>
    %123 = vector.shape_cast %122 : vector<1x16x56xbf16> to vector<16x56xbf16>
    %cst_124 = arith.constant dense<0.000000e+00> : vector<16x85xf32>
    %124 = tpu.matmul %123, %121, %cst_124 {dimension_numbers = #tpu.dot_dimension_numbers<[1], [0], [0], [1], [0, 0, 1, 1], [], []>} : vector<16x56xbf16>, vector<56x85xbf16>, vector<16x85xf32> -> vector<16x85xf32>
    %c0_125 = arith.constant 0 : index
    %c126_126 = arith.constant 126 : index
    %125 = vector.load %arg16[%c0_125, %c126_126] : memref<56x512xbf16, #tpu.memory_space<vmem>>, vector<56x85xbf16>
    %c1_127 = arith.constant 1 : index
    %c0_128 = arith.constant 0 : index
    %c0_129 = arith.constant 0 : index
    %126 = vector.load %arg6[%c1_127, %c0_128, %c0_129] : memref<7x16x56xbf16, #tpu.memory_space<vmem>>, vector<1x16x56xbf16>
    %127 = vector.shape_cast %126 : vector<1x16x56xbf16> to vector<16x56xbf16>
    %cst_130 = arith.constant dense<0.000000e+00> : vector<16x85xf32>
    %128 = tpu.matmul %127, %125, %cst_130 {dimension_numbers = #tpu.dot_dimension_numbers<[1], [0], [0], [1], [0, 0, 1, 1], [], []>} : vector<16x56xbf16>, vector<56x85xbf16>, vector<16x85xf32> -> vector<16x85xf32>
    %129 = arith.addf %124, %128 : vector<16x85xf32>
    %c0_131 = arith.constant 0 : index
    %c127_132 = arith.constant 127 : index
    %130 = vector.load %arg16[%c0_131, %c127_132] : memref<56x512xbf16, #tpu.memory_space<vmem>>, vector<56x85xbf16>
    %c2_133 = arith.constant 2 : index
    %c0_134 = arith.constant 0 : index
    %c0_135 = arith.constant 0 : index
    %131 = vector.load %arg6[%c2_133, %c0_134, %c0_135] : memref<7x16x56xbf16, #tpu.memory_space<vmem>>, vector<1x16x56xbf16>
    %132 = vector.shape_cast %131 : vector<1x16x56xbf16> to vector<16x56xbf16>
    %cst_136 = arith.constant dense<0.000000e+00> : vector<16x85xf32>
    %133 = tpu.matmul %132, %130, %cst_136 {dimension_numbers = #tpu.dot_dimension_numbers<[1], [0], [0], [1], [0, 0, 1, 1], [], []>} : vector<16x56xbf16>, vector<56x85xbf16>, vector<16x85xf32> -> vector<16x85xf32>
    %134 = arith.addf %129, %133 : vector<16x85xf32>
    %c0_137 = arith.constant 0 : index
    %c128_138 = arith.constant 128 : index
    %135 = vector.load %arg16[%c0_137, %c128_138] : memref<56x512xbf16, #tpu.memory_space<vmem>>, vector<56x85xbf16>
    %c3_139 = arith.constant 3 : index
    %c0_140 = arith.constant 0 : index
    %c0_141 = arith.constant 0 : index
    %136 = vector.load %arg6[%c3_139, %c0_140, %c0_141] : memref<7x16x56xbf16, #tpu.memory_space<vmem>>, vector<1x16x56xbf16>
    %137 = vector.shape_cast %136 : vector<1x16x56xbf16> to vector<16x56xbf16>
    %cst_142 = arith.constant dense<0.000000e+00> : vector<16x85xf32>
    %138 = tpu.matmul %137, %135, %cst_142 {dimension_numbers = #tpu.dot_dimension_numbers<[1], [0], [0], [1], [0, 0, 1, 1], [], []>} : vector<16x56xbf16>, vector<56x85xbf16>, vector<16x85xf32> -> vector<16x85xf32>
    %139 = arith.addf %134, %138 : vector<16x85xf32>
    %c0_143 = arith.constant 0 : index
    %c129_144 = arith.constant 129 : index
    %140 = vector.load %arg16[%c0_143, %c129_144] : memref<56x512xbf16, #tpu.memory_space<vmem>>, vector<56x85xbf16>
    %c4_145 = arith.constant 4 : index
    %c0_146 = arith.constant 0 : index
    %c0_147 = arith.constant 0 : index
    %141 = vector.load %arg6[%c4_145, %c0_146, %c0_147] : memref<7x16x56xbf16, #tpu.memory_space<vmem>>, vector<1x16x56xbf16>
    %142 = vector.shape_cast %141 : vector<1x16x56xbf16> to vector<16x56xbf16>
    %cst_148 = arith.constant dense<0.000000e+00> : vector<16x85xf32>
    %143 = tpu.matmul %142, %140, %cst_148 {dimension_numbers = #tpu.dot_dimension_numbers<[1], [0], [0], [1], [0, 0, 1, 1], [], []>} : vector<16x56xbf16>, vector<56x85xbf16>, vector<16x85xf32> -> vector<16x85xf32>
    %144 = arith.addf %139, %143 : vector<16x85xf32>
    %c0_149 = arith.constant 0 : index
    %c130_150 = arith.constant 130 : index
    %145 = vector.load %arg16[%c0_149, %c130_150] : memref<56x512xbf16, #tpu.memory_space<vmem>>, vector<56x85xbf16>
    %c5_151 = arith.constant 5 : index
    %c0_152 = arith.constant 0 : index
    %c0_153 = arith.constant 0 : index
    %146 = vector.load %arg6[%c5_151, %c0_152, %c0_153] : memref<7x16x56xbf16, #tpu.memory_space<vmem>>, vector<1x16x56xbf16>
    %147 = vector.shape_cast %146 : vector<1x16x56xbf16> to vector<16x56xbf16>
    %cst_154 = arith.constant dense<0.000000e+00> : vector<16x85xf32>
    %148 = tpu.matmul %147, %145, %cst_154 {dimension_numbers = #tpu.dot_dimension_numbers<[1], [0], [0], [1], [0, 0, 1, 1], [], []>} : vector<16x56xbf16>, vector<56x85xbf16>, vector<16x85xf32> -> vector<16x85xf32>
    %149 = arith.addf %144, %148 : vector<16x85xf32>
    %c0_155 = arith.constant 0 : index
    %c131_156 = arith.constant 131 : index
    %150 = vector.load %arg16[%c0_155, %c131_156] : memref<56x512xbf16, #tpu.memory_space<vmem>>, vector<56x85xbf16>
    %c6_157 = arith.constant 6 : index
    %c0_158 = arith.constant 0 : index
    %c0_159 = arith.constant 0 : index
    %151 = vector.load %arg6[%c6_157, %c0_158, %c0_159] : memref<7x16x56xbf16, #tpu.memory_space<vmem>>, vector<1x16x56xbf16>
    %152 = vector.shape_cast %151 : vector<1x16x56xbf16> to vector<16x56xbf16>
    %cst_160 = arith.constant dense<0.000000e+00> : vector<16x85xf32>
    %153 = tpu.matmul %152, %150, %cst_160 {dimension_numbers = #tpu.dot_dimension_numbers<[1], [0], [0], [1], [0, 0, 1, 1], [], []>} : vector<16x56xbf16>, vector<56x85xbf16>, vector<16x85xf32> -> vector<16x85xf32>
    %154 = arith.addf %149, %153 : vector<16x85xf32>
    %c0_161 = arith.constant 0 : index
    %c0_162 = arith.constant 0 : index
    %155 = vector.load %arg7[%c0_161, %c0_162] : memref<16x1xf32, #tpu.memory_space<vmem>>, vector<16x1xf32>
    %156 = vector.broadcast %155 : vector<16x1xf32> to vector<16x85xf32>
    %157 = arith.addf %154, %156 : vector<16x85xf32>
    %cst_163 = arith.constant 0.000000e+00 : f32
    %158 = vector.broadcast %cst_163 : f32 to vector<16x85xf32>
    %159 = arith.maximumf %157, %158 : vector<16x85xf32>
    %160 = arith.truncf %159 : vector<16x85xf32> to vector<16x85xbf16>
    %c0_164 = arith.constant 0 : index
    %c128_165 = arith.constant 128 : index
    %161 = vector.load %arg16[%c0_164, %c128_165] : memref<56x512xbf16, #tpu.memory_space<vmem>>, vector<16x85xbf16>
    tpu.vector_store %arg16[%c0_164, %c128_165], %160 {strides = array<i32>} : memref<56x512xbf16, #tpu.memory_space<vmem>>, vector<16x85xbf16>,
    %c0_166 = arith.constant 0 : index
    %c125_167 = arith.constant 125 : index
    %162 = vector.load %arg16[%c0_166, %c125_167] : memref<56x512xbf16, #tpu.memory_space<vmem>>, vector<16x85xbf16>
    %c0_168 = arith.constant 0 : index
    %c0_169 = arith.constant 0 : index
    %c0_170 = arith.constant 0 : index
    %163 = vector.load %arg8[%c0_168, %c0_169, %c0_170] : memref<7x8x16xbf16, #tpu.memory_space<vmem>>, vector<1x8x16xbf16>
    %164 = vector.shape_cast %163 : vector<1x8x16xbf16> to vector<8x16xbf16>
    %cst_171 = arith.constant dense<0.000000e+00> : vector<8x85xf32>
    %165 = tpu.matmul %164, %162, %cst_171 {dimension_numbers = #tpu.dot_dimension_numbers<[1], [0], [0], [1], [0, 0, 1, 1], [], []>} : vector<8x16xbf16>, vector<16x85xbf16>, vector<8x85xf32> -> vector<8x85xf32>
    %c0_172 = arith.constant 0 : index
    %c126_173 = arith.constant 126 : index
    %166 = vector.load %arg16[%c0_172, %c126_173] : memref<56x512xbf16, #tpu.memory_space<vmem>>, vector<16x85xbf16>
    %c1_174 = arith.constant 1 : index
    %c0_175 = arith.constant 0 : index
    %c0_176 = arith.constant 0 : index
    %167 = vector.load %arg8[%c1_174, %c0_175, %c0_176] : memref<7x8x16xbf16, #tpu.memory_space<vmem>>, vector<1x8x16xbf16>
    %168 = vector.shape_cast %167 : vector<1x8x16xbf16> to vector<8x16xbf16>
    %cst_177 = arith.constant dense<0.000000e+00> : vector<8x85xf32>
    %169 = tpu.matmul %168, %166, %cst_177 {dimension_numbers = #tpu.dot_dimension_numbers<[1], [0], [0], [1], [0, 0, 1, 1], [], []>} : vector<8x16xbf16>, vector<16x85xbf16>, vector<8x85xf32> -> vector<8x85xf32>
    %170 = arith.addf %165, %169 : vector<8x85xf32>
    %c0_178 = arith.constant 0 : index
    %c127_179 = arith.constant 127 : index
    %171 = vector.load %arg16[%c0_178, %c127_179] : memref<56x512xbf16, #tpu.memory_space<vmem>>, vector<16x85xbf16>
    %c2_180 = arith.constant 2 : index
    %c0_181 = arith.constant 0 : index
    %c0_182 = arith.constant 0 : index
    %172 = vector.load %arg8[%c2_180, %c0_181, %c0_182] : memref<7x8x16xbf16, #tpu.memory_space<vmem>>, vector<1x8x16xbf16>
    %173 = vector.shape_cast %172 : vector<1x8x16xbf16> to vector<8x16xbf16>
    %cst_183 = arith.constant dense<0.000000e+00> : vector<8x85xf32>
    %174 = tpu.matmul %173, %171, %cst_183 {dimension_numbers = #tpu.dot_dimension_numbers<[1], [0], [0], [1], [0, 0, 1, 1], [], []>} : vector<8x16xbf16>, vector<16x85xbf16>, vector<8x85xf32> -> vector<8x85xf32>
    %175 = arith.addf %170, %174 : vector<8x85xf32>
    %c0_184 = arith.constant 0 : index
    %c128_185 = arith.constant 128 : index
    %176 = vector.load %arg16[%c0_184, %c128_185] : memref<56x512xbf16, #tpu.memory_space<vmem>>, vector<16x85xbf16>
    %c3_186 = arith.constant 3 : index
    %c0_187 = arith.constant 0 : index
    %c0_188 = arith.constant 0 : index
    %177 = vector.load %arg8[%c3_186, %c0_187, %c0_188] : memref<7x8x16xbf16, #tpu.memory_space<vmem>>, vector<1x8x16xbf16>
    %178 = vector.shape_cast %177 : vector<1x8x16xbf16> to vector<8x16xbf16>
    %cst_189 = arith.constant dense<0.000000e+00> : vector<8x85xf32>
    %179 = tpu.matmul %178, %176, %cst_189 {dimension_numbers = #tpu.dot_dimension_numbers<[1], [0], [0], [1], [0, 0, 1, 1], [], []>} : vector<8x16xbf16>, vector<16x85xbf16>, vector<8x85xf32> -> vector<8x85xf32>
    %180 = arith.addf %175, %179 : vector<8x85xf32>
    %c0_190 = arith.constant 0 : index
    %c129_191 = arith.constant 129 : index
    %181 = vector.load %arg16[%c0_190, %c129_191] : memref<56x512xbf16, #tpu.memory_space<vmem>>, vector<16x85xbf16>
    %c4_192 = arith.constant 4 : index
    %c0_193 = arith.constant 0 : index
    %c0_194 = arith.constant 0 : index
    %182 = vector.load %arg8[%c4_192, %c0_193, %c0_194] : memref<7x8x16xbf16, #tpu.memory_space<vmem>>, vector<1x8x16xbf16>
    %183 = vector.shape_cast %182 : vector<1x8x16xbf16> to vector<8x16xbf16>
    %cst_195 = arith.constant dense<0.000000e+00> : vector<8x85xf32>
    %184 = tpu.matmul %183, %181, %cst_195 {dimension_numbers = #tpu.dot_dimension_numbers<[1], [0], [0], [1], [0, 0, 1, 1], [], []>} : vector<8x16xbf16>, vector<16x85xbf16>, vector<8x85xf32> -> vector<8x85xf32>
    %185 = arith.addf %180, %184 : vector<8x85xf32>
    %c0_196 = arith.constant 0 : index
    %c130_197 = arith.constant 130 : index
    %186 = vector.load %arg16[%c0_196, %c130_197] : memref<56x512xbf16, #tpu.memory_space<vmem>>, vector<16x85xbf16>
    %c5_198 = arith.constant 5 : index
    %c0_199 = arith.constant 0 : index
    %c0_200 = arith.constant 0 : index
    %187 = vector.load %arg8[%c5_198, %c0_199, %c0_200] : memref<7x8x16xbf16, #tpu.memory_space<vmem>>, vector<1x8x16xbf16>
    %188 = vector.shape_cast %187 : vector<1x8x16xbf16> to vector<8x16xbf16>
    %cst_201 = arith.constant dense<0.000000e+00> : vector<8x85xf32>
    %189 = tpu.matmul %188, %186, %cst_201 {dimension_numbers = #tpu.dot_dimension_numbers<[1], [0], [0], [1], [0, 0, 1, 1], [], []>} : vector<8x16xbf16>, vector<16x85xbf16>, vector<8x85xf32> -> vector<8x85xf32>
    %190 = arith.addf %185, %189 : vector<8x85xf32>
    %c0_202 = arith.constant 0 : index
    %c131_203 = arith.constant 131 : index
    %191 = vector.load %arg16[%c0_202, %c131_203] : memref<56x512xbf16, #tpu.memory_space<vmem>>, vector<16x85xbf16>
    %c6_204 = arith.constant 6 : index
    %c0_205 = arith.constant 0 : index
    %c0_206 = arith.constant 0 : index
    %192 = vector.load %arg8[%c6_204, %c0_205, %c0_206] : memref<7x8x16xbf16, #tpu.memory_space<vmem>>, vector<1x8x16xbf16>
    %193 = vector.shape_cast %192 : vector<1x8x16xbf16> to vector<8x16xbf16>
    %cst_207 = arith.constant dense<0.000000e+00> : vector<8x85xf32>
    %194 = tpu.matmul %193, %191, %cst_207 {dimension_numbers = #tpu.dot_dimension_numbers<[1], [0], [0], [1], [0, 0, 1, 1], [], []>} : vector<8x16xbf16>, vector<16x85xbf16>, vector<8x85xf32> -> vector<8x85xf32>
    %195 = arith.addf %190, %194 : vector<8x85xf32>
    %c0_208 = arith.constant 0 : index
    %c0_209 = arith.constant 0 : index
    %196 = vector.load %arg9[%c0_208, %c0_209] : memref<8x1xf32, #tpu.memory_space<vmem>>, vector<8x1xf32>
    %197 = vector.broadcast %196 : vector<8x1xf32> to vector<8x85xf32>
    %198 = arith.addf %195, %197 : vector<8x85xf32>
    %cst_210 = arith.constant 0.000000e+00 : f32
    %199 = vector.broadcast %cst_210 : f32 to vector<8x85xf32>
    %200 = arith.maximumf %198, %199 : vector<8x85xf32>
    %201 = vector.extract_strided_slice %200 {offsets = [0, 0], sizes = [1, 85], strides = [1, 1]} : vector<8x85xf32> to vector<1x85xf32>
    %c0_211 = arith.constant 0 : index
    %c0_212 = arith.constant 0 : index
    %202 = vector.load %arg11[%c0_211, %c0_212] : memref<85x10xf32, #tpu.memory_space<vmem>>, vector<85x10xf32>
    %cst_213 = arith.constant dense<0.000000e+00> : vector<1x10xf32>
    %203 = tpu.matmul %201, %202, %cst_213 {dimension_numbers = #tpu.dot_dimension_numbers<[1], [0], [0], [1], [0, 0, 1, 1], [], []>} : vector<1x85xf32>, vector<85x10xf32>, vector<1x10xf32> -> vector<1x10xf32>
    %c0_214 = arith.constant 0 : index
    %c0_215 = arith.constant 0 : index
    %204 = vector.load %arg12[%c0_214, %c0_215] : memref<1x10xf32, #tpu.memory_space<vmem>>, vector<1x10xf32>
    %205 = arith.addf %203, %204 : vector<1x10xf32>
    %cst_216 = arith.constant 0.000000e+00 : f32
    %206 = vector.broadcast %cst_216 : f32 to vector<1x10xf32>
    %207 = arith.maximumf %205, %206 : vector<1x10xf32>
    %c0_217 = arith.constant 0 : index
    %c0_218 = arith.constant 0 : index
    %208 = vector.load %arg13[%c0_217, %c0_218] : memref<10x1xf32, #tpu.memory_space<vmem>>, vector<10x1xf32>
    %cst_219 = arith.constant dense<0.000000e+00> : vector<1x1xf32>
    %209 = tpu.matmul %207, %208, %cst_219 {dimension_numbers = #tpu.dot_dimension_numbers<[1], [0], [0], [1], [0, 0, 1, 1], [], []>} : vector<1x10xf32>, vector<10x1xf32>, vector<1x1xf32> -> vector<1x1xf32>
    %c0_220 = arith.constant 0 : index
    %c0_221 = arith.constant 0 : index
    %210 = vector.load %arg14[%c0_220, %c0_221] : memref<1x1xf32, #tpu.memory_space<vmem>>, vector<1x1xf32>
    %211 = arith.addf %209, %210 : vector<1x1xf32>
    %cst_222 = arith.constant 0.000000e+00 : f32
    %212 = vector.broadcast %cst_222 : f32 to vector<1x1xf32>
    %213 = arith.subf %212, %211 : vector<1x1xf32>
    %214 = math.exp %213 : vector<1x1xf32>
    %cst_223 = arith.constant 1.000000e+00 : f32
    %215 = vector.broadcast %cst_223 : f32 to vector<1x1xf32>
    %216 = arith.addf %215, %214 : vector<1x1xf32>
    %217 = tpu.reciprocal %216 {approx = true} : vector<1x1xf32> -> vector<1x1xf32>
    %c0_224 = arith.constant 0 : index
    %c0_225 = arith.constant 0 : index
    %c0_226 = arith.constant 0 : index
    %218 = vector.load %arg15[%c0_224, %c0_225, %c0_226] : memref<1x1x1xf32, #tpu.memory_space<vmem>>, vector<1x1x1xf32>
    %219 = vector.shape_cast %218 : vector<1x1x1xf32> to vector<1x1xf32>
    %220 = vector.shape_cast %217 : vector<1x1xf32> to vector<1x1x1xf32>
    tpu.vector_store %arg15[%c0_224, %c0_225, %c0_226], %220 {strides = array<i32>} : memref<1x1x1xf32, #tpu.memory_space<vmem>>, vector<1x1x1xf32>,
    return
  }
  func.func @transform_0(%arg0: i32) -> (i32, i32, i32) {
    %c0_i32 = arith.constant 0 : i32
    %c0_i32_0 = arith.constant 0 : i32
    %c0_i32_1 = arith.constant 0 : i32
    return %arg0, %c0_i32, %c0_i32_0 : i32, i32, i32
  }
  func.func @transform_1(%arg0: i32) -> (i32, i32, i32) {
    %c0_i32 = arith.constant 0 : i32
    %c0_i32_0 = arith.constant 0 : i32
    %c0_i32_1 = arith.constant 0 : i32
    %c0_i32_2 = arith.constant 0 : i32
    return %c0_i32, %c0_i32_0, %c0_i32_1 : i32, i32, i32
  }
  func.func @transform_2(%arg0: i32) -> (i32, i32) {
    %c0_i32 = arith.constant 0 : i32
    %c0_i32_0 = arith.constant 0 : i32
    %c0_i32_1 = arith.constant 0 : i32
    return %c0_i32, %c0_i32_0 : i32, i32
  }
  func.func @transform_3(%arg0: i32) -> (i32, i32, i32) {
    %c0_i32 = arith.constant 0 : i32
    %c0_i32_0 = arith.constant 0 : i32
    %c0_i32_1 = arith.constant 0 : i32
    %c0_i32_2 = arith.constant 0 : i32
    return %c0_i32, %c0_i32_0, %c0_i32_1 : i32, i32, i32
  }
  func.func @transform_4(%arg0: i32) -> (i32, i32) {
    %c0_i32 = arith.constant 0 : i32
    %c0_i32_0 = arith.constant 0 : i32
    %c0_i32_1 = arith.constant 0 : i32
    return %c0_i32, %c0_i32_0 : i32, i32
  }
  func.func @transform_5(%arg0: i32) -> (i32, i32, i32) {
    %c0_i32 = arith.constant 0 : i32
    %c0_i32_0 = arith.constant 0 : i32
    %c0_i32_1 = arith.constant 0 : i32
    %c0_i32_2 = arith.constant 0 : i32
    return %c0_i32, %c0_i32_0, %c0_i32_1 : i32, i32, i32
  }
  func.func @transform_6(%arg0: i32) -> (i32, i32) {
    %c0_i32 = arith.constant 0 : i32
    %c0_i32_0 = arith.constant 0 : i32
    %c0_i32_1 = arith.constant 0 : i32
    return %c0_i32, %c0_i32_0 : i32, i32
  }
  func.func @transform_7(%arg0: i32) -> (i32, i32, i32) {
    %c0_i32 = arith.constant 0 : i32
    %c0_i32_0 = arith.constant 0 : i32
    %c0_i32_1 = arith.constant 0 : i32
    %c0_i32_2 = arith.constant 0 : i32
    return %c0_i32, %c0_i32_0, %c0_i32_1 : i32, i32, i32
  }
  func.func @transform_8(%arg0: i32) -> (i32, i32) {
    %c0_i32 = arith.constant 0 : i32
    %c0_i32_0 = arith.constant 0 : i32
    %c0_i32_1 = arith.constant 0 : i32
    return %c0_i32, %c0_i32_0 : i32, i32
  }
  func.func @transform_9(%arg0: i32) -> (i32, i32, i32) {
    %c0_i32 = arith.constant 0 : i32
    %c0_i32_0 = arith.constant 0 : i32
    %c0_i32_1 = arith.constant 0 : i32
    %c0_i32_2 = arith.constant 0 : i32
    return %c0_i32, %c0_i32_0, %c0_i32_1 : i32, i32, i32
  }
  func.func @transform_10(%arg0: i32) -> (i32, i32) {
    %c0_i32 = arith.constant 0 : i32
    %c0_i32_0 = arith.constant 0 : i32
    %c0_i32_1 = arith.constant 0 : i32
    return %c0_i32, %c0_i32_0 : i32, i32
  }
  func.func @transform_11(%arg0: i32) -> (i32, i32) {
    %c0_i32 = arith.constant 0 : i32
    %c0_i32_0 = arith.constant 0 : i32
    %c0_i32_1 = arith.constant 0 : i32
    return %c0_i32, %c0_i32_0 : i32, i32
  }
  func.func @transform_12(%arg0: i32) -> (i32, i32) {
    %c0_i32 = arith.constant 0 : i32
    %c0_i32_0 = arith.constant 0 : i32
    %c0_i32_1 = arith.constant 0 : i32
    return %c0_i32, %c0_i32_0 : i32, i32
  }
  func.func @transform_13(%arg0: i32) -> (i32, i32) {
    %c0_i32 = arith.constant 0 : i32
    %c0_i32_0 = arith.constant 0 : i32
    %c0_i32_1 = arith.constant 0 : i32
    return %c0_i32, %c0_i32_0 : i32, i32
  }
  func.func @transform_14(%arg0: i32) -> (i32, i32, i32) {
    %c0_i32 = arith.constant 0 : i32
    %c0_i32_0 = arith.constant 0 : i32
    %c0_i32_1 = arith.constant 0 : i32
    return %arg0, %c0_i32, %c0_i32_0 : i32, i32, i32
  }
}

</mosaic_0001>

<bundles_post_ra>
// kernel: model_ext_forward.1
= control target key start
LH: loop header
LB: loop body
LE: loop exit
PB: predicated region body
PF: predicated region fallthrough
CT: control target
= control target key end

     0   :  { %s5880_s15 = smov 0   ;;  %s7661_s0 = inlined_call_operand.vmem [shape: f32[2,24,256], index: 0, kind: input, shape index: {}]   ;;  %s7662_s1 = inlined_call_operand.vmem [shape: bf16[9,56,24], index: 1, kind: input, shape index: {}]   ;;  %s7663_s2 = inlined_call_operand.vmem [shape: f32[56,1], index: 2, kind: input, shape index: {}]   ;;  %s7664_s3 = inlined_call_operand.vmem [shape: bf16[9,56,56], index: 3, kind: input, shape index: {}]   ;;  %s7665_s4 = inlined_call_operand.vmem [shape: f32[56,1], index: 4, kind: input, shape index: {}]   ;;  %s7666_s5 = inlined_call_operand.vmem [shape: bf16[7,16,56], index: 5, kind: input, shape index: {}]   ;;  %s7667_s6 = inlined_call_operand.vmem [shape: f32[16,1], index: 6, kind: input, shape index: {}]   ;;  %s7668_s7 = inlined_call_operand.vmem [shape: bf16[7,8,16], index: 7, kind: input, shape index: {}]   ;;  %s7669_s8 = inlined_call_operand.vmem [shape: f32[8,1], index: 8, kind: input, shape index: {}]   ;;  %s7670_s9 = inlined_call_operand.vmem [shape: bf16[3,256,96], index: 9, kind: input, shape index: {}]   ;;  %s7671_s10 = inlined_call_operand.vmem [shape: f32[85,10], index: 10, kind: input, shape index: {}]   ;;  %s7672_s11 = inlined_call_operand.vmem [shape: f32[1,10], index: 11, kind: input, shape index: {}]   ;;  %s7673_s12 = inlined_call_operand.vmem [shape: f32[10,1], index: 12, kind: input, shape index: {}]   ;;  %s7674_s13 = inlined_call_operand.<no memory space> [shape: f32[1,1], index: 13, kind: input, shape index: {}]   ;;  %s7675_s14 = inlined_call_operand.vmem [shape: f32[2,1,1], index: 14, kind: output, shape index: {}]  }
   0x1   :  { %v19_v0 = vstv %s7674_s13 }
   0x2   :  { %20 = vst [vmem:[#allocation3] sm:$0x1] %v19_v0 }
   0x3 LB: > { %s4631_s16 = sadd.s32 4294967295, %s5791_s15   ;;  %p4635_p0 = scmp.ge.s32.totalorder %s5791_s15, 1  ;;  %s5791_s15 = sphi %s5880_s15, %s26_s15  }
   0x4   : > { %p414_p1 = scmp.lt.s32.totalorder %s5791_s15, 3 }
   0x6   : > { %p415_p2 = pnand %p4635_p0, %p414_p1 }
   0x8   : > { %418 = sbr.rel (%p415_p2) target bundleno = 2333 (0x91d), region = 76 }
   0xd   : > { %p458_p3 = scmp.lt.s32.totalorder %s4631_s16, 1  ;;  %v5793_v1 = vmov 0   ;;  %s5794_s20 = smov 3   ;;  %vm585_vm0 = vcmask 1043456   ;;  %vm565_vm1 = vcmask 23552   ;;  %v5613_v51 = vld [vmem:[%s7662_s1 + $0x1c] sm:$0xff] }
   0xe   : > { %471 = vst [vmem:[#allocation2 + $0x20] sm:$0xff] %v5793_v1  ;;  %5779 = vset.pattern.permute.xlu1 %v5793_v1  ;;  %5778 = vset.pattern.permute.xlu0 %v5793_v1  ;;  %s5795_s21 = smov 4   ;;  %s5796_s22 = smov 2   ;;  %vm678_vm2 = vcmask 31744   ;;  %vm572_vm3 = vcmask 195584   ;;  %vm797_vm4 = vcmask 15360  }
   0xf   : > { %s7701_s16 = smov (!%p458_p3, %s4631_s16), 1  ;;  %472 = vst [vmem:[#allocation2 + $0x28] sm:$0xff] %v5793_v1  ;;  %5780 = vset.pattern.permute.xlu2 %v5793_v1  ;;  %s5797_s23 = smov 1   ;;  %vm930_vm5 = vcmask 7168   ;;  %vm1222_vm6 = vcmask 1039360   ;;  %vm1355_vm7 = vcmask 1031168  }
  0x10   : > { %467 = vst [vmem:[#allocation2] sm:$0xff] %v5793_v1  ;;  %s5760_s13 = smul.u32 48, %s7701_s16  ;;  %s5798_s24 = smov 127   ;;  %vm1488_vm8 = vcmask 1022976   ;;  %vm1621_vm9 = vcmask 1014784   ;;  %vm1793_vm10 = vcmask 1039364  }
  0x11   : > { %468 = vst [vmem:[#allocation2 + $0x8] sm:$0xff] %v5793_v1  ;;  %s7677_s27 = smov 126   ;;  %s5800_s17 = smov 125   ;;  %vm6409_vm11 = vmor %vm1793_vm10, %vm585_vm0  ;;  %vm1934_vm12 = vcmask 457728   ;;  %vm3921_vm13 = vcmask 781312   ;;  %vm4318_vm14 = vcmask 691200  }
  0x12   : > { %469 = vst [vmem:[#allocation2 + $0x10] sm:$0xff] %v5793_v1  ;;  %s462_s19 = scalar_lea.vmem %s7661_s0, %s5760_s13  ;;  %s5801_s28 = smov 124   ;;  %vm4340_vm15 = vcmask 130048  }
  0x13   : > { %470 = vst [vmem:[#allocation2 + $0x18] sm:$0xff] %v5793_v1  ;;  %v485_v2 = vld [vmem:[%s462_s19 + $0x20] sm:$0xff]  ;;  %v486_v3 = vld [vmem:[%s462_s19 + $0x28] sm:$0xff]  ;;  %v483_v7 = vld [vmem:[%s462_s19 + $0x10] sm:$0xff]  ;;  %s7699_s13 = smov 126  }
  0x14   : > { %473 = vst [vmem:[#allocation2 + $0x30] sm:$0xff] %v5793_v1  ;;  %v5894_v4 = vpack.c.bf16 %v486_v3, %v485_v2  ;;  %v481_v5 = vld [vmem:[%s462_s19] sm:$0xff]  ;;  %v482_v6 = vld [vmem:[%s462_s19 + $0x8] sm:$0xff]  ;;  %v484_v8 = vld [vmem:[%s462_s19 + $0x18] sm:$0xff]  ;;  %s465_s19 = scalar_lea.vmem %s7675_s14, %s7701_s16 }
  0x15   : > { %474 = vst [vmem:[#allocation2 + $0x38] sm:$0xff] %v5793_v1  ;;  %v487_v9 = vpack.c.bf16 %v482_v6, %v481_v5  ;;  %v488_v10 = vpack.c.bf16 %v484_v8, %v483_v7  ;;  %v5614_v6 = vld [vmem:[%s7662_s1 + $0x24] sm:$0xff] }
  0x16   : > { %475 = vst [vmem:[#allocation2 + $0x40] sm:$0xff] %v5793_v1  ;;  %v1201_v29 = vunpack.c.l.b16 %v5894_v4  ;;  %v1202_v30 = vunpack.c.h.b16 %v5894_v4 }
  0x17   : > { %492 = vst [vmem:[#allocation2 + $0x24] sm:$0xff] %v5894_v4  ;;  %v4658_v18 = vld [vmem:[#allocation2] sm:$0xf] }
  0x18   : > { %476 = vst [vmem:[#allocation2 + $0x48] sm:$0xff] %v5793_v1  ;;  %v5926_v31 = vpack.c.b16 %v1201_v29, %v1201_v29  ;;  %v5928_v32 = vpack.c.b16 %v1202_v30, %v1202_v30  ;;  %v4814_v2 = vld [vmem:[#allocation2 + $0xc] sm:$0xf] }
  0x19   : > { %477 = vst [vmem:[#allocation2 + $0x50] sm:$0xff] %v5793_v1  ;;  %v5608_v19 = vld [vmem:[#allocation2 + $0xc] sm:$0xf0] }
  0x1a   : > { %478 = vst [vmem:[#allocation2 + $0x58] sm:$0xff] %v5793_v1  ;;  %v4659_v23 = vor.u32 %v5608_v19, %v4658_v18  ;;  %v5629_v3 = vld [vmem:[#allocation2 + $0x18] sm:$0xf0] }
  0x1b   : > { %479 = vst [vmem:[#allocation2 + $0x60] sm:$0xff] %v5793_v1  ;;  %v5975_v4 = vor.u32 %v5629_v3, %v4814_v2 }
  0x1c   : > { %480 = vst [vmem:[#allocation2 + $0x68] sm:$0xff] %v5793_v1  ;;  %v5610_v1 = vld [vmem:[%s7662_s1] sm:$0xff] }
  0x1d   : > { %490 = vst [vmem:[#allocation2 + $0x4] sm:$0xff] %v487_v9 }
  0x1e   : > { %v5897_v11 = vld [vmem:[#allocation2 + $0x28] sm:$0xff]   ;;  %v497_v12 = vld [vmem:[#allocation2 + $0x20] sm:$0xff]  ;;  %491 = vst [vmem:[#allocation2 + $0x14] sm:$0xff] %v488_v10 }
  0x1f   : > { %v546_v13 = vunpack.c.l.b16 %v5897_v11  ;;  %v544_v14 = vunpack.c.l.b16 %v497_v12  ;;  %v545_v17 = vunpack.c.h.b16 %v497_v12  ;;  %v1203_v58 = vunpack.c.h.b16 %v5897_v11 }
  0x21   : > { %v552_v15 = vpack.c.b16 %v546_v13, %v546_v13  ;;  %v550_v16 = vpack.c.b16 %v544_v14, %v544_v14  ;;  %v551_v24 = vpack.c.b16 %v545_v17, %v545_v17  ;;  %v5962_v59 = vpack.c.b16 %v1203_v58, %v1203_v58 }
  0x23   : > { %563 = vrot.lane.b32.xlu1 %v552_v15, %s5794_s20  ;;  %559 = vrot.lane.b32.xlu0 %v550_v16, %s5794_s20 }
  0x24   : > { %v5607_v20 = vld [vmem:[#allocation2 + $0x4] sm:$0xf]  ;;  %v4666_v25 = vld [vmem:[#allocation2 + $0x8] sm:$0xf] }
  0x25   : > { %v4660_v21 = vld [vmem:[#allocation2 + $0x10] sm:$0xf0]  ;;  %v5609_v26 = vld [vmem:[#allocation2 + $0x14] sm:$0xf0]  ;;  %v4806_v35 = vld [vmem:[#allocation2 + $0x4] sm:$0xf] }
  0x26   : > { %v4663_v22 = vor.u32 %v5607_v20, %v4660_v21  ;;  %v4667_v27 = vor.u32 %v5609_v26, %v4666_v25  ;;  %v5628_v36 = vld [vmem:[#allocation2 + $0x10] sm:$0xf0]  ;;  %v5627_v37 = vld [vmem:[#allocation2 + $0x8] sm:$0xf]  ;;  %v4808_v40 = vld [vmem:[#allocation2 + $0x14] sm:$0xf0] }
  0x27   : > { %v5934_v39 = vor.u32 %v5628_v36, %v4806_v35  ;;  %v5936_v41 = vor.u32 %v5627_v37, %v4808_v40  ;;  %v5615_v20 = vld [vmem:[%s7662_s1 + $0x2c] sm:$0xff] }
  0x28   : > { %555 = vrot.lane.b32.xlu2 %v4663_v22, %s5794_s20 }
  0x2b   : > { %553 = vrot.lane.b32.xlu1 %v4659_v23, %s5794_s20  ;;  %561 = vrot.lane.b32.xlu0 %v551_v24, %s5794_s20 }
  0x30   : > { %557 = vrot.lane.b32.xlu2 %v4667_v27, %s5794_s20 }
  0x33   : > { %674 = vrot.lane.b32.xlu1 %v551_v24, %s5795_s21  ;;  %672 = vrot.lane.b32.xlu0 %v550_v16, %s5795_s21 }
  0x38   : > { %676 = vrot.lane.b32.xlu2 %v552_v15, %s5795_s21 }
  0x3b   : > { %666 = vrot.lane.b32.xlu0 %v4659_v23, %s5795_s21  ;;  %668 = vrot.lane.b32.xlu1 %v4663_v22, %s5795_s21 }
  0x40   : > { %670 = vrot.lane.b32.xlu2 %v4667_v27, %s5795_s21 }
  0x43   : > { %791 = vrot.lane.b32.xlu0 %v550_v16, %s5796_s22  ;;  %793 = vrot.lane.b32.xlu1 %v551_v24, %s5796_s22 }
  0x48   : > { %795 = vrot.lane.b32.xlu2 %v552_v15, %s5796_s22 }
  0x4b   : > { %785 = vrot.lane.b32.xlu0 %v4659_v23, %s5796_s22  ;;  %787 = vrot.lane.b32.xlu1 %v4663_v22, %s5796_s22 }
  0x50   : > { %789 = vrot.lane.b32.xlu2 %v4667_v27, %s5796_s22 }
  0x53   : > { %924 = vrot.lane.b32.xlu0 %v550_v16, %s5797_s23  ;;  %926 = vrot.lane.b32.xlu1 %v551_v24, %s5797_s23  ;;  %v5611_v16 = vld [vmem:[%s7662_s1 + $0x8] sm:$0xff] }
  0x58   : > { %928 = vrot.lane.b32.xlu2 %v552_v15, %s5797_s23 }
  0x5b   : > { %918 = vrot.lane.b32.xlu0 %v4659_v23, %s5797_s23  ;;  %920 = vrot.lane.b32.xlu1 %v4663_v22, %s5797_s23 }
  0x60   : > { %922 = vrot.lane.b32.xlu2 %v4667_v27, %s5797_s23 }
  0x63   : > { %1216 = vrot.lane.b32.xlu0 %v5926_v31, %s5798_s24  ;;  %1218 = vrot.lane.b32.xlu1 %v5928_v32, %s5798_s24 }
  0x68   : > { %1220 = vrot.lane.b32.xlu2 %v5962_v59, %s5798_s24 }
  0x6b   : > { %1210 = vrot.lane.b32.xlu0 %v5934_v39, %s5798_s24  ;;  %1212 = vrot.lane.b32.xlu1 %v5936_v41, %s5798_s24 }
  0x70   : > { %1214 = vrot.lane.b32.xlu2 %v5975_v4, %s5798_s24 }
  0x73   : > { %1349 = vrot.lane.b32.xlu0 %v5926_v31, %s7677_s27  ;;  %1351 = vrot.lane.b32.xlu1 %v5928_v32, %s7677_s27 }
  0x78   : > { %1353 = vrot.lane.b32.xlu2 %v5962_v59, %s7677_s27 }
  0x7b   : > { %1343 = vrot.lane.b32.xlu0 %v5934_v39, %s7677_s27  ;;  %1345 = vrot.lane.b32.xlu1 %v5936_v41, %s7677_s27 }
  0x80   : > { %1347 = vrot.lane.b32.xlu2 %v5975_v4, %s7677_s27 }
  0x82   : > { %v556_v28 = vpop.permute.xlu2 %555 }
  0x83   : > { %1482 = vrot.lane.b32.xlu0 %v5926_v31, %s5800_s17  ;;  %1484 = vrot.lane.b32.xlu1 %v5928_v32, %s5800_s17 }
  0x88   : > { %1486 = vrot.lane.b32.xlu2 %v5962_v59, %s5800_s17 }
  0x8a   : > { %v558_v38 = vpop.permute.xlu2 %557 }
  0x8b   : > { %v567_v50 = vsel %vm565_vm1, %v556_v28, %v558_v38  ;;  %1476 = vrot.lane.b32.xlu0 %v5934_v39, %s5800_s17  ;;  %1478 = vrot.lane.b32.xlu1 %v5936_v41, %s5800_s17  ;;  %v505_v38 = vld [vmem:[%s7662_s1 + $0x18] sm:$0xf] }
  0x90   : > { %1480 = vrot.lane.b32.xlu2 %v5975_v4, %s5800_s17 }
  0x92   : > { %v677_v48 = vpop.permute.xlu2 %676 }
  0x93   : > { %1615 = vrot.lane.b32.xlu0 %v5926_v31, %s5801_s28  ;;  %1617 = vrot.lane.b32.xlu1 %v5928_v32, %s5801_s28 }
  0x95   : > { %v564_v33 = vpop.permute.xlu1 %563  ;;  %v560_v34 = vpop.permute.xlu0 %559 }
  0x98   : > { %1619 = vrot.lane.b32.xlu2 %v5962_v59, %s5801_s28  ;;  %v4702_v59 = vld [vmem:[%s7662_s1 + $0x50] sm:$0xf] }
  0x9a   : > { %v671_v60 = vpop.permute.xlu2 %670 }
  0x9b   : > { %1609 = vrot.lane.b32.xlu0 %v5934_v39, %s5801_s28  ;;  %1611 = vrot.lane.b32.xlu1 %v5936_v41, %s5801_s28  ;;  %v661_v39 = vunpack.c.l.b16 %v505_v38  ;;  %v5616_v41 = vld [vmem:[%s7662_s1 + $0x38] sm:$0xff] }
  0x9d   : > { %v554_v42 = vpop.permute.xlu1 %553  ;;  %v562_v43 = vpop.permute.xlu0 %561  ;;  %v665_v40 = vpack.c.b16 %v661_v39, %v661_v39  ;;  %v5626_v39 = vld [vmem:[%s7662_s1 + $0x80] sm:$0xff] }
  0x9e   : > { %v568_v44 = vsel %vm565_vm1, %v560_v34, %v562_v43  ;;  %v569_v45 = vsel %vm565_vm1, %v562_v43, %v564_v33  ;;  %v566_v49 = vsel %vm565_vm1, %v554_v42, %v556_v28  ;;  %v4643_v28 = vld [vmem:[%s7662_s1 + $0x34] sm:$0xf]  ;;  %v5617_v43 = vld [vmem:[%s7662_s1 + $0x40] sm:$0xff] }
  0x9f   : > { %v587_v46 = vsel %vm585_vm0, %v568_v44, 0  ;;  %v590_v47 = vsel %vm585_vm0, %v569_v45, 0  ;;  %v5612_v33 = vld [vmem:[%s7662_s1 + $0x10] sm:$0xff]  ;;  %v527_v36 = vunpack.c.l.b16 %v4643_v28  ;;  %v1082_v44 = vsel %vm585_vm0, %v5926_v31, 0  ;;  %v5618_v31 = vld [vmem:[%s7662_s1 + $0x48] sm:$0xff] }
  0xa0   : > { %598 = vmatpush.bf16.msra.mxu0 %v587_v46  ;;  %626 = vmatpush.bf16.msra.mxu1 %v590_v47  ;;  %v5619_v42 = vld [vmem:[%s7662_s1 + $0x54] sm:$0xff]  ;;  %v1085_v45 = vsel %vm585_vm0, %v5928_v32, 0  ;;  %v5620_v46 = vld [vmem:[%s7662_s1 + $0x5c] sm:$0xff]  ;;  %v4771_v47 = vld [vmem:[#allocation2 + $0x4] sm:$0xf] }
  0xa1   : > { %v531_v37 = vpack.c.b16 %v527_v36, %v527_v36  ;;  %1613 = vrot.lane.b32.xlu2 %v5975_v4, %s5801_s28  ;;  %v4729_v4 = vld [vmem:[%s7662_s1 + $0x6c] sm:$0xf] }
  0xa2   : > { %v796_v5 = vpop.permute.xlu2 %795 }
  0xa4   : > { %599 = vmatpush.bf16.msra.mxu0 %v566_v49  ;;  %627 = vmatpush.bf16.msra.mxu1 %v567_v50  ;;  %v5622_v49 = vld [vmem:[#allocation2 + $0x8] sm:$0xf] }
  0xa5   : > { %v675_v52 = vpop.permute.xlu1 %674  ;;  %v673_v53 = vpop.permute.xlu0 %672 }
  0xa6   : > { %v681_v54 = vsel %vm678_vm2, %v673_v53, %v675_v52  ;;  %v682_v55 = vsel %vm678_vm2, %v675_v52, %v677_v48  ;;  %v5623_v48 = vld [vmem:[#allocation2 + $0x10] sm:$0xf0] }
  0xa7   : > { %4668 = vmatmul.msk.bf16.vlgmr.msra.gmra.mxu0 %vm572_vm3, %v5613_v51  ;;  %4672 = vmatmul.msk.bf16.vlgmr.msra.gmra.mxu1 %vm572_vm3, %v5613_v51  ;;  %v698_v56 = vsel %vm585_vm0, %v681_v54, 0  ;;  %v701_v57 = vsel %vm585_vm0, %v682_v55, 0  ;;  %v4772_v50 = vor.u32 %v5623_v48, %v4771_v47  ;;  %v4773_v51 = vld [vmem:[#allocation2 + $0x14] sm:$0xf0] }
  0xa8   : > { %709 = vmatpush.bf16.msra.mxu2 %v698_v56  ;;  %737 = vmatpush.bf16.msra.mxu3 %v701_v57  ;;  %v4776_v32 = vor.u32 %v5622_v49, %v4773_v51 }
  0xaa   : > { %v790_v13 = vpop.permute.xlu2 %789 }
  0xad   : > { %v667_v61 = vpop.permute.xlu0 %666  ;;  %v669_v62 = vpop.permute.xlu1 %668 }
  0xae   : > { %v679_v63 = vsel %vm678_vm2, %v667_v61, %v669_v62  ;;  %v680_v0 = vsel %vm678_vm2, %v669_v62, %v671_v60  ;;  %v5621_v62 = vld [vmem:[%s7662_s1 + $0x64] sm:$0xff] }
  0xaf   : > { %710 = vmatpush.bf16.msra.mxu2 %v679_v63  ;;  %738 = vmatpush.bf16.msra.mxu3 %v680_v0 }
  0xb2   : > { %4688 = vmatmul.msk.bf16.vlgmr.msra.gmra.mxu2 %vm572_vm3, %v5610_v1  ;;  %4692 = vmatmul.msk.bf16.vlgmr.msra.gmra.mxu3 %vm572_vm3, %v5610_v1  ;;  %v929_v19 = vpop.permute.xlu2 %928  ;;  %v780_v1 = vunpack.c.l.b16 %v4702_v59 }
  0xb4   : > { %v784_v3 = vpack.c.b16 %v780_v1, %v780_v1 }
  0xb5   : > { %v792_v7 = vpop.permute.xlu0 %791  ;;  %v794_v8 = vpop.permute.xlu1 %793 }
  0xb6   : > { %v800_v9 = vsel %vm797_vm4, %v792_v7, %v794_v8  ;;  %v801_v10 = vsel %vm797_vm4, %v794_v8, %v796_v5  ;;  %v913_v5 = vunpack.c.l.b16 %v4729_v4  ;;  %v5624_v7 = vld [vmem:[%s7662_s1 + $0x70] sm:$0xff] }
  0xb7   : > { %4669 = vmatmul.msk.bf16.gmra.mxu0 %vm572_vm3, %v5614_v6  ;;  %4673 = vmatmul.msk.bf16.gmra.mxu1 %vm572_vm3, %v5614_v6  ;;  %v817_v11 = vsel %vm585_vm0, %v800_v9, 0  ;;  %v820_v12 = vsel %vm585_vm0, %v801_v10, 0 }
  0xb8   : > { %828 = vmatpush.bf16.msrb.mxu0 %v817_v11  ;;  %856 = vmatpush.bf16.msrb.mxu1 %v820_v12  ;;  %v917_v6 = vpack.c.b16 %v913_v5, %v913_v5  ;;  %v5630_v12 = vld [vmem:[%s7662_s1 + $0x8c] sm:$0xff] }
  0xba   : > { %v923_v27 = vpop.permute.xlu2 %922 }
  0xbd   : > { %v786_v14 = vpop.permute.xlu0 %785  ;;  %v788_v15 = vpop.permute.xlu1 %787 }
  0xbe   : > { %v798_v17 = vsel %vm797_vm4, %v786_v14, %v788_v15  ;;  %v799_v18 = vsel %vm797_vm4, %v788_v15, %v790_v13  ;;  %v5625_v13 = vld [vmem:[%s7662_s1 + $0x78] sm:$0xff] }
  0xbf   : > { %829 = vmatpush.bf16.msrb.mxu0 %v798_v17  ;;  %857 = vmatpush.bf16.msrb.mxu1 %v799_v18 }
  0xc2   : > { %4689 = vmatmul.msk.bf16.gmra.mxu2 %vm572_vm3, %v5611_v16  ;;  %4693 = vmatmul.msk.bf16.gmra.mxu3 %vm572_vm3, %v5611_v16  ;;  %v1221_v55 = vpop.permute.xlu2 %1220 }
  0xc3   : > { %1093 = vmatpush.bf16.msra.mxu0 %v1082_v44  ;;  %1121 = vmatpush.bf16.msra.mxu1 %v1085_v45 }
  0xc5   : > { %v925_v21 = vpop.permute.xlu0 %924  ;;  %v927_v22 = vpop.permute.xlu1 %926 }
  0xc6   : > { %v933_v23 = vsel %vm930_vm5, %v925_v21, %v927_v22  ;;  %v934_v24 = vsel %vm930_vm5, %v927_v22, %v929_v19 }
  0xc7   : > { %4670 = vmatmul.msk.bf16.gmra.mxu0 %vm572_vm3, %v5615_v20  ;;  %4674 = vmatmul.msk.bf16.gmra.mxu1 %vm572_vm3, %v5615_v20  ;;  %v950_v25 = vsel %vm585_vm0, %v933_v23, 0  ;;  %v953_v26 = vsel %vm585_vm0, %v934_v24, 0 }
  0xc8   : > { %961 = vmatpush.bf16.msrb.mxu2 %v950_v25  ;;  %989 = vmatpush.bf16.msrb.mxu3 %v953_v26 }
  0xc9   : > { %1094 = vmatpush.bf16.msra.mxu0 %v4772_v50  ;;  %1122 = vmatpush.bf16.msra.mxu1 %v4776_v32 }
  0xca   : > { %v1215_v63 = vpop.permute.xlu2 %1214 }
  0xcd   : > { %v919_v29 = vpop.permute.xlu0 %918  ;;  %v921_v30 = vpop.permute.xlu1 %920 }
  0xce   : > { %v931_v34 = vsel %vm930_vm5, %v919_v29, %v921_v30  ;;  %v932_v35 = vsel %vm930_vm5, %v921_v30, %v923_v27 }
  0xcf   : > { %962 = vmatpush.bf16.msrb.mxu2 %v931_v34  ;;  %990 = vmatpush.bf16.msrb.mxu3 %v932_v35  ;;  %v5631_v35 = vld [vmem:[%s7662_s1 + $0x94] sm:$0xff] }
  0xd2   : > { %4690 = vmatmul.msk.bf16.gmra.mxu2 %vm572_vm3, %v5612_v33  ;;  %4694 = vmatmul.msk.bf16.gmra.mxu3 %vm572_vm3, %v5612_v33  ;;  %v1354_v22 = vpop.permute.xlu2 %1353 }
  0xd5   : > { %v1217_v52 = vpop.permute.xlu0 %1216  ;;  %v1219_v53 = vpop.permute.xlu1 %1218 }
  0xd6   : > { %v1225_v54 = vsel %vm1222_vm6, %v1217_v52, %v1219_v53  ;;  %v1226_v56 = vsel %vm1222_vm6, %v1219_v53, %v1221_v55  ;;  %v4756_v55 = vld [vmem:[%s7662_s1 + $0x88] sm:$0xf] }
  0xd7   : > { %4671 = vmatmul.msk.bf16.gmra.mxu0 %vm572_vm3, %v531_v37  ;;  %4675 = vmatmul.msk.bf16.gmra.mxu1 %vm572_vm3, %v531_v37  ;;  %v1242_v57 = vsel %vm585_vm0, %v1225_v54, 0  ;;  %v1245_v58 = vsel %vm585_vm0, %v1226_v56, 0 }
  0xd8   : > { %1253 = vmatpush.bf16.msra.mxu2 %v1242_v57  ;;  %1281 = vmatpush.bf16.msra.mxu3 %v1245_v58 }
  0xda   : > { %v1348_v38 = vpop.permute.xlu2 %1347 }
  0xdd   : > { %v1211_v60 = vpop.permute.xlu0 %1210  ;;  %v1213_v61 = vpop.permute.xlu1 %1212 }
  0xde   : > { %v1223_v0 = vsel %vm1222_vm6, %v1211_v60, %v1213_v61  ;;  %v1224_v2 = vsel %vm1222_vm6, %v1213_v61, %v1215_v63  ;;  %v5632_v60 = vld [vmem:[%s7662_s1 + $0x9c] sm:$0xff]  ;;  %v1049_v63 = vunpack.c.l.b16 %v4756_v55 }
  0xdf   : > { %1254 = vmatpush.bf16.msra.mxu2 %v1223_v0  ;;  %1282 = vmatpush.bf16.msra.mxu3 %v1224_v2 }
  0xe2   : > { %4691 = vmatmul.msk.bf16.gmra.mxu2 %vm572_vm3, %v665_v40  ;;  %4695 = vmatmul.msk.bf16.gmra.mxu3 %vm572_vm3, %v665_v40  ;;  %v1487_v51 = vpop.permute.xlu2 %1486 }
  0xe5   : > { %v1350_v20 = vpop.permute.xlu0 %1349  ;;  %v1352_v21 = vpop.permute.xlu1 %1351 }
  0xe6   : > { %v1359_v23 = vsel %vm1355_vm7, %v1352_v21, %v1354_v22  ;;  %v1358_v24 = vsel %vm1355_vm7, %v1350_v20, %v1352_v21  ;;  %v5633_v21 = vld [vmem:[%s7662_s1 + $0xa8] sm:$0xff] }
  0xe7   : > { %4715 = vmatmul.msk.bf16.vlgmr.msrb.gmra.mxu0 %vm572_vm3, %v5616_v41  ;;  %4719 = vmatmul.msk.bf16.vlgmr.msrb.gmra.mxu1 %vm572_vm3, %v5616_v41  ;;  %v1378_v25 = vsel %vm585_vm0, %v1359_v23, 0  ;;  %v1375_v28 = vsel %vm585_vm0, %v1358_v24, 0 }
  0xe8   : > { %1414 = vmatpush.bf16.msrb.mxu1 %v1378_v25  ;;  %1386 = vmatpush.bf16.msrb.mxu0 %v1375_v28 }
  0xea   : > { %v1481_v0 = vpop.permute.xlu2 %1480 }
  0xed   : > { %v1344_v36 = vpop.permute.xlu0 %1343  ;;  %v1346_v37 = vpop.permute.xlu1 %1345 }
  0xee   : > { %v1356_v40 = vsel %vm1355_vm7, %v1344_v36, %v1346_v37  ;;  %v1357_v41 = vsel %vm1355_vm7, %v1346_v37, %v1348_v38  ;;  %v5636_v38 = vld [vmem:[%s7662_s1 + $0xc4] sm:$0xff] }
  0xef   : > { %1387 = vmatpush.bf16.msrb.mxu0 %v1356_v40  ;;  %1415 = vmatpush.bf16.msrb.mxu1 %v1357_v41 }
  0xf2   : > { %4742 = vmatmul.msk.bf16.vlgmr.msrb.gmra.mxu2 %vm572_vm3, %v5619_v42  ;;  %4746 = vmatmul.msk.bf16.vlgmr.msrb.gmra.mxu3 %vm572_vm3, %v5619_v42 }
  0xf5   : > { %v1483_v48 = vpop.permute.xlu0 %1482  ;;  %v1485_v49 = vpop.permute.xlu1 %1484 }
  0xf6   : > { %v1491_v50 = vsel %vm1488_vm8, %v1483_v48, %v1485_v49 }
  0xf7   : > { %4716 = vmatmul.msk.bf16.gmra.mxu0 %vm572_vm3, %v5617_v43  ;;  %4720 = vmatmul.msk.bf16.gmra.mxu1 %vm572_vm3, %v5617_v43  ;;  %v1508_v32 = vsel %vm585_vm0, %v1491_v50, 0  ;;  %v1620_v50 = vpop.permute.xlu2 %1619 }
  0xf8   : > { %1519 = vmatpush.bf16.msrb.mxu2 %v1508_v32 }
  0xfd   : > { %v1477_v61 = vpop.permute.xlu0 %1476 }
 0x102   : > { %4743 = vmatmul.msk.bf16.gmra.mxu2 %vm572_vm3, %v5620_v46  ;;  %4747 = vmatmul.msk.bf16.gmra.mxu3 %vm572_vm3, %v5620_v46 }
 0x105   : > { %v1616_v48 = vpop.permute.xlu0 %1615 }
 0x107   : > { %4717 = vmatmul.msk.bf16.gmra.mxu0 %vm572_vm3, %v5618_v31  ;;  %4721 = vmatmul.msk.bf16.gmra.mxu1 %vm572_vm3, %v5618_v31  ;;  %v1492_v31 = vsel %vm1488_vm8, %v1485_v49, %v1487_v51 }
 0x108   : > { %v1511_v52 = vsel %vm585_vm0, %v1492_v31, 0 }
 0x109   : > { %1547 = vmatpush.bf16.msrb.mxu3 %v1511_v52 }
 0x112   : > { %4744 = vmatmul.msk.bf16.gmra.mxu2 %vm572_vm3, %v5621_v62  ;;  %4748 = vmatmul.msk.bf16.gmra.mxu3 %vm572_vm3, %v5621_v62  ;;  %v1479_v62 = vpop.permute.xlu1 %1478 }
 0x113   : > { %v1489_v1 = vsel %vm1488_vm8, %v1477_v61, %v1479_v62  ;;  %v1490_v2 = vsel %vm1488_vm8, %v1479_v62, %v1481_v0 }
 0x114   : > { %1520 = vmatpush.bf16.msrb.mxu2 %v1489_v1  ;;  %1548 = vmatpush.bf16.msrb.mxu3 %v1490_v2 }
 0x117   : > { %4718 = vmatmul.msk.bf16.gmra.mxu0 %vm572_vm3, %v784_v3  ;;  %4722 = vmatmul.msk.bf16.gmra.mxu1 %vm572_vm3, %v784_v3  ;;  %v1053_v3 = vpack.c.b16 %v1049_v63, %v1049_v63 }
 0x11a   : > { %v1618_v49 = vpop.permute.xlu1 %1617 }
 0x11b   : > { %v1624_v51 = vsel %vm1621_vm9, %v1616_v48, %v1618_v49 }
 0x11c   : > { %v1641_v52 = vsel %vm585_vm0, %v1624_v51, 0 }
 0x122   : > { %4745 = vmatmul.msk.bf16.gmra.mxu2 %vm572_vm3, %v917_v6  ;;  %4749 = vmatmul.msk.bf16.gmra.mxu3 %vm572_vm3, %v917_v6  ;;  %v1612_v61 = vpop.permute.xlu1 %1611 }
 0x124   : > { %v601_v8 = vpop.f32.mrf.mxu0  ;;  %v629_v9 = vpop.f32.mrf.mxu1 }
 0x127   : > { %4777 = vmatmul.msk.bf16.vlgmr.msra.gmra.mxu0 %vm572_vm3, %v5624_v7  ;;  %4781 = vmatmul.msk.bf16.vlgmr.msra.gmra.mxu1 %vm572_vm3, %v5624_v7 }
 0x128   : > { %1652 = vmatpush.bf16.msra.mxu0 %v1641_v52 }
 0x12c   : > { %v603_v10 = vpop.f32.mrf.mxu0  ;;  %v631_v11 = vpop.f32.mrf.mxu1 }
 0x132   : > { %4816 = vmatmul.msk.bf16.vlgmr.msra.gmra.mxu2 %vm572_vm3, %v5630_v12  ;;  %4820 = vmatmul.msk.bf16.vlgmr.msra.gmra.mxu3 %vm572_vm3, %v5630_v12 }
 0x134   : > { %v606_v14 = vpop.f32.mrf.mxu0  ;;  %v634_v15 = vpop.f32.mrf.mxu1 }
 0x135   : > { %v712_v16 = vpop.f32.mrf.mxu2  ;;  %v740_v17 = vpop.f32.mrf.mxu3 }
 0x136   : > { %v6114_v18 = vadd.f32 %v712_v16, %v601_v8  ;;  %v6116_v19 = vadd.f32 %v740_v17, %v629_v9 }
 0x137   : > { %4778 = vmatmul.msk.bf16.gmra.mxu0 %vm572_vm3, %v5625_v13  ;;  %4782 = vmatmul.msk.bf16.gmra.mxu1 %vm572_vm3, %v5625_v13 }
 0x13c   : > { %v608_v26 = vpop.f32.mrf.mxu0  ;;  %v636_v27 = vpop.f32.mrf.mxu1 }
 0x13d   : > { %v714_v29 = vpop.f32.mrf.mxu2  ;;  %v742_v30 = vpop.f32.mrf.mxu3 }
 0x13e   : > { %v6124_v33 = vadd.f32 %v714_v29, %v603_v10  ;;  %v6126_v34 = vadd.f32 %v742_v30, %v631_v11  ;;  %v4791_v10 = vld [vmem:[%s7662_s1 + $0xa4] sm:$0xf] }
 0x13f   : > { %v1184_v11 = vunpack.c.l.b16 %v4791_v10  ;;  %v1722_v10 = vld [vmem:[%s7663_s2 + $0x30] sm:$0xff] }
 0x140   : > { %1755 = vperm.xlu0 %5778, %v1722_v10   ;;  %v5641_v10 = vld [vmem:[%s7662_s1 + $0xf0] sm:$0xff] }
 0x141   : > { %v1188_v20 = vpack.c.b16 %v1184_v11, %v1184_v11 }
 0x142   : > { %4817 = vmatmul.msk.bf16.gmra.mxu2 %vm572_vm3, %v5631_v35  ;;  %4821 = vmatmul.msk.bf16.gmra.mxu3 %vm572_vm3, %v5631_v35 }
 0x144   : > { %v611_v42 = vpop.f32.mrf.mxu0  ;;  %v639_v43 = vpop.f32.mrf.mxu1 }
 0x145   : > { %v717_v44 = vpop.f32.mrf.mxu2  ;;  %v745_v45 = vpop.f32.mrf.mxu3 }
 0x146   : > { %v6138_v46 = vadd.f32 %v717_v44, %v606_v14  ;;  %v6140_v47 = vadd.f32 %v745_v45, %v634_v15 }
 0x147   : > { %4779 = vmatmul.msk.bf16.gmra.mxu0 %vm572_vm3, %v5626_v39  ;;  %4783 = vmatmul.msk.bf16.gmra.mxu1 %vm572_vm3, %v5626_v39  ;;  %v5634_v39 = vld [vmem:[%s7662_s1 + $0xb0] sm:$0xff] }
 0x14c   : > { %v613_v53 = vpop.f32.mrf.mxu0  ;;  %v641_v54 = vpop.f32.mrf.mxu1 }
 0x14d   : > { %v719_v56 = vpop.f32.mrf.mxu2  ;;  %v747_v57 = vpop.f32.mrf.mxu3 }
 0x14e   : > { %v6151_v58 = vadd.f32 %v719_v56, %v608_v26  ;;  %v6153_v59 = vadd.f32 %v747_v57, %v636_v27  ;;  %v5637_v57 = vld [vmem:[%s7662_s1 + $0xcc] sm:$0xff] }
 0x152   : > { %4818 = vmatmul.msk.bf16.gmra.mxu2 %vm572_vm3, %v5632_v60  ;;  %4822 = vmatmul.msk.bf16.gmra.mxu3 %vm572_vm3, %v5632_v60  ;;  %v1610_v60 = vpop.permute.xlu0 %1609 }
 0x153   : > { %v1622_v62 = vsel %vm1621_vm9, %v1610_v60, %v1612_v61 }
 0x154   : > { %v616_v4 = vpop.f32.mrf.mxu0  ;;  %v644_v5 = vpop.f32.mrf.mxu1  ;;  %1653 = vmatpush.bf16.msra.mxu0 %v1622_v62 }
 0x155   : > { %v722_v6 = vpop.f32.mrf.mxu2  ;;  %v750_v7 = vpop.f32.mrf.mxu3 }
 0x156   : > { %v6162_v8 = vadd.f32 %v722_v6, %v611_v42  ;;  %v6164_v9 = vadd.f32 %v750_v7, %v639_v43 }
 0x157   : > { %4780 = vmatmul.msk.bf16.gmra.mxu0 %vm572_vm3, %v1053_v3  ;;  %4784 = vmatmul.msk.bf16.gmra.mxu1 %vm572_vm3, %v1053_v3 }
 0x15c   : > { %v618_v12 = vpop.f32.mrf.mxu0  ;;  %v646_v13 = vpop.f32.mrf.mxu1 }
 0x15d   : > { %v724_v14 = vpop.f32.mrf.mxu2  ;;  %v752_v15 = vpop.f32.mrf.mxu3  ;;  %v4830_v12 = vld [vmem:[%s7662_s1 + $0xc0] sm:$0xf] }
 0x15e   : > { %v6171_v16 = vadd.f32 %v724_v14, %v613_v53  ;;  %v6173_v17 = vadd.f32 %v752_v15, %v641_v54 }
 0x162   : > { %4819 = vmatmul.msk.bf16.gmra.mxu2 %vm572_vm3, %v1188_v20  ;;  %4823 = vmatmul.msk.bf16.gmra.mxu3 %vm572_vm3, %v1188_v20 }
 0x164   : > { %v831_v22 = vpop.f32.mrf.mxu0  ;;  %v859_v23 = vpop.f32.mrf.mxu1 }
 0x165   : > { %v878_v24 = vadd.f32 %v831_v22, %v6114_v18  ;;  %v879_v25 = vadd.f32 %v859_v23, %v6116_v19  ;;  %v727_v26 = vpop.f32.mrf.mxu2  ;;  %v755_v27 = vpop.f32.mrf.mxu3  ;;  %v1718_v22 = vld [vmem:[%s7663_s2 + $0x10] sm:$0xff]  ;;  %v1338_v23 = vunpack.c.l.b16 %v4830_v12 }
 0x166   : > { %v6182_v28 = vadd.f32 %v727_v26, %v616_v4  ;;  %v6184_v29 = vadd.f32 %v755_v27, %v644_v5 }
 0x167   : > { %4843 = vmatmul.msk.bf16.vlgmr.msrb.gmra.mxu0 %vm572_vm3, %v5633_v21  ;;  %4847 = vmatmul.msk.bf16.vlgmr.msrb.gmra.mxu1 %vm572_vm3, %v5633_v21  ;;  %v1716_v21 = vld [vmem:[%s7663_s2] sm:$0xff] }
 0x168   : > { %1725 = vperm.xlu0 %5778, %v1716_v21  }
 0x16c   : > { %v833_v30 = vpop.f32.mrf.mxu0  ;;  %v861_v35 = vpop.f32.mrf.mxu1 }
 0x16d   : > { %v6189_v36 = vadd.f32 %v833_v30, %v6124_v33  ;;  %v6192_v37 = vadd.f32 %v861_v35, %v6126_v34  ;;  %v729_v18 = vpop.f32.mrf.mxu2  ;;  %v757_v19 = vpop.f32.mrf.mxu3 }
 0x172   : > { %4870 = vmatmul.msk.bf16.vlgmr.msrb.gmra.mxu2 %vm572_vm3, %v5636_v38  ;;  %4874 = vmatmul.msk.bf16.vlgmr.msrb.gmra.mxu3 %vm572_vm3, %v5636_v38  ;;  %v4857_v38 = vld [vmem:[%s7662_s1 + $0xdc] sm:$0xf] }
 0x174   : > { %v836_v40 = vpop.f32.mrf.mxu0  ;;  %v864_v33 = vpop.f32.mrf.mxu1 }
 0x175   : > { %v882_v41 = vadd.f32 %v836_v40, %v6138_v46  ;;  %v883_v34 = vadd.f32 %v864_v33, %v6140_v47  ;;  %v964_v42 = vpop.f32.mrf.mxu2  ;;  %v992_v43 = vpop.f32.mrf.mxu3  ;;  %v1625_v46 = vsel %vm1621_vm9, %v1618_v49, %v1620_v50 }
 0x176   : > { %v6204_v44 = vadd.f32 %v964_v42, %v878_v24  ;;  %v6206_v45 = vadd.f32 %v992_v43, %v879_v25  ;;  %v1644_v47 = vsel %vm585_vm0, %v1625_v46, 0  ;;  %v5639_v42 = vld [vmem:[%s7662_s1 + $0xe0] sm:$0xff] }
 0x177   : > { %4844 = vmatmul.msk.bf16.gmra.mxu0 %vm572_vm3, %v5634_v39  ;;  %4848 = vmatmul.msk.bf16.gmra.mxu1 %vm572_vm3, %v5634_v39  ;;  %v1717_v39 = vld [vmem:[%s7663_s2 + $0x8] sm:$0xff] }
 0x178   : > { %1680 = vmatpush.bf16.msra.mxu1 %v1644_v47 }
 0x17c   : > { %v838_v31 = vpop.f32.mrf.mxu0  ;;  %v866_v32 = vpop.f32.mrf.mxu1 }
 0x17d   : > { %v6215_v53 = vadd.f32 %v838_v31, %v6151_v58  ;;  %v6218_v54 = vadd.f32 %v866_v32, %v6153_v59  ;;  %v6220_v55 = vpop.f32.mrf.mxu2  ;;  %v6222_v56 = vpop.f32.mrf.mxu3  ;;  %v5635_v59 = vld [vmem:[%s7662_s1 + $0xb8] sm:$0xff] }
 0x17e   : > { %v1614_v58 = vpop.permute.xlu2 %1613 }
 0x17f   : > { %v1623_v63 = vsel %vm1621_vm9, %v1612_v61, %v1614_v58 }
 0x180   : > { %1681 = vmatpush.bf16.msra.mxu1 %v1623_v63 }
 0x182   : > { %4871 = vmatmul.msk.bf16.gmra.mxu2 %vm572_vm3, %v5637_v57  ;;  %4875 = vmatmul.msk.bf16.gmra.mxu3 %vm572_vm3, %v5637_v57 }
 0x184   : > { %v841_v0 = vpop.f32.mrf.mxu0  ;;  %v869_v1 = vpop.f32.mrf.mxu1 }
 0x185   : > { %v886_v2 = vadd.f32 %v841_v0, %v6162_v8  ;;  %v887_v3 = vadd.f32 %v869_v1, %v6164_v9  ;;  %v969_v4 = vpop.f32.mrf.mxu2  ;;  %v997_v5 = vpop.f32.mrf.mxu3  ;;  %v1720_v8 = vld [vmem:[%s7663_s2 + $0x20] sm:$0xff] }
 0x186   : > { %v6236_v6 = vadd.f32 %v969_v4, %v882_v41  ;;  %v6238_v7 = vadd.f32 %v997_v5, %v883_v34  ;;  %1745 = vperm.xlu1 %5779, %v1720_v8  }
 0x187   : > { %4845 = vmatmul.msk.bf16.gmra.mxu0 %vm572_vm3, %v5635_v59  ;;  %4849 = vmatmul.msk.bf16.gmra.mxu1 %vm572_vm3, %v5635_v59 }
 0x18c   : > { %v843_v9 = vpop.f32.mrf.mxu0  ;;  %v871_v11 = vpop.f32.mrf.mxu1 }
 0x18d   : > { %v6252_v13 = vadd.f32 %v843_v9, %v6171_v16  ;;  %v6255_v14 = vadd.f32 %v871_v11, %v6173_v17  ;;  %v6257_v15 = vpop.f32.mrf.mxu2  ;;  %v6259_v20 = vpop.f32.mrf.mxu3  ;;  %v5638_v16 = vld [vmem:[%s7662_s1 + $0xd4] sm:$0xff]  ;;  %v1342_v17 = vpack.c.b16 %v1338_v23, %v1338_v23 }
 0x18e   : > { %1735 = vperm.xlu1 %5779, %v1718_v22  }
 0x192   : > { %4872 = vmatmul.msk.bf16.gmra.mxu2 %vm572_vm3, %v5638_v16  ;;  %4876 = vmatmul.msk.bf16.gmra.mxu3 %vm572_vm3, %v5638_v16 }
 0x194   : > { %v846_v24 = vpop.f32.mrf.mxu0  ;;  %v874_v25 = vpop.f32.mrf.mxu1 }
 0x195   : > { %v890_v26 = vadd.f32 %v846_v24, %v6182_v28  ;;  %v891_v27 = vadd.f32 %v874_v25, %v6184_v29  ;;  %v974_v30 = vpop.f32.mrf.mxu2  ;;  %v1002_v35 = vpop.f32.mrf.mxu3  ;;  %v1471_v28 = vunpack.c.l.b16 %v4857_v38  ;;  %v4884_v25 = vld [vmem:[%s7662_s1 + $0xf8] sm:$0xf] }
 0x196   : > { %v1019_v18 = vadd.f32 %v974_v30, %v886_v2  ;;  %v1020_v19 = vadd.f32 %v1002_v35, %v887_v3  ;;  %1730 = vperm.xlu1 %5779, %v1717_v39   ;;  %v1721_v2 = vld [vmem:[%s7663_s2 + $0x28] sm:$0xff]  ;;  %v1604_v30 = vunpack.c.l.b16 %v4884_v25 }
 0x197   : > { %4846 = vmatmul.msk.bf16.gmra.mxu0 %vm572_vm3, %v1342_v17  ;;  %4850 = vmatmul.msk.bf16.gmra.mxu1 %vm572_vm3, %v1342_v17  ;;  %v1475_v34 = vpack.c.b16 %v1471_v28, %v1471_v28 }
 0x198   : > { %1750 = vperm.xlu2 %5780, %v1721_v2   ;;  %v1608_v35 = vpack.c.b16 %v1604_v30, %v1604_v30 }
 0x19c   : > { %v848_v40 = vpop.f32.mrf.mxu0  ;;  %v876_v29 = vpop.f32.mrf.mxu1 }
 0x19d   : > { %v6282_v33 = vpop.f32.mrf.mxu2  ;;  %v6284_v41 = vpop.f32.mrf.mxu3 }
 0x1a2   : > { %4873 = vmatmul.msk.bf16.gmra.mxu2 %vm572_vm3, %v1475_v34  ;;  %4877 = vmatmul.msk.bf16.gmra.mxu3 %vm572_vm3, %v1475_v34 }
 0x1a4   : > { %v1096_v43 = vpop.f32.mrf.mxu0  ;;  %v1124_v48 = vpop.f32.mrf.mxu1 }
 0x1a5   : > { %v1143_v49 = vadd.f32 %v1096_v43, %v6204_v44  ;;  %v1144_v50 = vadd.f32 %v1124_v48, %v6206_v45  ;;  %v979_v51 = vpop.f32.mrf.mxu2  ;;  %v1007_v46 = vpop.f32.mrf.mxu3  ;;  %v5640_v44 = vld [vmem:[%s7662_s1 + $0xe8] sm:$0xff] }
 0x1a6   : > { %v1023_v47 = vadd.f32 %v979_v51, %v890_v26  ;;  %v1024_v31 = vadd.f32 %v1007_v46, %v891_v27 }
 0x1a7   : > { %4897 = vmatmul.msk.bf16.vlgmr.msra.gmra.mxu0 %vm572_vm3, %v5639_v42  ;;  %4901 = vmatmul.msk.bf16.vlgmr.msra.gmra.mxu1 %vm572_vm3, %v5639_v42 }
 0x1ac   : > { %v6295_v32 = vpop.f32.mrf.mxu0  ;;  %v6297_v52 = vpop.f32.mrf.mxu1 }
 0x1ad   : > { %v981_v57 = vpop.f32.mrf.mxu2  ;;  %v1009_v60 = vpop.f32.mrf.mxu3 }
 0x1b4   : > { %v1101_v61 = vpop.f32.mrf.mxu0  ;;  %v1129_v45 = vpop.f32.mrf.mxu1 }
 0x1b5   : > { %v1147_v58 = vadd.f32 %v1101_v61, %v6236_v6  ;;  %v1148_v59 = vadd.f32 %v1129_v45, %v6238_v7  ;;  %v1256_v62 = vpop.f32.mrf.mxu2  ;;  %v1284_v63 = vpop.f32.mrf.mxu3  ;;  %v1719_v7 = vld [vmem:[%s7663_s2 + $0x18] sm:$0xff] }
 0x1b6   : > { %v6304_v0 = vadd.f32 %v1256_v62, %v1143_v49  ;;  %v6306_v1 = vadd.f32 %v1284_v63, %v1144_v50  ;;  %1740 = vperm.xlu2 %5780, %v1719_v7  }
 0x1b7   : > { %4898 = vmatmul.msk.bf16.gmra.mxu0 %vm572_vm3, %v5640_v44  ;;  %4902 = vmatmul.msk.bf16.gmra.mxu1 %vm572_vm3, %v5640_v44 }
 0x1bc   : > { %v6313_v3 = vpop.f32.mrf.mxu0  ;;  %v6315_v4 = vpop.f32.mrf.mxu1 }
 0x1bd   : > { %v6317_v5 = vpop.f32.mrf.mxu2  ;;  %v6319_v6 = vpop.f32.mrf.mxu3 }
 0x1c4   : > { %v1106_v8 = vpop.f32.mrf.mxu0  ;;  %v1134_v9 = vpop.f32.mrf.mxu1 }
 0x1c5   : > { %v1151_v11 = vadd.f32 %v1106_v8, %v1019_v18  ;;  %v1152_v12 = vadd.f32 %v1134_v9, %v1020_v19  ;;  %v1261_v21 = vpop.f32.mrf.mxu2  ;;  %v1289_v22 = vpop.f32.mrf.mxu3 }
 0x1c6   : > { %v6327_v16 = vadd.f32 %v1261_v21, %v1147_v58  ;;  %v6329_v23 = vadd.f32 %v1289_v22, %v1148_v59 }
 0x1c7   : > { %4899 = vmatmul.msk.bf16.gmra.mxu0 %vm572_vm3, %v5641_v10  ;;  %4903 = vmatmul.msk.bf16.gmra.mxu1 %vm572_vm3, %v5641_v10 }
 0x1cc   : > { %v6333_v17 = vpop.f32.mrf.mxu0  ;;  %v6335_v24 = vpop.f32.mrf.mxu1 }
 0x1cd   : > { %v6340_v26 = vpop.f32.mrf.mxu2  ;;  %v6342_v27 = vpop.f32.mrf.mxu3 }
 0x1d4   : > { %v1111_v18 = vpop.f32.mrf.mxu0  ;;  %v1139_v19 = vpop.f32.mrf.mxu1 }
 0x1d5   : > { %v1155_v38 = vadd.f32 %v1111_v18, %v1023_v47  ;;  %v1156_v39 = vadd.f32 %v1139_v19, %v1024_v31  ;;  %v1266_v28 = vpop.f32.mrf.mxu2  ;;  %v1294_v40 = vpop.f32.mrf.mxu3 }
 0x1d6   : > { %v6344_v29 = vadd.f32 %v1266_v28, %v1151_v11  ;;  %v6346_v34 = vadd.f32 %v1294_v40, %v1152_v12  ;;  %v6388_v40 = vpop.permute.xlu0 %1755 }
 0x1d7   : > { %4900 = vmatmul.msk.bf16.gmra.mxu0 %vm572_vm3, %v1608_v35  ;;  %4904 = vmatmul.msk.bf16.gmra.mxu1 %vm572_vm3, %v1608_v35  ;;  %7685 = vst [vmem:[#allocation10_spill] sm:$0xff] %v6388_v40  ;;  %vm4549_vm3 = vcmask 80896  }
 0x1dc   : > { %v1113_v42 = vpop.f32.mrf.mxu0  ;;  %v1141_v43 = vpop.f32.mrf.mxu1 }
 0x1dd   : > { %v6350_v48 = vpop.f32.mrf.mxu2  ;;  %v6352_v49 = vpop.f32.mrf.mxu3 }
 0x1de   : > { %v1726_v40 = vpop.permute.xlu0 %1725 }
 0x1e4   : > { %v1389_v50 = vpop.f32.mrf.mxu0  ;;  %v1417_v51 = vpop.f32.mrf.mxu1 }
 0x1e5   : > { %v1271_v46 = vpop.f32.mrf.mxu2  ;;  %v1299_v47 = vpop.f32.mrf.mxu3 }
 0x1e6   : > { %v6354_v31 = vadd.f32 %v1271_v46, %v1155_v38  ;;  %v6356_v57 = vadd.f32 %v1299_v47, %v1156_v39 }
 0x1e8   : > { %7679 = vst [vmem:[#allocation4_spill] sm:$0xff] %v6354_v31 }
 0x1e9   : > { %7680 = vst [vmem:[#allocation5_spill] sm:$0xff] %v6356_v57 }
 0x1ec   : > { %v1391_v60 = vpop.f32.mrf.mxu0  ;;  %v1419_v44 = vpop.f32.mrf.mxu1 }
 0x1ed   : > { %v1273_v61 = vpop.f32.mrf.mxu2  ;;  %v1301_v45 = vpop.f32.mrf.mxu3 }
 0x1ee   : > { %v1436_v61 = vadd.f32 %v1389_v50, %v6304_v0  ;;  %v1437_v45 = vadd.f32 %v1417_v51, %v6306_v1 }
 0x1f4   : > { %v6358_v58 = vpop.f32.mrf.mxu0  ;;  %v6360_v59 = vpop.f32.mrf.mxu1 }
 0x1f5   : > { %v1522_v62 = vpop.f32.mrf.mxu2  ;;  %v1550_v63 = vpop.f32.mrf.mxu3 }
 0x1f6   : > { %v1569_v31 = vadd.f32 %v1522_v62, %v1436_v61 }
 0x1f8   : > { %v6386_v28 = vpop.permute.xlu1 %1745 }
 0x1fc   : > { %v6362_v2 = vpop.f32.mrf.mxu0  ;;  %v6364_v7 = vpop.f32.mrf.mxu1 }
 0x1fd   : > { %v1524_v10 = vpop.f32.mrf.mxu2  ;;  %v1552_v8 = vpop.f32.mrf.mxu3 }
 0x200   : > { %v1736_v57 = vpop.permute.xlu1 %1735 }
 0x204   : > { %v6366_v9 = vpop.f32.mrf.mxu0  ;;  %v6368_v11 = vpop.f32.mrf.mxu1 }
 0x205   : > { %v1527_v12 = vpop.f32.mrf.mxu2  ;;  %v1555_v21 = vpop.f32.mrf.mxu3 }
 0x20c   : > { %v6370_v22 = vpop.f32.mrf.mxu0  ;;  %v6372_v25 = vpop.f32.mrf.mxu1 }
 0x20d   : > { %7681 = vst [vmem:[#allocation6_spill] sm:$0xff] %v6370_v22  ;;  %v6374_v30 = vpop.f32.mrf.mxu2  ;;  %v6376_v35 = vpop.f32.mrf.mxu3 }
 0x20e   : > { %7682 = vst [vmem:[#allocation7_spill] sm:$0xff] %v6372_v25  ;;  %v1570_v25 = vadd.f32 %v1550_v63, %v1437_v45 }
 0x214   : > { %v6378_v18 = vpop.f32.mrf.mxu0  ;;  %v6380_v19 = vpop.f32.mrf.mxu1 }
 0x215   : > { %7683 = vst [vmem:[#allocation8_spill] sm:$0xff] %v6378_v18  ;;  %v6382_v38 = vpop.f32.mrf.mxu2  ;;  %v6384_v39 = vpop.f32.mrf.mxu3  ;;  %v1014_v18 = vadd.f32 %v6222_v56, %v6192_v37 }
 0x216   : > { %7684 = vst [vmem:[#allocation9_spill] sm:$0xff] %v6380_v19  ;;  %v1013_v19 = vadd.f32 %v6220_v55, %v6189_v36 }
 0x21c   : > { %v1406_v42 = vpop.f32.mrf.mxu0  ;;  %v1434_v43 = vpop.f32.mrf.mxu1 }
 0x21d   : > { %v6390_v46 = vpop.f32.mrf.mxu2  ;;  %v6392_v47 = vpop.f32.mrf.mxu3  ;;  %v1145_v42 = vadd.f32 %v6295_v32, %v1013_v19 }
 0x21e   : > { %7686 = vst [vmem:[#allocation11_spill] sm:$0xff] %v6390_v46  ;;  %v1731_v19 = vpop.permute.xlu1 %1730 }
 0x21f   : > { %7687 = vst [vmem:[#allocation12_spill] sm:$0xff] %v6392_v47  ;;  %v1146_v47 = vadd.f32 %v6297_v52, %v1014_v18  ;;  %v1305_v36 = vadd.f32 %v6317_v5, %v1145_v42  ;;  %v6419_v42 = vpop.permute.xlu2 %1750 }
 0x221   : > { %v1306_v55 = vadd.f32 %v6319_v6, %v1146_v47  ;;  %v1438_v51 = vadd.f32 %v1391_v60, %v1305_v36  ;;  %v1440_v47 = vadd.f32 %v6358_v58, %v6327_v16 }
 0x223   : > { %v1439_v62 = vadd.f32 %v1419_v44, %v1306_v55  ;;  %v1573_v36 = vadd.f32 %v1527_v12, %v1440_v47 }
 0x224   : > { %v1655_v43 = vpop.f32.mrf.mxu0  ;;  %v1683_v46 = vpop.f32.mrf.mxu1 }
 0x225   : > { %v1702_v22 = vadd.f32 %v1655_v43, %v1569_v31  ;;  %v1703_v0 = vadd.f32 %v1683_v46, %v1570_v25  ;;  %v6402_v50 = vpop.f32.mrf.mxu2  ;;  %v6404_v1 = vpop.f32.mrf.mxu3  ;;  %v1571_v31 = vadd.f32 %v1524_v10, %v1438_v51  ;;  %v1572_v25 = vadd.f32 %v1552_v8, %v1439_v62 }
 0x226   : > { %v1441_v10 = vadd.f32 %v6360_v59, %v6329_v23  ;;  %v1017_v43 = vadd.f32 %v6257_v15, %v6215_v53 }
 0x227   : > { %v1758_v37 = vadd.f32 %v1726_v40, %v1702_v22  ;;  %v1759_v56 = vadd.f32 %v1726_v40, %v1703_v0  ;;  %v1018_v0 = vadd.f32 %v6259_v20, %v6218_v54 }
 0x228   : > { %v1574_v55 = vadd.f32 %v1555_v21, %v1441_v10  ;;  %v1149_v16 = vadd.f32 %v6313_v3, %v1017_v43 }
 0x229   : > { %v1772_v32 = vmax.f32 %v1758_v37, 0.0  ;;  %v1773_v63 = vmax.f32 %v1759_v56, 0.0  ;;  %v1150_v58 = vadd.f32 %v6315_v4, %v1018_v0 }
 0x22a   : > { %v1309_v62 = vadd.f32 %v6340_v26, %v1149_v16 }
 0x22b   : > { %v1786_v18 = vpack.c.bf16 %v1773_v63, %v1772_v32  ;;  %v1310_v53 = vadd.f32 %v6342_v27, %v1150_v58  ;;  %v4950_v27 = vld [vmem:[#allocation2 + $0x40] sm:$0xf]  ;;  %v7694_v58 = vld [vmem:[#allocation4_spill] sm:$0xff] }
 0x22c   : > { %v1657_v46 = vpop.f32.mrf.mxu0  ;;  %v1685_v5 = vpop.f32.mrf.mxu1  ;;  %v1442_v20 = vadd.f32 %v6362_v2, %v1309_v62  ;;  %v7696_v62 = vld [vmem:[#allocation5_spill] sm:$0xff] }
 0x22d   : > { %v1704_v61 = vadd.f32 %v1657_v46, %v1571_v31  ;;  %v1705_v6 = vadd.f32 %v1685_v5, %v1572_v25  ;;  %1795 = vst.msk [vmem:[#allocation2 + $0x4] sm:$0xff] %vm6409_vm11, %v1786_v18  ;;  %v1539_v60 = vpop.f32.mrf.mxu2  ;;  %v1567_v44 = vpop.f32.mrf.mxu3  ;;  %v1443_v12 = vadd.f32 %v6364_v7, %v1310_v53  ;;  %v7697_v53 = vld [vmem:[#allocation9_spill] sm:$0xff] }
 0x22e   : > { %v1575_v3 = vadd.f32 %v6374_v30, %v1442_v20  ;;  %v1741_v31 = vpop.permute.xlu2 %1740  ;;  %v1444_v30 = vadd.f32 %v6366_v9, %v6344_v29  ;;  %v1022_v60 = vadd.f32 %v6284_v41, %v6255_v14 }
 0x22f   : > { %v1760_v22 = vadd.f32 %v1731_v19, %v1704_v61  ;;  %v1761_v40 = vadd.f32 %v1731_v19, %v1705_v6  ;;  %v1576_v4 = vadd.f32 %v6376_v35, %v1443_v12  ;;  %v1445_v35 = vadd.f32 %v6368_v11, %v6346_v34 }
 0x230   : > { %v1021_v6 = vadd.f32 %v6282_v33, %v6252_v13  ;;  %v1577_v44 = vadd.f32 %v6382_v38, %v1444_v30  ;;  %v1154_v11 = vadd.f32 %v6335_v24, %v1022_v60  ;;  %v7690_v38 = vld [vmem:[#allocation6_spill] sm:$0xff]  ;;  %v7692_v24 = vld [vmem:[#allocation11_spill] sm:$0xff] }
 0x231   : > { %v1774_v8 = vmax.f32 %v1760_v22, 0.0  ;;  %v1775_v45 = vmax.f32 %v1761_v40, 0.0  ;;  %v1578_v22 = vadd.f32 %v6384_v39, %v1445_v35 }
 0x232   : > { %v1153_v34 = vadd.f32 %v6333_v17, %v1021_v6  ;;  %v1314_v14 = vadd.f32 %v6352_v49, %v1154_v11 }
 0x233   : > { %v1787_v37 = vpack.c.bf16 %v1775_v45, %v1774_v8  ;;  %v7691_v8 = vld [vmem:[#allocation7_spill] sm:$0xff] }
 0x234   : > { %v1660_v56 = vpop.f32.mrf.mxu0  ;;  %v1688_v51 = vpop.f32.mrf.mxu1  ;;  %v1313_v13 = vadd.f32 %v6350_v48, %v1153_v34  ;;  %v1447_v45 = vadd.f32 %v7691_v8, %v1314_v14  ;;  %v5646_v34 = vld [vmem:[#allocation2 + $0x2c] sm:$0xf0] }
 0x235   : > { %v1706_v23 = vadd.f32 %v1660_v56, %v1573_v36  ;;  %v1707_v59 = vadd.f32 %v1688_v51, %v1574_v55  ;;  %1796 = vst.msk [vmem:[#allocation2 + $0x14] sm:$0xff] %vm6409_vm11, %v1787_v37  ;;  %v7693_v36 = vld [vmem:[#allocation12_spill] sm:$0xff] }
 0x236   : > { %v1446_v39 = vadd.f32 %v7690_v38, %v1313_v13  ;;  %v1580_v55 = vadd.f32 %v7693_v36, %v1447_v45  ;;  %v4926_v38 = vld [vmem:[#allocation2] sm:$0xf] }
 0x237   : > { %v1762_v15 = vadd.f32 %v1736_v57, %v1706_v23  ;;  %v1763_v54 = vadd.f32 %v1736_v57, %v1707_v59  ;;  %v5649_v57 = vld [vmem:[#allocation2 + $0x4c] sm:$0xf0] }
 0x238   : > { %v6437_v7 = vor.u32 %v5649_v57, %v4950_v27  ;;  %v1579_v0 = vadd.f32 %v7692_v24, %v1446_v39  ;;  %v7695_v23 = vld [vmem:[#allocation8_spill] sm:$0xff] }
 0x239   : > { %v1776_v21 = vmax.f32 %v1762_v15, 0.0  ;;  %v1777_v32 = vmax.f32 %v1763_v54, 0.0  ;;  %v1448_v59 = vadd.f32 %v7695_v23, %v7694_v58  ;;  %v1449_v15 = vadd.f32 %v7697_v53, %v7696_v62  ;;  %v5643_v39 = vld [vmem:[#allocation2 + $0xc] sm:$0xf0] }
 0x23a   : > { %1908 = vrot.lane.b32.xlu2 %v6437_v7, %s5794_s20  ;;  %v4927_v45 = vor.u32 %v5643_v39, %v4926_v38 }
 0x23b   : > { %v1788_v63 = vpack.c.bf16 %v1777_v32, %v1776_v21  ;;  %v1581_v12 = vadd.f32 %v6402_v50, %v1448_v59  ;;  %v1582_v21 = vadd.f32 %v6404_v1, %v1449_v15 }
 0x23c   : > { %v1662_v25 = vpop.f32.mrf.mxu0  ;;  %v1690_v18 = vpop.f32.mrf.mxu1  ;;  %v5644_v8 = vld [vmem:[#allocation2 + $0x14] sm:$0xf0] }
 0x23d   : > { %v1708_v19 = vadd.f32 %v1662_v25, %v1575_v3  ;;  %v1709_v26 = vadd.f32 %v1690_v18, %v1576_v4  ;;  %1797 = vst.msk [vmem:[#allocation2 + $0x24] sm:$0xff] %vm6409_vm11, %v1788_v63 }
 0x23f   : > { %v1764_v2 = vadd.f32 %v1741_v31, %v1708_v19  ;;  %v1765_v46 = vadd.f32 %v1741_v31, %v1709_v26  ;;  %v7698_v31 = vld [vmem:[#allocation10_spill] sm:$0xff] }
 0x241   : > { %v1778_v5 = vmax.f32 %v1764_v2, 0.0  ;;  %v1779_v61 = vmax.f32 %v1765_v46, 0.0 }
 0x243   : > { %v1789_v40 = vpack.c.bf16 %v1779_v61, %v1778_v5 }
 0x244   : > { %v1665_v29 = vpop.f32.mrf.mxu0  ;;  %v1693_v9 = vpop.f32.mrf.mxu1  ;;  %v4946_v13 = vld [vmem:[#allocation2 + $0x28] sm:$0xf] }
 0x245   : > { %1798 = vst.msk [vmem:[#allocation2 + $0x34] sm:$0xff] %vm6409_vm11, %v1789_v40  ;;  %v1710_v47 = vadd.f32 %v1665_v29, %v1577_v44  ;;  %v1711_v10 = vadd.f32 %v1693_v9, %v1578_v22  ;;  %v4938_v9 = vld [vmem:[#allocation2 + $0x20] sm:$0xf] }
 0x247   : > { %v1766_v33 = vadd.f32 %v6386_v28, %v1710_v47  ;;  %v1767_v41 = vadd.f32 %v6386_v28, %v1711_v10  ;;  %v4939_v47 = vor.u32 %v5646_v34, %v4938_v9 }
 0x249   : > { %v1780_v17 = vmax.f32 %v1766_v33, 0.0  ;;  %v1781_v43 = vmax.f32 %v1767_v41, 0.0  ;;  %v5645_v33 = vld [vmem:[#allocation2 + $0x24] sm:$0xf] }
 0x24b   : > { %v1790_v37 = vpack.c.bf16 %v1781_v43, %v1780_v17  ;;  %v4928_v17 = vld [vmem:[#allocation2 + $0x10] sm:$0xf0]  ;;  %v4934_v43 = vld [vmem:[#allocation2 + $0x8] sm:$0xf] }
 0x24c   : > { %v1667_v56 = vpop.f32.mrf.mxu0  ;;  %v1695_v51 = vpop.f32.mrf.mxu1  ;;  %v5647_v11 = vld [vmem:[#allocation2 + $0x34] sm:$0xf0]  ;;  %v4940_v10 = vld [vmem:[#allocation2 + $0x30] sm:$0xf0]  ;;  %v4935_v24 = vor.u32 %v5644_v8, %v4934_v43 }
 0x24d   : > { %1799 = vst.msk [vmem:[#allocation2 + $0x44] sm:$0xff] %vm6409_vm11, %v1790_v37  ;;  %v1712_v48 = vadd.f32 %v1667_v56, %v1579_v0  ;;  %v1713_v49 = vadd.f32 %v1695_v51, %v1580_v55  ;;  %v4947_v14 = vor.u32 %v5647_v11, %v4946_v13  ;;  %v4943_v41 = vor.u32 %v5645_v33, %v4940_v10  ;;  %v5642_v0 = vld [vmem:[#allocation2 + $0x4] sm:$0xf]  ;;  %v5677_v10 = vld [vmem:[#allocation2 + $0x38] sm:$0xf0] }
 0x24e   : > { %v4931_v36 = vor.u32 %v5642_v0, %v4928_v17  ;;  %v5655_v33 = vld [vmem:[%s7664_s3 + $0x24] sm:$0xff] }
 0x24f   : > { %v1768_v28 = vadd.f32 %v6419_v42, %v1712_v48  ;;  %v1769_v16 = vadd.f32 %v6419_v42, %v1713_v49 }
 0x251   : > { %v1782_v54 = vmax.f32 %v1768_v28, 0.0  ;;  %v1783_v20 = vmax.f32 %v1769_v16, 0.0 }
 0x253   : > { %v1791_v32 = vpack.c.bf16 %v1783_v20, %v1782_v54 }
 0x254   : > { %v1670_v3 = vpop.f32.mrf.mxu0  ;;  %v1698_v4 = vpop.f32.mrf.mxu1  ;;  %v4958_v57 = vld [vmem:[#allocation2 + $0x48] sm:$0xf]  ;;  %v5648_v1 = vld [vmem:[#allocation2 + $0x44] sm:$0xf] }
 0x255   : > { %1800 = vst.msk [vmem:[#allocation2 + $0x54] sm:$0xff] %vm6409_vm11, %v1791_v32  ;;  %v1714_v63 = vadd.f32 %v1670_v3, %v1581_v12  ;;  %v1715_v42 = vadd.f32 %v1698_v4, %v1582_v21  ;;  %v5138_v20 = vld [vmem:[#allocation2 + $0x44] sm:$0xf]  ;;  %v5678_v32 = vld [vmem:[#allocation2 + $0x48] sm:$0xf] }
 0x257   : > { %v1770_v25 = vadd.f32 %v7698_v31, %v1714_v63  ;;  %v1771_v18 = vadd.f32 %v7698_v31, %v1715_v42 }
 0x259   : > { %v1784_v19 = vmax.f32 %v1770_v25, 0.0  ;;  %v1785_v26 = vmax.f32 %v1771_v18, 0.0 }
 0x25b   : > { %v1792_v27 = vpack.c.bf16 %v1785_v26, %v1784_v19 }
 0x25c   : > { %v1672_v2 = vpop.f32.mrf.mxu0  ;;  %v1700_v50 = vpop.f32.mrf.mxu1  ;;  %v5650_v46 = vld [vmem:[#allocation2 + $0x54] sm:$0xf0]  ;;  %v4952_v30 = vld [vmem:[#allocation2 + $0x50] sm:$0xf0] }
 0x25d   : > { %1801 = vst.msk [vmem:[#allocation2 + $0x64] sm:$0xff] %vm6409_vm11, %v1792_v27  ;;  %v6479_v35 = vor.u32 %v5650_v46, %v4958_v57  ;;  %v6481_v5 = vor.u32 %v5648_v1, %v4952_v30  ;;  %v5679_v23 = vld [vmem:[#allocation2 + $0x50] sm:$0xf0]  ;;  %v5140_v53 = vld [vmem:[#allocation2 + $0x54] sm:$0xf0]  ;;  %v5654_v30 = vld [vmem:[%s7664_s3 + $0x1c] sm:$0xff] }
 0x25e   : > { %v6551_v12 = vor.u32 %v5679_v23, %v5138_v20  ;;  %v6555_v3 = vor.u32 %v5678_v32, %v5140_v53  ;;  %v5146_v57 = vld [vmem:[#allocation2 + $0x4c] sm:$0xf]  ;;  %v5680_v2 = vld [vmem:[#allocation2 + $0x58] sm:$0xf0] }
 0x25f   : > { %1912 = vrot.lane.b32.xlu1 %v6479_v35, %s5794_s20  ;;  %1910 = vrot.lane.b32.xlu0 %v6481_v5, %s5794_s20 }
 0x264   : > { %v1814_v61 = vld [vmem:[#allocation2 + $0x60] sm:$0xff]  ;;  %v6487_v6 = vld [vmem:[#allocation2 + $0x68] sm:$0xff]  }
 0x265   : > { %v1881_v60 = vunpack.c.l.b16 %v1814_v61  ;;  %v1883_v44 = vunpack.c.l.b16 %v6487_v6  ;;  %v1882_v22 = vunpack.c.h.b16 %v1814_v61  ;;  %v2673_v16 = vunpack.c.h.b16 %v6487_v6  ;;  %v5128_v61 = vld [vmem:[#allocation2 + $0x34] sm:$0xf0]  ;;  %v5126_v6 = vld [vmem:[#allocation2 + $0x24] sm:$0xf] }
 0x266   : > { %v2611_v9 = vld [vmem:[#allocation2 + $0x64] sm:$0xff] }
 0x267   : > { %v1893_v40 = vpack.c.b16 %v1881_v60, %v1881_v60  ;;  %v1895_v52 = vpack.c.b16 %v1883_v44, %v1883_v44  ;;  %v1894_v29 = vpack.c.b16 %v1882_v22, %v1882_v22  ;;  %v6553_v21 = vpack.c.b16 %v2673_v16, %v2673_v16  ;;  %v5675_v44 = vld [vmem:[#allocation2 + $0x28] sm:$0xf] }
 0x268   : > { %v6588_v22 = vor.u32 %v5675_v44, %v5128_v61 }
 0x269   : > { %1914 = vrot.lane.b32.xlu2 %v1893_v40, %s5794_s20  ;;  %1918 = vrot.lane.b32.xlu1 %v1895_v52, %s5794_s20 }
 0x26a   : > { %1916 = vrot.lane.b32.xlu0 %v1894_v29, %s5794_s20 }
 0x271   : > { %1902 = vrot.lane.b32.xlu2 %v4939_v47, %s5794_s20  ;;  %1906 = vrot.lane.b32.xlu1 %v4947_v14, %s5794_s20 }
 0x272   : > { %1904 = vrot.lane.b32.xlu0 %v4943_v41, %s5794_s20 }
 0x279   : > { %1896 = vrot.lane.b32.xlu2 %v4927_v45, %s5794_s20  ;;  %1900 = vrot.lane.b32.xlu1 %v4935_v24, %s5794_s20 }
 0x27a   : > { %1898 = vrot.lane.b32.xlu0 %v4931_v36, %s5794_s20 }
 0x281   : > { %2177 = vrot.lane.b32.xlu2 %v6437_v7, %s5796_s22  ;;  %2181 = vrot.lane.b32.xlu1 %v6479_v35, %s5796_s22 }
 0x282   : > { %2179 = vrot.lane.b32.xlu0 %v6481_v5, %s5796_s22 }
 0x289   : > { %2039 = vrot.lane.b32.xlu2 %v6437_v7, %s5795_s21  ;;  %2043 = vrot.lane.b32.xlu1 %v6479_v35, %s5795_s21 }
 0x28a   : > { %2041 = vrot.lane.b32.xlu0 %v6481_v5, %s5795_s21 }
 0x291   : > { %2171 = vrot.lane.b32.xlu2 %v4939_v47, %s5796_s22  ;;  %2175 = vrot.lane.b32.xlu1 %v4947_v14, %s5796_s22 }
 0x292   : > { %2173 = vrot.lane.b32.xlu0 %v4943_v41, %s5796_s22 }
 0x294   : > { %v1909_v55 = vpop.permute.xlu2 %1908 }
 0x299   : > { %2033 = vrot.lane.b32.xlu2 %v4939_v47, %s5795_s21  ;;  %2037 = vrot.lane.b32.xlu1 %v4947_v14, %s5795_s21 }
 0x29a   : > { %2035 = vrot.lane.b32.xlu0 %v4943_v41, %s5795_s21 }
 0x2a1   : > { %2183 = vrot.lane.b32.xlu2 %v1893_v40, %s5796_s22  ;;  %2187 = vrot.lane.b32.xlu1 %v1895_v52, %s5796_s22 }
 0x2a2   : > { %2185 = vrot.lane.b32.xlu0 %v1894_v29, %s5796_s22 }
 0x2a9   : > { %2045 = vrot.lane.b32.xlu2 %v1893_v40, %s5795_s21  ;;  %2049 = vrot.lane.b32.xlu1 %v1895_v52, %s5795_s21 }
 0x2aa   : > { %2047 = vrot.lane.b32.xlu0 %v1894_v29, %s5795_s21 }
 0x2b1   : > { %2165 = vrot.lane.b32.xlu2 %v4927_v45, %s5796_s22  ;;  %2169 = vrot.lane.b32.xlu1 %v4935_v24, %s5796_s22 }
 0x2b2   : > { %2167 = vrot.lane.b32.xlu0 %v4931_v36, %s5796_s22 }
 0x2b9   : > { %2027 = vrot.lane.b32.xlu2 %v4927_v45, %s5795_s21  ;;  %2031 = vrot.lane.b32.xlu1 %v4935_v24, %s5795_s21 }
 0x2ba   : > { %2029 = vrot.lane.b32.xlu0 %v4931_v36, %s5795_s21 }
 0x2c1   : > { %2329 = vrot.lane.b32.xlu2 %v6437_v7, %s5797_s23  ;;  %2333 = vrot.lane.b32.xlu1 %v6479_v35, %s5797_s23  ;;  %v5676_v35 = vld [vmem:[#allocation2 + $0x30] sm:$0xf0] }
 0x2c2   : > { %2331 = vrot.lane.b32.xlu0 %v6481_v5, %s5797_s23  ;;  %v6582_v5 = vor.u32 %v5680_v2, %v5146_v57  ;;  %v6584_v60 = vor.u32 %v5676_v35, %v5126_v6 }
 0x2c3   : > { %v1915_v37 = vpop.permute.xlu2 %1914 }
 0x2c9   : > { %2335 = vrot.lane.b32.xlu2 %v1893_v40, %s5797_s23  ;;  %2339 = vrot.lane.b32.xlu1 %v1895_v52, %s5797_s23 }
 0x2ca   : > { %2337 = vrot.lane.b32.xlu0 %v1894_v29, %s5797_s23 }
 0x2cb   : > { %v1903_v56 = vpop.permute.xlu2 %1902 }
 0x2d1   : > { %2323 = vrot.lane.b32.xlu2 %v4939_v47, %s5797_s23  ;;  %2327 = vrot.lane.b32.xlu1 %v4947_v14, %s5797_s23  ;;  %v1913_v7 = vpop.permute.xlu1 %1912  ;;  %v1911_v48 = vpop.permute.xlu0 %1910  ;;  %v5134_v47 = vld [vmem:[#allocation2 + $0x2c] sm:$0xf]  ;;  %v2671_v14 = vunpack.c.l.b16 %v2611_v9 }
 0x2d2   : > { %2325 = vrot.lane.b32.xlu0 %v4943_v41, %s5797_s23  ;;  %v1924_v4 = vsel %vm565_vm1, %v1909_v55, %v1911_v48  ;;  %v1925_v63 = vsel %vm565_vm1, %v1911_v48, %v1913_v7  ;;  %v2672_v41 = vunpack.c.h.b16 %v2611_v9  ;;  %v6613_v38 = vor.u32 %v5677_v10, %v5134_v47  ;;  %v5674_v55 = vld [vmem:[#allocation2 + $0x18] sm:$0xf0]  ;;  %v5673_v7 = vld [vmem:[#allocation2 + $0x10] sm:$0xf0]  ;;  %v5116_v48 = vld [vmem:[#allocation2 + $0x14] sm:$0xf0] }
 0x2d3   : > { %v1897_v51 = vpop.permute.xlu2 %1896  ;;  %v6615_v39 = vpack.c.b16 %v2671_v14, %v2671_v14  ;;  %v5081_v10 = vld [vmem:[#allocation2 + $0x54] sm:$0xf0] }
 0x2d4   : > { %v6619_v8 = vpack.c.b16 %v2672_v41, %v2672_v41  ;;  %v5666_v41 = vld [vmem:[#allocation2 + $0x30] sm:$0xf0] }
 0x2d5   : > { %v2524_v9 = vsel %vm585_vm0, %v6615_v39, 0 }
 0x2d6   : > { %v2527_v47 = vsel %vm585_vm0, %v6619_v8, 0 }
 0x2d9   : > { %2317 = vrot.lane.b32.xlu2 %v4927_v45, %s5797_s23  ;;  %2321 = vrot.lane.b32.xlu1 %v4935_v24, %s5797_s23 }
 0x2da   : > { %2319 = vrot.lane.b32.xlu0 %v4931_v36, %s5797_s23  ;;  %v5122_v36 = vld [vmem:[#allocation2 + $0xc] sm:$0xf] }
 0x2db   : > { %v1919_v49 = vpop.permute.xlu1 %1918  ;;  %v6544_v28 = vpop.permute.xlu2 %2177 }
 0x2dc   : > { %v1917_v58 = vpop.permute.xlu0 %1916 }
 0x2dd   : > { %v1926_v59 = vsel %vm565_vm1, %v1915_v37, %v1917_v58  ;;  %v1927_v62 = vsel %vm565_vm1, %v1917_v58, %v1919_v49  ;;  %v5114_v49 = vld [vmem:[#allocation2 + $0x4] sm:$0xf]  ;;  %v5672_v58 = vld [vmem:[#allocation2 + $0x8] sm:$0xf] }
 0x2de   : > { %v1948_v15 = vsel %vm585_vm0, %v1926_v59, 0  ;;  %v1951_v54 = vsel %vm585_vm0, %v1927_v62, 0  ;;  %v6642_v16 = vor.u32 %v5673_v7, %v5114_v49  ;;  %v6646_v23 = vor.u32 %v5672_v58, %v5116_v48  ;;  %v5664_v7 = vld [vmem:[#allocation2 + $0x10] sm:$0xf0]  ;;  %v5065_v48 = vld [vmem:[#allocation2 + $0x14] sm:$0xf0] }
 0x2df   : > { %1957 = vmatpush.bf16.msra.mxu2 %v1948_v15  ;;  %1985 = vmatpush.bf16.msra.mxu3 %v1951_v54  ;;  %v5063_v49 = vld [vmem:[#allocation2 + $0x4] sm:$0xf] }
 0x2e0   : > { %v5064_v58 = vor.u32 %v5664_v7, %v5063_v49 }
 0x2e1   : > { %2850 = vrot.lane.b32.xlu2 %v6551_v12, %s7677_s27  ;;  %2860 = vrot.lane.b32.xlu1 %v6553_v21, %s7677_s27 }
 0x2e2   : > { %2852 = vrot.lane.b32.xlu0 %v6555_v3, %s7677_s27 }
 0x2e3   : > { %1958 = vmatpush.bf16.msra.mxu2 %v1924_v4  ;;  %1986 = vmatpush.bf16.msra.mxu3 %v1925_v63  ;;  %v1907_v42 = vpop.permute.xlu1 %1906  ;;  %v6565_v31 = vpop.permute.xlu2 %2039  ;;  %v4911_v4 = vld [vmem:[%s7664_s3 + $0x34] sm:$0xf] }
 0x2e4   : > { %v1905_v25 = vpop.permute.xlu0 %1904  ;;  %v1844_v63 = vunpack.c.l.b16 %v4911_v4 }
 0x2e5   : > { %v1922_v18 = vsel %vm565_vm1, %v1903_v56, %v1905_v25  ;;  %v1923_v19 = vsel %vm565_vm1, %v1905_v25, %v1907_v42  ;;  %v5656_v56 = vld [vmem:[%s7664_s3 + $0x2c] sm:$0xff] }
 0x2e7   : > { %1959 = vmatpush.bf16.msra.mxu2 %v1922_v18  ;;  %1987 = vmatpush.bf16.msra.mxu3 %v1923_v19 }
 0x2e9   : > { %2698 = vrot.lane.b32.xlu2 %v6551_v12, %s5798_s24  ;;  %2708 = vrot.lane.b32.xlu1 %v6553_v21, %s5798_s24 }
 0x2ea   : > { %2700 = vrot.lane.b32.xlu0 %v6555_v3, %s5798_s24 }
 0x2eb   : > { %v1901_v26 = vpop.permute.xlu1 %1900  ;;  %v6575_v27 = vpop.permute.xlu2 %2171 }
 0x2ec   : > { %v1899_v50 = vpop.permute.xlu0 %1898 }
 0x2ed   : > { %v1920_v46 = vsel %vm565_vm1, %v1897_v51, %v1899_v50  ;;  %v1921_v1 = vsel %vm565_vm1, %v1899_v50, %v1901_v26  ;;  %v6640_v51 = vor.u32 %v5674_v55, %v5122_v36  ;;  %v1848_v50 = vpack.c.b16 %v1844_v63, %v1844_v63 }
 0x2ee   : > { %1960 = vmatpush.bf16.msra.mxu2 %v1920_v46  ;;  %1988 = vmatpush.bf16.msra.mxu3 %v1921_v1 }
 0x2f1   : > { %4960 = vmatmul.msk.bf16.vlgmr.msra.gmra.mxu2 %vm1934_vm12, %v5654_v30  ;;  %4964 = vmatmul.msk.bf16.vlgmr.msra.gmra.mxu3 %vm1934_vm12, %v5654_v30 }
 0x2f2   : > { %2844 = vrot.lane.b32.xlu2 %v6584_v60, %s7677_s27  ;;  %2854 = vrot.lane.b32.xlu1 %v6582_v5, %s7677_s27 }
 0x2f3   : > { %2846 = vrot.lane.b32.xlu0 %v6588_v22, %s7677_s27  ;;  %v6596_v40 = vpop.permute.xlu1 %2181  ;;  %v6598_v52 = vpop.permute.xlu2 %2033 }
 0x2f4   : > { %v2180_v29 = vpop.permute.xlu0 %2179 }
 0x2f5   : > { %v2193_v42 = vsel %vm797_vm4, %v6544_v28, %v2180_v29  ;;  %v2194_v25 = vsel %vm797_vm4, %v2180_v29, %v6596_v40 }
 0x2fa   : > { %2692 = vrot.lane.b32.xlu2 %v6584_v60, %s5798_s24  ;;  %2702 = vrot.lane.b32.xlu1 %v6582_v5, %s5798_s24 }
 0x2fb   : > { %2694 = vrot.lane.b32.xlu0 %v6588_v22, %s5798_s24  ;;  %v6606_v34 = vpop.permute.xlu1 %2043  ;;  %v2184_v11 = vpop.permute.xlu2 %2183 }
 0x2fc   : > { %v6608_v13 = vpop.permute.xlu0 %2041 }
 0x2fd   : > { %v2055_v35 = vsel %vm678_vm2, %v6565_v31, %v6608_v13 }
 0x301   : > { %4961 = vmatmul.msk.bf16.gmra.mxu2 %vm1934_vm12, %v5655_v33  ;;  %4965 = vmatmul.msk.bf16.gmra.mxu3 %vm1934_vm12, %v5655_v33  ;;  %v5667_v33 = vld [vmem:[#allocation2 + $0x48] sm:$0xf] }
 0x302   : > { %2856 = vrot.lane.b32.xlu2 %v6615_v39, %s7677_s27  ;;  %2848 = vrot.lane.b32.xlu1 %v6613_v38, %s7677_s27 }
 0x303   : > { %2858 = vrot.lane.b32.xlu0 %v6619_v8, %s7677_s27  ;;  %v2176_v45 = vpop.permute.xlu1 %2175  ;;  %v2046_v17 = vpop.permute.xlu2 %2045 }
 0x304   : > { %v2174_v43 = vpop.permute.xlu0 %2173 }
 0x305   : > { %v2191_v1 = vsel %vm797_vm4, %v6575_v27, %v2174_v43  ;;  %v2192_v30 = vsel %vm797_vm4, %v2174_v43, %v2176_v45  ;;  %v2056_v27 = vsel %vm678_vm2, %v6608_v13, %v6606_v34  ;;  %v5079_v13 = vld [vmem:[#allocation2 + $0x44] sm:$0xf]  ;;  %v5073_v43 = vld [vmem:[#allocation2 + $0x34] sm:$0xf0] }
 0x30a   : > { %2704 = vrot.lane.b32.xlu2 %v6615_v39, %s5798_s24  ;;  %2696 = vrot.lane.b32.xlu1 %v6613_v38, %s5798_s24 }
 0x30b   : > { %2706 = vrot.lane.b32.xlu0 %v6619_v8, %s5798_s24  ;;  %v6633_v24 = vpop.permute.xlu1 %2037  ;;  %v2166_v0 = vpop.permute.xlu2 %2165 }
 0x30c   : > { %v6635_v37 = vpop.permute.xlu0 %2035 }
 0x30d   : > { %v2053_v31 = vsel %vm678_vm2, %v6598_v52, %v6635_v37  ;;  %v2054_v34 = vsel %vm678_vm2, %v6635_v37, %v6633_v24  ;;  %v5084_v52 = vor.u32 %v5667_v33, %v5081_v10  ;;  %v5651_v37 = vld [vmem:[%s7664_s3] sm:$0xff] }
 0x311   : > { %4962 = vmatmul.msk.bf16.gmra.mxu2 %vm1934_vm12, %v5656_v56  ;;  %4966 = vmatmul.msk.bf16.gmra.mxu3 %vm1934_vm12, %v5656_v56  ;;  %v5657_v56 = vld [vmem:[%s7664_s3 + $0x38] sm:$0xff] }
 0x312   : > { %2838 = vrot.lane.b32.xlu2 %v6642_v16, %s7677_s27  ;;  %2842 = vrot.lane.b32.xlu1 %v6640_v51, %s7677_s27 }
 0x313   : > { %2840 = vrot.lane.b32.xlu0 %v6646_v23, %s7677_s27  ;;  %v2188_v59 = vpop.permute.xlu1 %2187  ;;  %v6654_v62 = vpop.permute.xlu2 %2027 }
 0x314   : > { %v2186_v53 = vpop.permute.xlu0 %2185 }
 0x315   : > { %v2195_v15 = vsel %vm797_vm4, %v2184_v11, %v2186_v53  ;;  %v2196_v54 = vsel %vm797_vm4, %v2186_v53, %v2188_v59  ;;  %v5668_v11 = vld [vmem:[#allocation2 + $0x50] sm:$0xf0]  ;;  %v5663_v59 = vld [vmem:[#allocation2 + $0x8] sm:$0xf] }
 0x316   : > { %v2216_v20 = vsel %vm585_vm0, %v2195_v15, 0  ;;  %v2219_v32 = vsel %vm585_vm0, %v2196_v54, 0  ;;  %v5080_v14 = vor.u32 %v5668_v11, %v5079_v13  ;;  %v3268_v13 = vld [vmem:[%s7665_s4] sm:$0xff] }
 0x317   : > { %2225 = vmatpush.bf16.msrb.mxu2 %v2216_v20  ;;  %2253 = vmatpush.bf16.msrb.mxu3 %v2219_v32 }
 0x31a   : > { %2686 = vrot.lane.b32.xlu2 %v6642_v16, %s5798_s24  ;;  %2690 = vrot.lane.b32.xlu1 %v6640_v51, %s5798_s24 }
 0x31b   : > { %2688 = vrot.lane.b32.xlu0 %v6646_v23, %s5798_s24  ;;  %2226 = vmatpush.bf16.msrb.mxu2 %v2193_v42  ;;  %v2050_v18 = vpop.permute.xlu1 %2049  ;;  %v6673_v19 = vpop.permute.xlu2 %2329 }
 0x31c   : > { %2254 = vmatpush.bf16.msrb.mxu3 %v2194_v25  ;;  %v2048_v26 = vpop.permute.xlu0 %2047  ;;  %v5652_v25 = vld [vmem:[%s7664_s3 + $0x8] sm:$0xff] }
 0x31d   : > { %v2057_v57 = vsel %vm678_vm2, %v2046_v17, %v2048_v26  ;;  %v2058_v2 = vsel %vm678_vm2, %v2048_v26, %v2050_v18  ;;  %v5658_v18 = vld [vmem:[%s7664_s3 + $0x40] sm:$0xff] }
 0x31e   : > { %v2078_v46 = vsel %vm585_vm0, %v2057_v57, 0  ;;  %v2081_v28 = vsel %vm585_vm0, %v2058_v2, 0 }
 0x31f   : > { %2087 = vmatpush.bf16.msrb.mxu0 %v2078_v46  ;;  %2115 = vmatpush.bf16.msrb.mxu1 %v2081_v28 }
 0x320   : > { %2227 = vmatpush.bf16.msrb.mxu2 %v2191_v1  ;;  %2255 = vmatpush.bf16.msrb.mxu3 %v2192_v30 }
 0x321   : > { %4963 = vmatmul.msk.bf16.gmra.mxu2 %vm1934_vm12, %v1848_v50  ;;  %4967 = vmatmul.msk.bf16.gmra.mxu3 %vm1934_vm12, %v1848_v50 }
 0x322   : > { %3154 = vrot.lane.b32.xlu2 %v6551_v12, %s5801_s28  ;;  %3164 = vrot.lane.b32.xlu1 %v6553_v21, %s5801_s28 }
 0x323   : > { %3156 = vrot.lane.b32.xlu0 %v6555_v3, %s5801_s28  ;;  %2088 = vmatpush.bf16.msrb.mxu0 %v2055_v35  ;;  %v2170_v61 = vpop.permute.xlu1 %2169  ;;  %v6696_v6 = vpop.permute.xlu2 %2335 }
 0x324   : > { %2116 = vmatpush.bf16.msrb.mxu1 %v2056_v27  ;;  %v2168_v44 = vpop.permute.xlu0 %2167 }
 0x325   : > { %v2189_v40 = vsel %vm797_vm4, %v2166_v0, %v2168_v44  ;;  %v2190_v29 = vsel %vm797_vm4, %v2168_v44, %v2170_v61  ;;  %v5071_v0 = vld [vmem:[#allocation2 + $0x24] sm:$0xf]  ;;  %v5653_v61 = vld [vmem:[%s7664_s3 + $0x10] sm:$0xff]  ;;  %v1822_v44 = vld [vmem:[%s7664_s3 + $0x18] sm:$0xf] }
 0x326   : > { %2228 = vmatpush.bf16.msrb.mxu2 %v2189_v40  ;;  %2256 = vmatpush.bf16.msrb.mxu3 %v2190_v29  ;;  %v5072_v55 = vor.u32 %v5666_v41, %v5071_v0  ;;  %v4994_v40 = vld [vmem:[%s7664_s3 + $0x50] sm:$0xf]  ;;  %v2022_v29 = vunpack.c.l.b16 %v1822_v44  ;;  %v3273_v41 = vld [vmem:[%s7665_s4 + $0x28] sm:$0xff] }
 0x327   : > { %2089 = vmatpush.bf16.msrb.mxu0 %v2053_v31  ;;  %v2160_v31 = vunpack.c.l.b16 %v4994_v40  ;;  %v5669_v0 = vld [vmem:[%s7664_s3 + $0x70] sm:$0xff]  ;;  %v5662_v40 = vld [vmem:[%s7664_s3 + $0x64] sm:$0xff] }
 0x328   : > { %2117 = vmatpush.bf16.msrb.mxu1 %v2054_v34 }
 0x329   : > { %v2164_v10 = vpack.c.b16 %v2160_v31, %v2160_v31 }
 0x32a   : > { %2533 = vmatpush.bf16.msra.mxu2 %v2524_v9  ;;  %2561 = vmatpush.bf16.msra.mxu3 %v2527_v47  ;;  %v2026_v47 = vpack.c.b16 %v2022_v29, %v2022_v29 }
 0x32b   : > { %3002 = vrot.lane.b32.xlu2 %v6551_v12, %s5800_s17  ;;  %3012 = vrot.lane.b32.xlu1 %v6553_v21, %s5800_s17  ;;  %v2032_v45 = vpop.permute.xlu1 %2031  ;;  %v6716_v17 = vpop.permute.xlu2 %2323  ;;  %v5665_v21 = vld [vmem:[#allocation2 + $0x28] sm:$0xf] }
 0x32c   : > { %3004 = vrot.lane.b32.xlu0 %v6555_v3, %s5800_s17  ;;  %v2030_v24 = vpop.permute.xlu0 %2029  ;;  %v5076_v3 = vor.u32 %v5665_v21, %v5073_v43 }
 0x32d   : > { %v2051_v36 = vsel %vm678_vm2, %v6654_v62, %v2030_v24  ;;  %v2052_v12 = vsel %vm678_vm2, %v2030_v24, %v2032_v45  ;;  %v5068_v62 = vor.u32 %v5663_v59, %v5065_v48  ;;  %v3272_v45 = vld [vmem:[%s7665_s4 + $0x20] sm:$0xff]  ;;  %v5660_v24 = vld [vmem:[%s7664_s3 + $0x54] sm:$0xff]  ;;  %vm4553_vm2 = vcmask 1041408  }
 0x32e   : > { %2534 = vmatpush.bf16.msra.mxu2 %v5080_v14  ;;  %2562 = vmatpush.bf16.msra.mxu3 %v5084_v52  ;;  %v3271_v52 = vld [vmem:[%s7665_s4 + $0x18] sm:$0xff] }
 0x32f   : > { %2090 = vmatpush.bf16.msrb.mxu0 %v2051_v36  ;;  %2118 = vmatpush.bf16.msrb.mxu1 %v2052_v12  ;;  %v3274_v36 = vld [vmem:[%s7665_s4 + $0x30] sm:$0xff] }
 0x331   : > { %5007 = vmatmul.msk.bf16.vlgmr.msrb.gmra.mxu2 %vm1934_vm12, %v5657_v56  ;;  %5011 = vmatmul.msk.bf16.vlgmr.msrb.gmra.mxu3 %vm1934_vm12, %v5657_v56 }
 0x332   : > { %2535 = vmatpush.bf16.msra.mxu2 %v5072_v55  ;;  %2563 = vmatpush.bf16.msra.mxu3 %v5076_v3 }
 0x333   : > { %4980 = vmatmul.msk.bf16.vlgmr.msrb.gmra.mxu0 %vm1934_vm12, %v5651_v37  ;;  %4984 = vmatmul.msk.bf16.vlgmr.msrb.gmra.mxu1 %vm1934_vm12, %v5651_v37  ;;  %v2334_v53 = vpop.permute.xlu1 %2333  ;;  %v2318_v15 = vpop.permute.xlu2 %2317 }
 0x334   : > { %3148 = vrot.lane.b32.xlu2 %v6584_v60, %s5801_s28  ;;  %3158 = vrot.lane.b32.xlu1 %v6582_v5, %s5801_s28  ;;  %v2332_v54 = vpop.permute.xlu0 %2331 }
 0x335   : > { %3150 = vrot.lane.b32.xlu0 %v6588_v22, %s5801_s28  ;;  %v2346_v2 = vsel %vm930_vm5, %v2332_v54, %v2334_v53 }
 0x336   : > { %2536 = vmatpush.bf16.msra.mxu2 %v5064_v58  ;;  %2564 = vmatpush.bf16.msra.mxu3 %v5068_v62 }
 0x33b   : > { %v2340_v20 = vpop.permute.xlu1 %2339  ;;  %v6741_v32 = vpop.permute.xlu2 %2850 }
 0x33c   : > { %2996 = vrot.lane.b32.xlu2 %v6584_v60, %s5800_s17  ;;  %3006 = vrot.lane.b32.xlu1 %v6582_v5, %s5800_s17  ;;  %v2338_v4 = vpop.permute.xlu0 %2337 }
 0x33d   : > { %2998 = vrot.lane.b32.xlu0 %v6588_v22, %s5800_s17  ;;  %v2347_v63 = vsel %vm930_vm5, %v6696_v6, %v2338_v4  ;;  %v2348_v42 = vsel %vm930_vm5, %v2338_v4, %v2340_v20  ;;  %v2345_v22 = vsel %vm930_vm5, %v6673_v19, %v2332_v54 }
 0x33e   : > { %v2368_v60 = vsel %vm585_vm0, %v2347_v63, 0  ;;  %v2371_v5 = vsel %vm585_vm0, %v2348_v42, 0  ;;  %v5661_v42 = vld [vmem:[%s7664_s3 + $0x5c] sm:$0xff] }
 0x33f   : > { %2377 = vmatpush.bf16.msra.mxu0 %v2368_v60  ;;  %2405 = vmatpush.bf16.msra.mxu1 %v2371_v5  ;;  %v5670_v60 = vld [vmem:[%s7664_s3 + $0x78] sm:$0xff] }
 0x341   : > { %5008 = vmatmul.msk.bf16.gmra.mxu2 %vm1934_vm12, %v5658_v18  ;;  %5012 = vmatmul.msk.bf16.gmra.mxu3 %vm1934_vm12, %v5658_v18 }
 0x343   : > { %4981 = vmatmul.msk.bf16.gmra.mxu0 %vm1934_vm12, %v5652_v25  ;;  %4985 = vmatmul.msk.bf16.gmra.mxu1 %vm1934_vm12, %v5652_v25  ;;  %v2328_v26 = vpop.permute.xlu1 %2327  ;;  %v6766_v57 = vpop.permute.xlu2 %2698 }
 0x344   : > { %3160 = vrot.lane.b32.xlu2 %v6615_v39, %s5801_s28  ;;  %3152 = vrot.lane.b32.xlu1 %v6613_v38, %s5801_s28  ;;  %v2326_v50 = vpop.permute.xlu0 %2325 }
 0x345   : > { %3162 = vrot.lane.b32.xlu0 %v6619_v8, %s5801_s28  ;;  %2378 = vmatpush.bf16.msra.mxu0 %v2345_v22  ;;  %v2343_v46 = vsel %vm930_vm5, %v6716_v17, %v2326_v50  ;;  %v2344_v28 = vsel %vm930_vm5, %v2326_v50, %v2328_v26 }
 0x346   : > { %2406 = vmatpush.bf16.msra.mxu1 %v2346_v2 }
 0x349   : > { %2379 = vmatpush.bf16.msra.mxu0 %v2343_v46 }
 0x34a   : > { %2407 = vmatpush.bf16.msra.mxu1 %v2344_v28 }
 0x34b   : > { %v2322_v19 = vpop.permute.xlu1 %2321 }
 0x34c   : > { %3008 = vrot.lane.b32.xlu2 %v6615_v39, %s5800_s17  ;;  %3000 = vrot.lane.b32.xlu1 %v6613_v38, %s5800_s17  ;;  %v2320_v1 = vpop.permute.xlu0 %2319  ;;  %v6780_v30 = vpop.permute.xlu2 %2844  ;;  %v5659_v38 = vld [vmem:[%s7664_s3 + $0x48] sm:$0xff] }
 0x34d   : > { %3010 = vrot.lane.b32.xlu0 %v6619_v8, %s5800_s17  ;;  %v2341_v35 = vsel %vm930_vm5, %v2318_v15, %v2320_v1  ;;  %v2342_v27 = vsel %vm930_vm5, %v2320_v1, %v2322_v19 }
 0x34e   : > { %2380 = vmatpush.bf16.msra.mxu0 %v2341_v35  ;;  %2408 = vmatpush.bf16.msra.mxu1 %v2342_v27 }
 0x351   : > { %5009 = vmatmul.msk.bf16.gmra.mxu2 %vm1934_vm12, %v5659_v38  ;;  %5013 = vmatmul.msk.bf16.gmra.mxu3 %vm1934_vm12, %v5659_v38 }
 0x353   : > { %4982 = vmatmul.msk.bf16.gmra.mxu0 %vm1934_vm12, %v5653_v61  ;;  %4986 = vmatmul.msk.bf16.gmra.mxu1 %vm1934_vm12, %v5653_v61  ;;  %v2861_v39 = vpop.permute.xlu1 %2860 }
 0x354   : > { %3142 = vrot.lane.b32.xlu2 %v6642_v16, %s5801_s28  ;;  %3146 = vrot.lane.b32.xlu1 %v6640_v51, %s5801_s28  ;;  %v2853_v8 = vpop.permute.xlu0 %2852  ;;  %v6800_v6 = vpop.permute.xlu2 %2692 }
 0x355   : > { %3144 = vrot.lane.b32.xlu0 %v6646_v23, %s5801_s28  ;;  %v2866_v59 = vsel %vm1355_vm7, %v6741_v32, %v2853_v8 }
 0x35b   : > { %v2709_v9 = vpop.permute.xlu1 %2708 }
 0x35c   : > { %2990 = vrot.lane.b32.xlu2 %v6642_v16, %s5800_s17  ;;  %2994 = vrot.lane.b32.xlu1 %v6640_v51, %s5800_s17  ;;  %v6814_v11 = vpop.permute.xlu0 %2700  ;;  %v2857_v34 = vpop.permute.xlu2 %2856  ;;  %v3270_v16 = vld [vmem:[%s7665_s4 + $0x10] sm:$0xff]  ;;  %v3269_v51 = vld [vmem:[%s7665_s4 + $0x8] sm:$0xff] }
 0x35d   : > { %2992 = vrot.lane.b32.xlu0 %v6646_v23, %s5800_s17  ;;  %v2714_v22 = vsel %vm1222_vm6, %v6766_v57, %v6814_v11 }
 0x361   : > { %5010 = vmatmul.msk.bf16.gmra.mxu2 %vm1934_vm12, %v2164_v10  ;;  %5014 = vmatmul.msk.bf16.gmra.mxu3 %vm1934_vm12, %v2164_v10  ;;  %v5048_v10 = vld [vmem:[%s7664_s3 + $0x88] sm:$0xf] }
 0x363   : > { %4983 = vmatmul.msk.bf16.gmra.mxu0 %vm1934_vm12, %v2026_v47  ;;  %4987 = vmatmul.msk.bf16.gmra.mxu1 %vm1934_vm12, %v2026_v47  ;;  %v5021_v47 = vld [vmem:[%s7664_s3 + $0x6c] sm:$0xf] }
 0x364   : > { %3277 = vperm.xlu2 %5780, %v3268_v13   ;;  %3287 = vperm.xlu1 %5779, %v3270_v16   ;;  %v2855_v23 = vpop.permute.xlu1 %2854  ;;  %v2705_v33 = vpop.permute.xlu2 %2704  ;;  %v2312_v16 = vunpack.c.l.b16 %v5021_v47 }
 0x365   : > { %3282 = vperm.xlu0 %5778, %v3269_v51   ;;  %v2847_v14 = vpop.permute.xlu0 %2846  ;;  %v2867_v62 = vsel %vm1355_vm7, %v2853_v8, %v2855_v23  ;;  %v2471_v51 = vunpack.c.l.b16 %v5048_v10  ;;  %v5685_v10 = vld [vmem:[%s7664_s3 + $0xb0] sm:$0xff] }
 0x366   : > { %v2864_v5 = vsel %vm1355_vm7, %v6780_v30, %v2847_v14 }
 0x36c   : > { %3292 = vperm.xlu2 %5780, %v3271_v52   ;;  %3302 = vperm.xlu1 %5779, %v3273_v41   ;;  %v2703_v17 = vpop.permute.xlu1 %2702  ;;  %v2839_v12 = vpop.permute.xlu2 %2838  ;;  %v2316_v41 = vpack.c.b16 %v2312_v16, %v2312_v16 }
 0x36d   : > { %3297 = vperm.xlu0 %5778, %v3272_v45   ;;  %v2695_v43 = vpop.permute.xlu0 %2694  ;;  %v2715_v26 = vsel %vm1222_vm6, %v6814_v11, %v2703_v17  ;;  %v2475_v45 = vpack.c.b16 %v2471_v51, %v2471_v51 }
 0x36e   : > { %v2712_v57 = vsel %vm1222_vm6, %v6800_v6, %v2695_v43  ;;  %v5671_v6 = vld [vmem:[%s7664_s3 + $0x80] sm:$0xff] }
 0x371   : > { %5085 = vmatmul.msk.bf16.vlgmr.msra.gmra.mxu2 %vm1934_vm12, %v5669_v0  ;;  %5089 = vmatmul.msk.bf16.vlgmr.msra.gmra.mxu3 %vm1934_vm12, %v5669_v0 }
 0x373   : > { %5034 = vmatmul.msk.bf16.vlgmr.msra.gmra.mxu0 %vm1934_vm12, %v5660_v24  ;;  %5038 = vmatmul.msk.bf16.vlgmr.msra.gmra.mxu1 %vm1934_vm12, %v5660_v24 }
 0x374   : > { %3307 = vperm.xlu2 %5780, %v3274_v36   ;;  %v2849_v55 = vpop.permute.xlu1 %2848  ;;  %v6851_v21 = vpop.f32.mrf.mxu3 }
 0x375   : > { %v2859_v37 = vpop.permute.xlu0 %2858  ;;  %v6853_v3 = vpop.f32.mrf.mxu2  ;;  %v2865_v18 = vsel %vm1355_vm7, %v2847_v14, %v2849_v55 }
 0x376   : > { %v2868_v56 = vsel %vm1355_vm7, %v2857_v34, %v2859_v37  ;;  %v2869_v7 = vsel %vm1355_vm7, %v2859_v37, %v2861_v39  ;;  %v2687_v58 = vpop.permute.xlu2 %2686 }
 0x377   : > { %v2889_v48 = vsel %vm585_vm0, %v2868_v56, 0  ;;  %v2892_v49 = vsel %vm585_vm0, %v2869_v7, 0 }
 0x378   : > { %2898 = vmatpush.bf16.msrb.mxu2 %v2889_v48  ;;  %2926 = vmatpush.bf16.msrb.mxu3 %v2892_v49  ;;  %v5681_v48 = vld [vmem:[%s7664_s3 + $0x8c] sm:$0xff] }
 0x37c   : > { %2899 = vmatpush.bf16.msrb.mxu2 %v2866_v59  ;;  %2927 = vmatpush.bf16.msrb.mxu3 %v2867_v62  ;;  %v2697_v53 = vpop.permute.xlu1 %2696  ;;  %v6862_v15 = vpop.f32.mrf.mxu3  ;;  %v5684_v59 = vld [vmem:[%s7664_s3 + $0xa8] sm:$0xff] }
 0x37d   : > { %v2707_v54 = vpop.permute.xlu0 %2706  ;;  %v6864_v20 = vpop.f32.mrf.mxu2  ;;  %v2713_v35 = vsel %vm1222_vm6, %v2695_v43, %v2697_v53 }
 0x37e   : > { %v2716_v4 = vsel %vm1222_vm6, %v2705_v33, %v2707_v54  ;;  %v2717_v63 = vsel %vm1222_vm6, %v2707_v54, %v2709_v9  ;;  %v6892_v19 = vpop.permute.xlu2 %3154 }
 0x37f   : > { %v2737_v32 = vsel %vm585_vm0, %v2716_v4, 0  ;;  %v2740_v25 = vsel %vm585_vm0, %v2717_v63, 0 }
 0x380   : > { %2746 = vmatpush.bf16.msrb.mxu0 %v2737_v32  ;;  %2774 = vmatpush.bf16.msrb.mxu1 %v2740_v25 }
 0x381   : > { %2900 = vmatpush.bf16.msrb.mxu2 %v2864_v5  ;;  %2928 = vmatpush.bf16.msrb.mxu3 %v2865_v18 }
 0x382   : > { %5086 = vmatmul.msk.bf16.gmra.mxu2 %vm1934_vm12, %v5670_v60  ;;  %5090 = vmatmul.msk.bf16.gmra.mxu3 %vm1934_vm12, %v5670_v60 }
 0x383   : > { %5035 = vmatmul.msk.bf16.gmra.mxu0 %vm1934_vm12, %v5661_v42  ;;  %5039 = vmatmul.msk.bf16.gmra.mxu1 %vm1934_vm12, %v5661_v42 }
 0x384   : > { %2747 = vmatpush.bf16.msrb.mxu0 %v2714_v22  ;;  %2775 = vmatpush.bf16.msrb.mxu1 %v2715_v26  ;;  %v2843_v2 = vpop.permute.xlu1 %2842  ;;  %v6888_v50 = vpop.f32.mrf.mxu3 }
 0x385   : > { %v2841_v46 = vpop.permute.xlu0 %2840  ;;  %v6890_v28 = vpop.f32.mrf.mxu2 }
 0x386   : > { %v2862_v1 = vsel %vm1355_vm7, %v2839_v12, %v2841_v46  ;;  %v2863_v30 = vsel %vm1355_vm7, %v2841_v46, %v2843_v2  ;;  %v6911_v29 = vpop.permute.xlu2 %3002 }
 0x387   : > { %2901 = vmatpush.bf16.msrb.mxu2 %v2862_v1  ;;  %2929 = vmatpush.bf16.msrb.mxu3 %v2863_v30 }
 0x388   : > { %2748 = vmatpush.bf16.msrb.mxu0 %v2712_v57  ;;  %2776 = vmatpush.bf16.msrb.mxu1 %v2713_v35 }
 0x38c   : > { %v2691_v27 = vpop.permute.xlu1 %2690  ;;  %v6899_v61 = vpop.f32.mrf.mxu3 }
 0x38d   : > { %v2689_v38 = vpop.permute.xlu0 %2688  ;;  %v6901_v39 = vpop.f32.mrf.mxu2 }
 0x38e   : > { %v2710_v8 = vsel %vm1222_vm6, %v2687_v58, %v2689_v38  ;;  %v2711_v44 = vsel %vm1222_vm6, %v2689_v38, %v2691_v27  ;;  %v6927_v13 = vpop.permute.xlu2 %3148 }
 0x38f   : > { %2749 = vmatpush.bf16.msrb.mxu0 %v2710_v8  ;;  %2777 = vmatpush.bf16.msrb.mxu1 %v2711_v44 }
 0x392   : > { %5087 = vmatmul.msk.bf16.gmra.mxu2 %vm1934_vm12, %v5671_v6  ;;  %5091 = vmatmul.msk.bf16.gmra.mxu3 %vm1934_vm12, %v5671_v6 }
 0x393   : > { %5036 = vmatmul.msk.bf16.gmra.mxu0 %vm1934_vm12, %v5662_v40  ;;  %5040 = vmatmul.msk.bf16.gmra.mxu1 %vm1934_vm12, %v5662_v40 }
 0x394   : > { %v3165_v31 = vpop.permute.xlu1 %3164  ;;  %v6917_v9 = vpop.f32.mrf.mxu3 }
 0x395   : > { %v3157_v11 = vpop.permute.xlu0 %3156  ;;  %v6919_v34 = vpop.f32.mrf.mxu2 }
 0x396   : > { %v6939_v17 = vpop.permute.xlu2 %2996  ;;  %v3170_v1 = vsel %vm1621_vm9, %v6892_v19, %v3157_v11  ;;  %v5682_v19 = vld [vmem:[%s7664_s3 + $0x94] sm:$0xff] }
 0x39c   : > { %v6929_v14 = vpop.f32.mrf.mxu3 }
 0x39d   : > { %v3013_v23 = vpop.permute.xlu1 %3012  ;;  %v6933_v52 = vpop.f32.mrf.mxu2 }
 0x39e   : > { %v6931_v33 = vpop.permute.xlu0 %3004  ;;  %v3161_v56 = vpop.permute.xlu2 %3160 }
 0x3a2   : > { %5088 = vmatmul.msk.bf16.gmra.mxu2 %vm1934_vm12, %v2475_v45  ;;  %5092 = vmatmul.msk.bf16.gmra.mxu3 %vm1934_vm12, %v2475_v45 }
 0x3a3   : > { %5037 = vmatmul.msk.bf16.gmra.mxu0 %vm1934_vm12, %v2316_v41  ;;  %5041 = vmatmul.msk.bf16.gmra.mxu1 %vm1934_vm12, %v2316_v41 }
 0x3a4   : > { %v6941_v43 = vpop.f32.mrf.mxu3 }
 0x3a5   : > { %v6943_v0 = vpop.f32.mrf.mxu2 }
 0x3a6   : > { %v3159_v24 = vpop.permute.xlu1 %3158  ;;  %v3009_v5 = vpop.permute.xlu2 %3008 }
 0x3a7   : > { %v3151_v36 = vpop.permute.xlu0 %3150  ;;  %v3171_v30 = vsel %vm1621_vm9, %v3157_v11, %v3159_v24 }
 0x3a8   : > { %v3168_v51 = vsel %vm1621_vm9, %v6927_v13, %v3151_v36 }
 0x3ac   : > { %v2007_v12 = vpop.f32.mrf.mxu3 }
 0x3ad   : > { %v1979_v37 = vpop.f32.mrf.mxu2 }
 0x3ae   : > { %v6945_v55 = vpop.permute.xlu1 %3006  ;;  %v3143_v41 = vpop.permute.xlu2 %3142 }
 0x3af   : > { %v6947_v7 = vpop.permute.xlu0 %2998 }
 0x3b0   : > { %v2092_v49 = vpop.f32.mrf.mxu0  ;;  %v2120_v58 = vpop.f32.mrf.mxu1 }
 0x3b1   : > { %v2093_v62 = vadd.f32 %v2092_v49, %v6853_v3  ;;  %v2121_v53 = vadd.f32 %v2120_v58, %v6851_v21 }
 0x3b2   : > { %5175 = vmatmul.msk.bf16.vlgmr.msrb.gmra.mxu2 %vm1934_vm12, %v5684_v59  ;;  %5179 = vmatmul.msk.bf16.vlgmr.msrb.gmra.mxu3 %vm1934_vm12, %v5684_v59 }
 0x3b3   : > { %5148 = vmatmul.msk.bf16.vlgmr.msrb.gmra.mxu0 %vm1934_vm12, %v5681_v48  ;;  %5152 = vmatmul.msk.bf16.vlgmr.msrb.gmra.mxu1 %vm1934_vm12, %v5681_v48 }
 0x3b4   : > { %v2258_v4 = vpop.f32.mrf.mxu3 }
 0x3b5   : > { %v6961_v63 = vadd.f32 %v2258_v4, %v2121_v53  ;;  %v2230_v32 = vpop.f32.mrf.mxu2 }
 0x3b6   : > { %v3153_v54 = vpop.permute.xlu1 %3152  ;;  %v6965_v60 = vadd.f32 %v2230_v32, %v2093_v62  ;;  %v2991_v62 = vpop.permute.xlu2 %2990 }
 0x3b7   : > { %v3163_v42 = vpop.permute.xlu0 %3162 }
 0x3b8   : > { %v3172_v25 = vsel %vm1621_vm9, %v3161_v56, %v3163_v42  ;;  %v3173_v3 = vsel %vm1621_vm9, %v3163_v42, %v3165_v31  ;;  %v2094_v21 = vpop.f32.mrf.mxu0  ;;  %v2122_v2 = vpop.f32.mrf.mxu1 }
 0x3b9   : > { %v3193_v18 = vsel %vm585_vm0, %v3172_v25, 0  ;;  %v3196_v22 = vsel %vm585_vm0, %v3173_v3, 0  ;;  %v2095_v26 = vadd.f32 %v2094_v21, %v6864_v20  ;;  %v2123_v46 = vadd.f32 %v2122_v2, %v6862_v15 }
 0x3ba   : > { %3202 = vmatpush.bf16.msra.mxu2 %v3193_v18  ;;  %3230 = vmatpush.bf16.msra.mxu3 %v3196_v22 }
 0x3bc   : > { %v2260_v35 = vpop.f32.mrf.mxu3 }
 0x3bd   : > { %v6974_v27 = vadd.f32 %v2260_v35, %v2123_v46  ;;  %v2232_v8 = vpop.f32.mrf.mxu2  ;;  %v5162_v35 = vld [vmem:[%s7664_s3 + $0xc0] sm:$0xf] }
 0x3be   : > { %3203 = vmatpush.bf16.msra.mxu2 %v3170_v1  ;;  %3231 = vmatpush.bf16.msra.mxu3 %v3171_v30  ;;  %v3001_v57 = vpop.permute.xlu1 %3000  ;;  %v6978_v15 = vadd.f32 %v2232_v8, %v2095_v26  ;;  %v2833_v8 = vunpack.c.l.b16 %v5162_v35 }
 0x3bf   : > { %v3011_v38 = vpop.permute.xlu0 %3010 }
 0x3c0   : > { %v3020_v20 = vsel %vm1488_vm8, %v3009_v5, %v3011_v38  ;;  %v3021_v44 = vsel %vm1488_vm8, %v3011_v38, %v3013_v23  ;;  %v2097_v40 = vpop.f32.mrf.mxu0  ;;  %v2125_v47 = vpop.f32.mrf.mxu1  ;;  %v3169_v23 = vsel %vm1621_vm9, %v3151_v36, %v3153_v54  ;;  %v5686_v5 = vld [vmem:[%s7664_s3 + $0xb8] sm:$0xff] }
 0x3c1   : > { %v3041_v6 = vsel %vm585_vm0, %v3020_v20, 0  ;;  %v3044_v31 = vsel %vm585_vm0, %v3021_v44, 0  ;;  %v2098_v11 = vadd.f32 %v2097_v40, %v6890_v28  ;;  %v2126_v16 = vadd.f32 %v2125_v47, %v6888_v50 }
 0x3c2   : > { %3050 = vmatpush.bf16.msra.mxu0 %v3041_v6  ;;  %3078 = vmatpush.bf16.msra.mxu1 %v3044_v31  ;;  %v3018_v50 = vsel %vm1488_vm8, %v6911_v29, %v6931_v33  ;;  %v3019_v28 = vsel %vm1488_vm8, %v6931_v33, %v6945_v55  ;;  %v3016_v33 = vsel %vm1488_vm8, %v6939_v17, %v6947_v7 }
 0x3c3   : > { %3204 = vmatpush.bf16.msra.mxu2 %v3168_v51  ;;  %3232 = vmatpush.bf16.msra.mxu3 %v3169_v23  ;;  %v3017_v55 = vsel %vm1488_vm8, %v6947_v7, %v3001_v57  ;;  %v2837_v47 = vpack.c.b16 %v2833_v8, %v2833_v8  ;;  %v5216_v8 = vld [vmem:[%s7664_s3 + $0xf8] sm:$0xf] }
 0x3c4   : > { %5149 = vmatmul.msk.bf16.gmra.mxu0 %vm1934_vm12, %v5682_v19  ;;  %5153 = vmatmul.msk.bf16.gmra.mxu1 %vm1934_vm12, %v5682_v19  ;;  %v2263_v45 = vpop.f32.mrf.mxu3 }
 0x3c5   : > { %5176 = vmatmul.msk.bf16.gmra.mxu2 %vm1934_vm12, %v5685_v10  ;;  %5180 = vmatmul.msk.bf16.gmra.mxu3 %vm1934_vm12, %v5685_v10  ;;  %v7003_v24 = vadd.f32 %v2263_v45, %v2126_v16  ;;  %v2235_v12 = vpop.f32.mrf.mxu2 }
 0x3c6   : > { %3051 = vmatpush.bf16.msra.mxu0 %v3018_v50  ;;  %3079 = vmatpush.bf16.msra.mxu1 %v3019_v28  ;;  %v3147_v13 = vpop.permute.xlu1 %3146  ;;  %v7005_v37 = vadd.f32 %v2235_v12, %v2098_v11  ;;  %v5690_v12 = vld [vmem:[%s7664_s3 + $0xe0] sm:$0xff] }
 0x3c7   : > { %v3145_v36 = vpop.permute.xlu0 %3144 }
 0x3c8   : > { %v2099_v56 = vpop.f32.mrf.mxu0  ;;  %v3166_v48 = vsel %vm1621_vm9, %v3143_v41, %v3145_v36  ;;  %v3167_v49 = vsel %vm1621_vm9, %v3145_v36, %v3147_v13  ;;  %v2127_v58 = vpop.f32.mrf.mxu1 }
 0x3c9   : > { %v2100_v29 = vadd.f32 %v2099_v56, %v6901_v39  ;;  %3205 = vmatpush.bf16.msra.mxu2 %v3166_v48  ;;  %3233 = vmatpush.bf16.msra.mxu3 %v3167_v49  ;;  %v2128_v59 = vadd.f32 %v2127_v58, %v6899_v61  ;;  %v5683_v61 = vld [vmem:[%s7664_s3 + $0x9c] sm:$0xff] }
 0x3ca   : > { %3052 = vmatpush.bf16.msra.mxu0 %v3016_v33  ;;  %3080 = vmatpush.bf16.msra.mxu1 %v3017_v55 }
 0x3cc   : > { %v2265_v54 = vpop.f32.mrf.mxu3 }
 0x3cd   : > { %v7016_v4 = vadd.f32 %v2265_v54, %v2128_v59  ;;  %v2237_v42 = vpop.f32.mrf.mxu2 }
 0x3ce   : > { %v2995_v53 = vpop.permute.xlu1 %2994  ;;  %v7018_v32 = vadd.f32 %v2237_v42, %v2100_v29 }
 0x3cf   : > { %v2993_v39 = vpop.permute.xlu0 %2992 }
 0x3d0   : > { %v2102_v25 = vpop.f32.mrf.mxu0  ;;  %v3014_v3 = vsel %vm1488_vm8, %v2991_v62, %v2993_v39  ;;  %v3015_v17 = vsel %vm1488_vm8, %v2993_v39, %v2995_v53  ;;  %v2130_v21 = vpop.f32.mrf.mxu1  ;;  %v5688_v62 = vld [vmem:[%s7664_s3 + $0xcc] sm:$0xff] }
 0x3d1   : > { %v2103_v7 = vadd.f32 %v2102_v25, %v6919_v34  ;;  %3053 = vmatpush.bf16.msra.mxu0 %v3014_v3  ;;  %3081 = vmatpush.bf16.msra.mxu1 %v3015_v17  ;;  %v2131_v18 = vadd.f32 %v2130_v21, %v6917_v9  ;;  %v5099_v9 = vld [vmem:[%s7664_s3 + $0xa4] sm:$0xf]  ;;  %v5691_v39 = vld [vmem:[%s7664_s3 + $0xe8] sm:$0xff] }
 0x3d2   : > { %v2634_v38 = vunpack.c.l.b16 %v5099_v9 }
 0x3d4   : > { %5150 = vmatmul.msk.bf16.gmra.mxu0 %vm1934_vm12, %v5683_v61  ;;  %5154 = vmatmul.msk.bf16.gmra.mxu1 %vm1934_vm12, %v5683_v61  ;;  %v2268_v22 = vpop.f32.mrf.mxu3  ;;  %v2638_v6 = vpack.c.b16 %v2634_v38, %v2634_v38 }
 0x3d5   : > { %5177 = vmatmul.msk.bf16.gmra.mxu2 %vm1934_vm12, %v5686_v5  ;;  %5181 = vmatmul.msk.bf16.gmra.mxu3 %vm1934_vm12, %v5686_v5  ;;  %v7034_v26 = vadd.f32 %v2268_v22, %v2131_v18  ;;  %v2240_v34 = vpop.f32.mrf.mxu2  ;;  %v5689_v18 = vld [vmem:[%s7664_s3 + $0xd4] sm:$0xff] }
 0x3d6   : > { %v7036_v2 = vadd.f32 %v2240_v34, %v2103_v7 }
 0x3d8   : > { %v2104_v46 = vpop.f32.mrf.mxu0  ;;  %v2132_v30 = vpop.f32.mrf.mxu1 }
 0x3d9   : > { %v2105_v1 = vadd.f32 %v2104_v46, %v6933_v52  ;;  %v2133_v57 = vadd.f32 %v2132_v30, %v6929_v14  ;;  %v5692_v46 = vld [vmem:[%s7664_s3 + $0xf0] sm:$0xff] }
 0x3dc   : > { %v2270_v20 = vpop.f32.mrf.mxu3 }
 0x3dd   : > { %v7046_v44 = vadd.f32 %v2270_v20, %v2133_v57  ;;  %v2242_v40 = vpop.f32.mrf.mxu2 }
 0x3de   : > { %v7048_v19 = vadd.f32 %v2242_v40, %v2105_v1  ;;  %v3137_v40 = vunpack.c.l.b16 %v5216_v8  ;;  %v5707_v8 = vld [vmem:[%s7670_s9 + $0x70] sm:$0xff] }
 0x3e0   : > { %v2107_v52 = vpop.f32.mrf.mxu0  ;;  %v2135_v11 = vpop.f32.mrf.mxu1 }
 0x3e1   : > { %v2108_v31 = vadd.f32 %v2107_v52, %v6943_v0  ;;  %v2136_v14 = vadd.f32 %v2135_v11, %v6941_v43  ;;  %v5687_v43 = vld [vmem:[%s7664_s3 + $0xc4] sm:$0xff] }
 0x3e4   : > { %5151 = vmatmul.msk.bf16.gmra.mxu0 %vm1934_vm12, %v2638_v6  ;;  %5155 = vmatmul.msk.bf16.gmra.mxu1 %vm1934_vm12, %v2638_v6  ;;  %v2273_v10 = vpop.f32.mrf.mxu3 }
 0x3e5   : > { %5178 = vmatmul.msk.bf16.gmra.mxu2 %vm1934_vm12, %v2837_v47  ;;  %5182 = vmatmul.msk.bf16.gmra.mxu3 %vm1934_vm12, %v2837_v47  ;;  %v2245_v16 = vpop.f32.mrf.mxu2  ;;  %v7056_v51 = vadd.f32 %v2273_v10, %v2136_v14  ;;  %v3141_v10 = vpack.c.b16 %v3137_v40, %v3137_v40  ;;  %v5723_v40 = vld [vmem:[%s7670_s9 + $0xf0] sm:$0xff] }
 0x3e6   : > { %v7058_v23 = vadd.f32 %v2245_v16, %v2108_v31 }
 0x3e8   : > { %v2109_v41 = vpop.f32.mrf.mxu0  ;;  %v2137_v0 = vpop.f32.mrf.mxu1 }
 0x3ec   : > { %v2275_v50 = vpop.f32.mrf.mxu3 }
 0x3ed   : > { %v2247_v28 = vpop.f32.mrf.mxu2 }
 0x3f0   : > { %v2382_v13 = vpop.f32.mrf.mxu0  ;;  %v2410_v36 = vpop.f32.mrf.mxu1 }
 0x3f1   : > { %v2429_v45 = vadd.f32 %v2382_v13, %v6965_v60  ;;  %v2430_v56 = vadd.f32 %v2410_v36, %v6961_v63 }
 0x3f4   : > { %5202 = vmatmul.msk.bf16.vlgmr.msra.gmra.mxu0 %vm1934_vm12, %v5687_v43  ;;  %5206 = vmatmul.msk.bf16.vlgmr.msra.gmra.mxu1 %vm1934_vm12, %v5687_v43  ;;  %v2566_v48 = vpop.f32.mrf.mxu3 }
 0x3f5   : > { %5229 = vmatmul.msk.bf16.vlgmr.msra.gmra.mxu2 %vm1934_vm12, %v5690_v12  ;;  %5233 = vmatmul.msk.bf16.vlgmr.msra.gmra.mxu3 %vm1934_vm12, %v5690_v12  ;;  %v2538_v49 = vpop.f32.mrf.mxu2  ;;  %v7072_v29 = vadd.f32 %v2566_v48, %v2430_v56 }
 0x3f6   : > { %v7074_v60 = vadd.f32 %v2538_v49, %v2429_v45 }
 0x3f8   : > { %v7076_v58 = vpop.f32.mrf.mxu0  ;;  %v7078_v33 = vpop.f32.mrf.mxu1 }
 0x3fc   : > { %v7080_v55 = vpop.f32.mrf.mxu3 }
 0x3fd   : > { %v7082_v63 = vpop.f32.mrf.mxu2 }
 0x400   : > { %v2387_v59 = vpop.f32.mrf.mxu0  ;;  %v2415_v54 = vpop.f32.mrf.mxu1 }
 0x401   : > { %v2433_v53 = vadd.f32 %v2387_v59, %v7005_v37  ;;  %v2434_v42 = vadd.f32 %v2415_v54, %v7003_v24 }
 0x404   : > { %5203 = vmatmul.msk.bf16.gmra.mxu0 %vm1934_vm12, %v5688_v62  ;;  %5207 = vmatmul.msk.bf16.gmra.mxu1 %vm1934_vm12, %v5688_v62 }
 0x405   : > { %5230 = vmatmul.msk.bf16.gmra.mxu2 %vm1934_vm12, %v5691_v39  ;;  %5234 = vmatmul.msk.bf16.gmra.mxu3 %vm1934_vm12, %v5691_v39  ;;  %v2543_v25 = vpop.f32.mrf.mxu2  ;;  %v2571_v3 = vpop.f32.mrf.mxu3 }
 0x406   : > { %v2589_v17 = vadd.f32 %v2543_v25, %v2433_v53  ;;  %v2590_v61 = vadd.f32 %v2571_v3, %v2434_v42 }
 0x408   : > { %v7096_v37 = vpop.f32.mrf.mxu0  ;;  %v7098_v7 = vpop.f32.mrf.mxu1 }
 0x40d   : > { %v7100_v21 = vpop.f32.mrf.mxu2  ;;  %v7102_v5 = vpop.f32.mrf.mxu3 }
 0x410   : > { %v2392_v24 = vpop.f32.mrf.mxu0  ;;  %v2420_v34 = vpop.f32.mrf.mxu1 }
 0x411   : > { %v2437_v22 = vadd.f32 %v2392_v24, %v7036_v2  ;;  %v2438_v1 = vadd.f32 %v2420_v34, %v7034_v26  ;;  %v5189_v26 = vld [vmem:[%s7664_s3 + $0xdc] sm:$0xf] }
 0x412   : > { %v2985_v20 = vunpack.c.l.b16 %v5189_v26  ;;  %v5708_v34 = vld [vmem:[%s7670_s9 + $0x78] sm:$0xff]  ;;  %v5699_v26 = vld [vmem:[%s7670_s9 + $0x30] sm:$0xff] }
 0x413   : > { %3502 = vmatpush.bf16.msrb.mxu1 %v5708_v34  ;;  %v5719_v34 = vld [vmem:[%s7670_s9 + $0xd0] sm:$0xff] }
 0x414   : > { %5204 = vmatmul.msk.bf16.gmra.mxu0 %vm1934_vm12, %v5689_v18  ;;  %5208 = vmatmul.msk.bf16.gmra.mxu1 %vm1934_vm12, %v5689_v18  ;;  %v2989_v11 = vpack.c.b16 %v2985_v20, %v2985_v20  ;;  %v5715_v20 = vld [vmem:[%s7670_s9 + $0xb0] sm:$0xff] }
 0x415   : > { %5231 = vmatmul.msk.bf16.gmra.mxu2 %vm1934_vm12, %v5692_v46  ;;  %5235 = vmatmul.msk.bf16.gmra.mxu3 %vm1934_vm12, %v5692_v46  ;;  %v2548_v30 = vpop.f32.mrf.mxu2  ;;  %v2576_v9 = vpop.f32.mrf.mxu3  ;;  %v5716_v46 = vld [vmem:[%s7670_s9 + $0xb8] sm:$0xff] }
 0x416   : > { %v7116_v57 = vadd.f32 %v2548_v30, %v2437_v22  ;;  %v7118_v2 = vadd.f32 %v2576_v9, %v2438_v1  ;;  %v5700_v22 = vld [vmem:[%s7670_s9 + $0x38] sm:$0xff]  ;;  %3659 = vmatpush.bf16.msrb.mxu2 %v5716_v46 }
 0x417   : > { %v5724_v9 = vld [vmem:[%s7670_s9 + $0xf8] sm:$0xff]  ;;  %3474 = vmatpush.bf16.msrb.mxu0 %v5700_v22  ;;  %3503 = vmatpush.bf16.msrb.mxu1 %v5707_v8  ;;  %v5711_v22 = vld [vmem:[%s7670_s9 + $0x90] sm:$0xff]  ;;  %v5702_v8 = vld [vmem:[%s7670_s9 + $0x48] sm:$0xff] }
 0x418   : > { %v7120_v35 = vpop.f32.mrf.mxu0  ;;  %v7122_v38 = vpop.f32.mrf.mxu1  ;;  %3687 = vmatpush.bf16.msrb.mxu3 %v5724_v9 }
 0x41a   : > { %3660 = vmatpush.bf16.msrb.mxu2 %v5715_v20  ;;  %v5710_v20 = vld [vmem:[%s7670_s9 + $0x88] sm:$0xff] }
 0x41b   : > { %3475 = vmatpush.bf16.msrb.mxu0 %v5699_v26  ;;  %v5694_v26 = vld [vmem:[%s7670_s9 + $0x8] sm:$0xff] }
 0x41c   : > { %3688 = vmatpush.bf16.msrb.mxu3 %v5723_v40 }
 0x41d   : > { %v7130_v52 = vpop.f32.mrf.mxu2  ;;  %v7132_v6 = vpop.f32.mrf.mxu3 }
 0x420   : > { %v2397_v31 = vpop.f32.mrf.mxu0  ;;  %v2425_v14 = vpop.f32.mrf.mxu1 }
 0x421   : > { %v2441_v47 = vadd.f32 %v2397_v31, %v7058_v23  ;;  %v2442_v16 = vadd.f32 %v2425_v14, %v7056_v51  ;;  %v5706_v14 = vld [vmem:[%s7670_s9 + $0x68] sm:$0xff] }
 0x422   : > { %3504 = vmatpush.bf16.msrb.mxu1 %v5706_v14  ;;  %v5718_v14 = vld [vmem:[%s7670_s9 + $0xc8] sm:$0xff] }
 0x424   : > { %5205 = vmatmul.msk.bf16.gmra.mxu0 %vm1934_vm12, %v2989_v11  ;;  %5209 = vmatmul.msk.bf16.gmra.mxu1 %vm1934_vm12, %v2989_v11 }
 0x425   : > { %5232 = vmatmul.msk.bf16.gmra.mxu2 %vm1934_vm12, %v3141_v10  ;;  %5236 = vmatmul.msk.bf16.gmra.mxu3 %vm1934_vm12, %v3141_v10  ;;  %v2553_v41 = vpop.f32.mrf.mxu2  ;;  %v2581_v0 = vpop.f32.mrf.mxu3  ;;  %v5714_v10 = vld [vmem:[%s7670_s9 + $0xa8] sm:$0xff] }
 0x426   : > { %v7140_v50 = vadd.f32 %v2553_v41, %v2441_v47  ;;  %v7142_v28 = vadd.f32 %v2581_v0, %v2442_v16  ;;  %v5698_v47 = vld [vmem:[%s7670_s9 + $0x28] sm:$0xff]  ;;  %3661 = vmatpush.bf16.msrb.mxu2 %v5714_v10 }
 0x427   : > { %v5722_v0 = vld [vmem:[%s7670_s9 + $0xe8] sm:$0xff]  ;;  %3476 = vmatpush.bf16.msrb.mxu0 %v5698_v47 }
 0x428   : > { %v2399_v13 = vpop.f32.mrf.mxu0  ;;  %v2427_v23 = vpop.f32.mrf.mxu1  ;;  %3689 = vmatpush.bf16.msrb.mxu3 %v5722_v0  ;;  %v5701_v0 = vld [vmem:[%s7670_s9 + $0x40] sm:$0xff] }
 0x42d   : > { %v2555_v43 = vpop.f32.mrf.mxu2  ;;  %v2583_v45 = vpop.f32.mrf.mxu3 }
 0x42e   : > { %v5697_v43 = vld [vmem:[%s7670_s9 + $0x20] sm:$0xff] }
 0x42f   : > { %v5705_v45 = vld [vmem:[%s7670_s9 + $0x60] sm:$0xff]  ;;  %3477 = vmatpush.bf16.msrb.mxu0 %v5697_v43 }
 0x430   : > { %v2751_v36 = vpop.f32.mrf.mxu0  ;;  %v2779_v12 = vpop.f32.mrf.mxu1  ;;  %3505 = vmatpush.bf16.msrb.mxu1 %v5705_v45 }
 0x431   : > { %v2798_v51 = vadd.f32 %v2751_v36, %v7074_v60  ;;  %v2799_v56 = vadd.f32 %v2779_v12, %v7072_v29  ;;  %v5713_v36 = vld [vmem:[%s7670_s9 + $0xa0] sm:$0xff]  ;;  %v5696_v12 = vld [vmem:[%s7670_s9 + $0x18] sm:$0xff] }
 0x432   : > { %3662 = vmatpush.bf16.msrb.mxu2 %v5713_v36 }
 0x433   : > { %3478 = vmatpush.bf16.msrb.mxu0 %v5696_v12 }
 0x435   : > { %v2903_v48 = vpop.f32.mrf.mxu2  ;;  %v2931_v49 = vpop.f32.mrf.mxu3 }
 0x436   : > { %v7146_v59 = vadd.f32 %v2903_v48, %v2798_v51  ;;  %v7148_v62 = vadd.f32 %v2931_v49, %v2799_v56  ;;  %v5704_v56 = vld [vmem:[%s7670_s9 + $0x58] sm:$0xff] }
 0x437   : > { %v5712_v48 = vld [vmem:[%s7670_s9 + $0x98] sm:$0xff]  ;;  %3506 = vmatpush.bf16.msrb.mxu1 %v5704_v56 }
 0x438   : > { %v7150_v53 = vpop.f32.mrf.mxu0  ;;  %v7152_v54 = vpop.f32.mrf.mxu1  ;;  %3663 = vmatpush.bf16.msrb.mxu2 %v5712_v48  ;;  %v2431_v48 = vadd.f32 %v7076_v58, %v6978_v15 }
 0x43c   : > { %3664 = vmatpush.bf16.msrb.mxu2 %v5711_v22  ;;  %v2587_v22 = vadd.f32 %v7082_v63, %v2431_v48 }
 0x43d   : > { %v7154_v39 = vpop.f32.mrf.mxu2  ;;  %v7156_v42 = vpop.f32.mrf.mxu3 }
 0x440   : > { %3665 = vmatpush.bf16.msrb.mxu2 %v5710_v20  ;;  %v2800_v20 = vadd.f32 %v7150_v53, %v2587_v22 }
 0x441   : > { %v2756_v25 = vpop.f32.mrf.mxu0  ;;  %v2784_v3 = vpop.f32.mrf.mxu1 }
 0x442   : > { %v2802_v60 = vadd.f32 %v2756_v25, %v2589_v17  ;;  %v2803_v24 = vadd.f32 %v2784_v3, %v2590_v61  ;;  %v2952_v15 = vadd.f32 %v7154_v39, %v2800_v20 }
 0x448   : > { %v2908_v18 = vpop.f32.mrf.mxu2  ;;  %v2936_v29 = vpop.f32.mrf.mxu3 }
 0x449   : > { %v7167_v1 = vadd.f32 %v2908_v18, %v2802_v60  ;;  %v7169_v30 = vadd.f32 %v2936_v29, %v2803_v24  ;;  %v7171_v17 = vpop.f32.mrf.mxu0  ;;  %v7173_v61 = vpop.f32.mrf.mxu1  ;;  %v5720_v24 = vld [vmem:[%s7670_s9 + $0xd8] sm:$0xff]  ;;  %v5695_v18 = vld [vmem:[%s7670_s9 + $0x10] sm:$0xff] }
 0x44a   : > { %v5703_v29 = vld [vmem:[%s7670_s9 + $0x50] sm:$0xff]  ;;  %3479 = vmatpush.bf16.msrb.mxu0 %v5695_v18 }
 0x44b   : > { %3507 = vmatpush.bf16.msrb.mxu1 %v5703_v29 }
 0x44e   : > { %3480 = vmatpush.bf16.msrb.mxu0 %v5694_v26 }
 0x44f   : > { %3508 = vmatpush.bf16.msrb.mxu1 %v5702_v8 }
 0x450   : > { %v7190_v31 = vpop.f32.mrf.mxu2  ;;  %v7192_v11 = vpop.f32.mrf.mxu3 }
 0x451   : > { %v2761_v16 = vpop.f32.mrf.mxu0  ;;  %v2789_v41 = vpop.f32.mrf.mxu1 }
 0x452   : > { %v2806_v13 = vadd.f32 %v2761_v16, %v7116_v57  ;;  %v2807_v23 = vadd.f32 %v2789_v41, %v7118_v2  ;;  %v5721_v57 = vld [vmem:[%s7670_s9 + $0xe0] sm:$0xff] }
 0x453   : > { %3690 = vmatpush.bf16.msrb.mxu3 %v5721_v57  ;;  %v5693_v41 = vld [vmem:[%s7670_s9] sm:$0xff]  ;;  %3509 = vmatpush.bf16.msrb.mxu1 %v5701_v0 }
 0x454   : > { %3481 = vmatpush.bf16.msrb.mxu0 %v5693_v41 }
 0x457   : > { %3691 = vmatpush.bf16.msrb.mxu3 %v5720_v24  ;;  %v2432_v24 = vadd.f32 %v7078_v33, %v6974_v27 }
 0x458   : > { %v2913_v2 = vpop.f32.mrf.mxu2  ;;  %v2941_v51 = vpop.f32.mrf.mxu3 }
 0x459   : > { %v7229_v49 = vadd.f32 %v2913_v2, %v2806_v13  ;;  %v7231_v25 = vadd.f32 %v2941_v51, %v2807_v23  ;;  %v7233_v3 = vpop.f32.mrf.mxu0  ;;  %v7235_v60 = vpop.f32.mrf.mxu1  ;;  %v5709_v13 = vld [vmem:[%s7670_s9 + $0x80] sm:$0xff] }
 0x45a   : > { %3666 = vmatpush.bf16.msrb.mxu2 %v5709_v13 }
 0x45b   : > { %3692 = vmatpush.bf16.msrb.mxu3 %v5719_v34  ;;  %v2588_v34 = vadd.f32 %v7080_v55, %v2432_v24 }
 0x45f   : > { %3693 = vmatpush.bf16.msrb.mxu3 %v5718_v14 }
 0x460   : > { %v7252_v46 = vpop.f32.mrf.mxu2  ;;  %v7254_v9 = vpop.f32.mrf.mxu3 }
 0x461   : > { %v2766_v40 = vpop.f32.mrf.mxu0  ;;  %v2794_v47 = vpop.f32.mrf.mxu1 }
 0x462   : > { %v2810_v10 = vadd.f32 %v2766_v40, %v7140_v50  ;;  %v2811_v16 = vadd.f32 %v2794_v47, %v7142_v28  ;;  %v5717_v50 = vld [vmem:[%s7670_s9 + $0xc0] sm:$0xff]  ;;  %v2801_v40 = vadd.f32 %v7152_v54, %v2588_v34 }
 0x463   : > { %3694 = vmatpush.bf16.msrb.mxu3 %v5717_v50 }
 0x464   : > { %v2953_v27 = vadd.f32 %v7156_v42, %v2801_v40 }
 0x468   : > { %v2918_v28 = vpop.f32.mrf.mxu2  ;;  %v2946_v23 = vpop.f32.mrf.mxu3 }
 0x469   : > { %v7282_v43 = vadd.f32 %v2918_v28, %v2810_v10  ;;  %v7284_v45 = vadd.f32 %v2946_v23, %v2811_v16  ;;  %v2768_v36 = vpop.f32.mrf.mxu0  ;;  %v2796_v57 = vpop.f32.mrf.mxu1 }
 0x46a   : > { %v3278_v10 = vpop.permute.xlu2 %3277 }
 0x470   : > { %v2920_v2 = vpop.f32.mrf.mxu2  ;;  %v2948_v51 = vpop.f32.mrf.mxu3 }
 0x471   : > { %v3055_v12 = vpop.f32.mrf.mxu0  ;;  %v3083_v56 = vpop.f32.mrf.mxu1  ;;  %v2435_v2 = vadd.f32 %v7096_v37, %v7018_v32  ;;  %v2436_v51 = vadd.f32 %v7098_v7, %v7016_v4  ;;  %v5732_v4 = vld [vmem:[%s7670_s9 + $0x138] sm:$0xff] }
 0x472   : > { %v3102_v47 = vadd.f32 %v3055_v12, %v7146_v59  ;;  %v3103_v14 = vadd.f32 %v3083_v56, %v7148_v62  ;;  %v3283_v59 = vpop.permute.xlu0 %3282  ;;  %v5740_v32 = vld [vmem:[%s7670_s9 + $0x178] sm:$0xff]  ;;  %3844 = vmatpush.bf16.msra.mxu0 %v5732_v4 }
 0x473   : > { %v2591_v48 = vadd.f32 %v7100_v21, %v2435_v2  ;;  %3872 = vmatpush.bf16.msra.mxu1 %v5740_v32 }
 0x475   : > { %v2804_v37 = vadd.f32 %v7171_v17, %v2591_v48  ;;  %v5731_v17 = vld [vmem:[%s7670_s9 + $0x130] sm:$0xff] }
 0x476   : > { %3845 = vmatpush.bf16.msra.mxu0 %v5731_v17 }
 0x478   : > { %v3207_v18 = vpop.f32.mrf.mxu2  ;;  %v3235_v29 = vpop.f32.mrf.mxu3 }
 0x479   : > { %v3057_v26 = vpop.f32.mrf.mxu0  ;;  %v3085_v8 = vpop.f32.mrf.mxu1  ;;  %v3254_v58 = vadd.f32 %v3207_v18, %v3102_v47  ;;  %v3255_v33 = vadd.f32 %v3235_v29, %v3103_v14  ;;  %v2592_v29 = vadd.f32 %v7102_v5, %v2436_v51 }
 0x47a   : > { %v3104_v63 = vadd.f32 %v3057_v26, %v2952_v15  ;;  %v3105_v16 = vadd.f32 %v3085_v8, %v2953_v27  ;;  %v2956_v26 = vadd.f32 %v7190_v31, %v2804_v37  ;;  %v3288_v47 = vpop.permute.xlu1 %3287  ;;  %v5730_v31 = vld [vmem:[%s7670_s9 + $0x128] sm:$0xff]  ;;  %v3298_v4 = vpop.permute.xlu0 %3297 }
 0x47b   : > { %v3310_v0 = vadd.f32 %v3278_v10, %v3254_v58  ;;  %v3311_v13 = vadd.f32 %v3278_v10, %v3255_v33  ;;  %v2805_v7 = vadd.f32 %v7173_v61, %v2592_v29  ;;  %v5739_v61 = vld [vmem:[%s7670_s9 + $0x170] sm:$0xff]  ;;  %3846 = vmatpush.bf16.msra.mxu0 %v5730_v31  ;;  %v5734_v37 = vld [vmem:[%s7670_s9 + $0x148] sm:$0xff] }
 0x47c   : > { %3873 = vmatpush.bf16.msra.mxu1 %v5739_v61 }
 0x47d   : > { %v3324_v36 = vmax.f32 %v3310_v0, 0.0  ;;  %v3325_v39 = vmax.f32 %v3311_v13, 0.0  ;;  %v2957_v8 = vadd.f32 %v7192_v11, %v2805_v7  ;;  %v5738_v11 = vld [vmem:[%s7670_s9 + $0x168] sm:$0xff]  ;;  %v5729_v13 = vld [vmem:[%s7670_s9 + $0x120] sm:$0xff] }
 0x47f   : > { %3847 = vmatpush.bf16.msra.mxu0 %v5729_v13 }
 0x480   : > { %v3209_v55 = vpop.f32.mrf.mxu2  ;;  %v3237_v41 = vpop.f32.mrf.mxu3  ;;  %3874 = vmatpush.bf16.msra.mxu1 %v5738_v11 }
 0x481   : > { %v3256_v53 = vadd.f32 %v3209_v55, %v3104_v63  ;;  %v3257_v50 = vadd.f32 %v3237_v41, %v3105_v16  ;;  %v3060_v54 = vpop.f32.mrf.mxu0  ;;  %v3088_v28 = vpop.f32.mrf.mxu1 }
 0x482   : > { %v3106_v21 = vadd.f32 %v3060_v54, %v7167_v1  ;;  %v3107_v5 = vadd.f32 %v3088_v28, %v7169_v30  ;;  %v3293_v55 = vpop.permute.xlu2 %3292 }
 0x483   : > { %v3312_v23 = vadd.f32 %v3283_v59, %v3256_v53  ;;  %v3313_v62 = vadd.f32 %v3283_v59, %v3257_v50  ;;  %v5737_v53 = vld [vmem:[%s7670_s9 + $0x160] sm:$0xff] }
 0x484   : > { %3875 = vmatpush.bf16.msra.mxu1 %v5737_v53 }
 0x485   : > { %v3326_v57 = vmax.f32 %v3312_v23, 0.0  ;;  %v3327_v42 = vmax.f32 %v3313_v62, 0.0  ;;  %v2439_v23 = vadd.f32 %v7120_v35, %v7048_v19  ;;  %v2440_v62 = vadd.f32 %v7122_v38, %v7046_v44  ;;  %v5728_v44 = vld [vmem:[%s7670_s9 + $0x118] sm:$0xff] }
 0x486   : > { %v5736_v38 = vld [vmem:[%s7670_s9 + $0x158] sm:$0xff]  ;;  %3848 = vmatpush.bf16.msra.mxu0 %v5728_v44 }
 0x487   : > { %v7302_v12 = vpack.c.bf16 %v3326_v57, %v3324_v36  ;;  %v7304_v56 = vpack.c.bf16 %v3327_v42, %v3325_v39  ;;  %v2595_v57 = vadd.f32 %v7130_v52, %v2439_v23  ;;  %v2596_v51 = vadd.f32 %v7132_v6, %v2440_v62 }
 0x488   : > { %v3212_v24 = vpop.f32.mrf.mxu2  ;;  %v3240_v18 = vpop.f32.mrf.mxu3  ;;  %3876 = vmatpush.bf16.msra.mxu1 %v5736_v38 }
 0x489   : > { %3482 = vmatmul.bf16.vlgmr.msrb.gmra.mxu0 %v7302_v12  ;;  %3510 = vmatmul.bf16.vlgmr.msrb.gmra.mxu1 %v7304_v56  ;;  %v3062_v22 = vpop.f32.mrf.mxu0  ;;  %v3090_v34 = vpop.f32.mrf.mxu1  ;;  %v3258_v20 = vadd.f32 %v3212_v24, %v3106_v21  ;;  %v3259_v40 = vadd.f32 %v3240_v18, %v3107_v5  ;;  %v2808_v52 = vadd.f32 %v7233_v3, %v2595_v57  ;;  %v5727_v18 = vld [vmem:[%s7670_s9 + $0x110] sm:$0xff] }
 0x48a   : > { %3667 = vmatmul.bf16.vlgmr.msrb.gmra.mxu2 %v7302_v12  ;;  %3695 = vmatmul.bf16.vlgmr.msrb.gmra.mxu3 %v7304_v56  ;;  %v3108_v1 = vadd.f32 %v3062_v22, %v2956_v26  ;;  %v3109_v14 = vadd.f32 %v3090_v34, %v2957_v8  ;;  %v2809_v6 = vadd.f32 %v7235_v60, %v2596_v51  ;;  %v5735_v3 = vld [vmem:[%s7670_s9 + $0x150] sm:$0xff]  ;;  %v3308_v13 = vpop.permute.xlu2 %3307 }
 0x48b   : > { %v3314_v27 = vadd.f32 %v3288_v47, %v3258_v20  ;;  %v3315_v58 = vadd.f32 %v3288_v47, %v3259_v40  ;;  %v2960_v29 = vadd.f32 %v7252_v46, %v2808_v52  ;;  %3849 = vmatpush.bf16.msra.mxu0 %v5727_v18  ;;  %v3303_v40 = vpop.permute.xlu1 %3302  ;;  %v5725_v47 = vld [vmem:[%s7670_s9 + $0x100] sm:$0xff] }
 0x48c   : > { %v2961_v22 = vadd.f32 %v7254_v9, %v2809_v6  ;;  %3877 = vmatpush.bf16.msra.mxu1 %v5735_v3 }
 0x48d   : > { %v3328_v50 = vmax.f32 %v3314_v27, 0.0  ;;  %v3329_v54 = vmax.f32 %v3315_v58, 0.0 }
 0x490   : > { %v3214_v30 = vpop.f32.mrf.mxu2  ;;  %v3242_v15 = vpop.f32.mrf.mxu3  ;;  %3878 = vmatpush.bf16.msra.mxu1 %v5734_v37 }
 0x491   : > { %v3260_v33 = vadd.f32 %v3214_v30, %v3108_v1  ;;  %v3261_v10 = vadd.f32 %v3242_v15, %v3109_v14  ;;  %v3065_v63 = vpop.f32.mrf.mxu0  ;;  %v3093_v16 = vpop.f32.mrf.mxu1  ;;  %v5733_v1 = vld [vmem:[%s7670_s9 + $0x140] sm:$0xff] }
 0x492   : > { %v3110_v48 = vadd.f32 %v3065_v63, %v7229_v49  ;;  %v3111_v24 = vadd.f32 %v3093_v16, %v7231_v25  ;;  %v5726_v25 = vld [vmem:[%s7670_s9 + $0x108] sm:$0xff] }
 0x493   : > { %v3316_v41 = vadd.f32 %v3293_v55, %v3260_v33  ;;  %v3317_v0 = vadd.f32 %v3293_v55, %v3261_v10  ;;  %3850 = vmatpush.bf16.msra.mxu0 %v5726_v25 }
 0x494   : > { %3879 = vmatpush.bf16.msra.mxu1 %v5733_v1 }
 0x495   : > { %v3330_v28 = vmax.f32 %v3316_v41, 0.0  ;;  %v3331_v59 = vmax.f32 %v3317_v0, 0.0 }
 0x497   : > { %v7346_v36 = vpack.c.bf16 %v3330_v28, %v3328_v50  ;;  %v7348_v39 = vpack.c.bf16 %v3331_v59, %v3329_v54  ;;  %3851 = vmatpush.bf16.msra.mxu0 %v5725_v47 }
 0x498   : > { %v3217_v42 = vpop.f32.mrf.mxu2  ;;  %v3245_v2 = vpop.f32.mrf.mxu3 }
 0x499   : > { %3487 = vmatmul.bf16.gmra.mxu0 %v7346_v36  ;;  %3515 = vmatmul.bf16.gmra.mxu1 %v7348_v39  ;;  %v3067_v19 = vpop.f32.mrf.mxu0  ;;  %v3095_v35 = vpop.f32.mrf.mxu1  ;;  %v3262_v34 = vadd.f32 %v3217_v42, %v3110_v48  ;;  %v3263_v60 = vadd.f32 %v3245_v2, %v3111_v24 }
 0x49a   : > { %3672 = vmatmul.bf16.gmra.mxu2 %v7346_v36  ;;  %3700 = vmatmul.bf16.gmra.mxu3 %v7348_v39  ;;  %v3112_v49 = vadd.f32 %v3067_v19, %v2960_v29  ;;  %v3113_v32 = vadd.f32 %v3095_v35, %v2961_v22 }
 0x49b   : > { %v3318_v46 = vadd.f32 %v3298_v4, %v3262_v34  ;;  %v3319_v5 = vadd.f32 %v3298_v4, %v3263_v60 }
 0x49d   : > { %v3332_v14 = vmax.f32 %v3318_v46, 0.0  ;;  %v3333_v30 = vmax.f32 %v3319_v5, 0.0  ;;  %v5517_v5 = vld [vmem:[#allocation2 + $0x40] sm:$0xf] }
 0x4a0   : > { %v3219_v7 = vpop.f32.mrf.mxu2  ;;  %v3247_v21 = vpop.f32.mrf.mxu3 }
 0x4a1   : > { %v3264_v9 = vadd.f32 %v3219_v7, %v3112_v49  ;;  %v3265_v26 = vadd.f32 %v3247_v21, %v3113_v32  ;;  %v3070_v8 = vpop.f32.mrf.mxu0  ;;  %v3098_v20 = vpop.f32.mrf.mxu1  ;;  %v5509_v49 = vld [vmem:[#allocation2 + $0x20] sm:$0xf]  ;;  %v5744_v32 = vld [vmem:[#allocation2 + $0x2c] sm:$0xf0] }
 0x4a2   : > { %v3114_v10 = vadd.f32 %v3070_v8, %v7282_v43  ;;  %v3115_v63 = vadd.f32 %v3098_v20, %v7284_v45  ;;  %v7416_v7 = vor.u32 %v5744_v32, %v5509_v49 }
 0x4a3   : > { %v3320_v17 = vadd.f32 %v3303_v40, %v3264_v9  ;;  %v3321_v61 = vadd.f32 %v3303_v40, %v3265_v26  ;;  %v5746_v9 = vld [vmem:[#allocation2 + $0x4c] sm:$0xf0]  ;;  %v5501_v26 = vld [vmem:[#allocation2] sm:$0xf] }
 0x4a4   : > { %3979 = vrot.lane.b32.xlu1 %v7416_v7, %s5796_s22  ;;  %v5518_v40 = vor.u32 %v5746_v9, %v5517_v5 }
 0x4a5   : > { %v3334_v15 = vmax.f32 %v3320_v17, 0.0  ;;  %v3335_v31 = vmax.f32 %v3321_v61, 0.0  ;;  %v5742_v17 = vld [vmem:[#allocation2 + $0xc] sm:$0xf0] }
 0x4a6   : > { %v7424_v61 = vor.u32 %v5742_v17, %v5501_v26  ;;  %3983 = vrot.lane.b32.xlu2 %v5518_v40, %s5796_s22 }
 0x4a7   : > { %v3342_v11 = vpack.c.bf16 %v3334_v15, %v3332_v14  ;;  %v3343_v27 = vpack.c.bf16 %v3335_v31, %v3333_v30 }
 0x4a8   : > { %v3222_v58 = vpop.f32.mrf.mxu2  ;;  %v3250_v33 = vpop.f32.mrf.mxu3  ;;  %3975 = vrot.lane.b32.xlu0 %v7424_v61, %s5796_s22 }
 0x4a9   : > { %3492 = vmatmul.bf16.gmra.mxu0 %v3342_v11  ;;  %3520 = vmatmul.bf16.gmra.mxu1 %v3343_v27  ;;  %v3072_v16 = vpop.f32.mrf.mxu0  ;;  %v3100_v55 = vpop.f32.mrf.mxu1  ;;  %v3266_v41 = vadd.f32 %v3222_v58, %v3114_v10  ;;  %v3267_v0 = vadd.f32 %v3250_v33, %v3115_v63 }
 0x4aa   : > { %3677 = vmatmul.bf16.gmra.mxu2 %v3342_v11  ;;  %3705 = vmatmul.bf16.gmra.mxu3 %v3343_v27 }
 0x4ab   : > { %v3322_v53 = vadd.f32 %v3308_v13, %v3266_v41  ;;  %v3323_v50 = vadd.f32 %v3308_v13, %v3267_v0 }
 0x4ad   : > { %v3336_v59 = vmax.f32 %v3322_v53, 0.0  ;;  %v3337_v23 = vmax.f32 %v3323_v50, 0.0 }
 0x4ae   : > { %4082 = vrot.lane.b32.xlu2 %v5518_v40, %s5797_s23 }
 0x4af   : > { %v3344_v62 = vpack.c.bf16 %v3336_v59, %v3336_v59  ;;  %v3345_v57 = vpack.c.bf16 %v3337_v23, %v3337_v23 }
 0x4b0   : > { %v3224_v54 = vpop.f32.mrf.mxu2  ;;  %v3252_v28 = vpop.f32.mrf.mxu3  ;;  %4031 = vrot.lane.b32.xlu0 %v5518_v40, %s5794_s20 }
 0x4b9   : > { %3497 = vmatmul.bf16.gmra.mxu0 %v3344_v62  ;;  %3525 = vmatmul.bf16.gmra.mxu1 %v3345_v57 }
 0x4ba   : > { %3682 = vmatmul.bf16.gmra.mxu2 %v3344_v62  ;;  %3710 = vmatmul.bf16.gmra.mxu3 %v3345_v57 }
 0x4c9   : > { %3852 = vmatmul.bf16.vlgmr.msra.gmra.mxu0 %v7302_v12  ;;  %3880 = vmatmul.bf16.vlgmr.msra.gmra.mxu1 %v7304_v56 }
 0x4d9   : > { %3857 = vmatmul.bf16.gmra.mxu0 %v7346_v36  ;;  %3885 = vmatmul.bf16.gmra.mxu1 %v7348_v39 }
 0x4e9   : > { %3862 = vmatmul.bf16.gmra.mxu0 %v3342_v11  ;;  %3890 = vmatmul.bf16.gmra.mxu1 %v3343_v27 }
 0x4f9   : > { %3867 = vmatmul.bf16.gmra.mxu0 %v3344_v62  ;;  %3895 = vmatmul.bf16.gmra.mxu1 %v3345_v57 }
 0x506   : > { %v3483_v43 = vpop.f32.mrf.mxu0  ;;  %v3511_v45 = vpop.f32.mrf.mxu1 }
 0x507   : > { %v3512_v1 = vadd.f32 %v3511_v45, %v3483_v43 }
 0x50d   : > { %v3668_v42 = vpop.f32.mrf.mxu2  ;;  %v3696_v2 = vpop.f32.mrf.mxu3 }
 0x50e   : > { %v3485_v51 = vpop.f32.mrf.mxu0  ;;  %v3513_v19 = vpop.f32.mrf.mxu1  ;;  %v3697_v47 = vadd.f32 %v3696_v2, %v3668_v42 }
 0x50f   : > { %v3514_v63 = vadd.f32 %v3513_v19, %v3485_v51 }
 0x510   : > { %v3900_v11 = vmax.f32 %v3512_v1, %v3697_v47 }
 0x515   : > { %v3670_v35 = vpop.f32.mrf.mxu2  ;;  %v3698_v44 = vpop.f32.mrf.mxu3 }
 0x516   : > { %v3488_v38 = vpop.f32.mrf.mxu0  ;;  %v3516_v12 = vpop.f32.mrf.mxu1  ;;  %v3699_v33 = vadd.f32 %v3698_v44, %v3670_v35 }
 0x517   : > { %v3517_v54 = vadd.f32 %v3516_v12, %v3488_v38 }
 0x518   : > { %v3901_v41 = vmax.f32 %v3514_v63, %v3699_v33 }
 0x51d   : > { %v3673_v52 = vpop.f32.mrf.mxu2  ;;  %v3701_v56 = vpop.f32.mrf.mxu3 }
 0x51e   : > { %v7392_v6 = vpop.f32.mrf.mxu0  ;;  %v7394_v36 = vpop.f32.mrf.mxu1  ;;  %v3702_v53 = vadd.f32 %v3701_v56, %v3673_v52 }
 0x51f   : > { %v3519_v51 = vadd.f32 %v7394_v36, %v7392_v6 }
 0x520   : > { %v3902_v23 = vmax.f32 %v3517_v54, %v3702_v53 }
 0x525   : > { %v3675_v39 = vpop.f32.mrf.mxu2  ;;  %v3703_v48 = vpop.f32.mrf.mxu3 }
 0x526   : > { %v7396_v24 = vpop.f32.mrf.mxu0  ;;  %v7398_v18 = vpop.f32.mrf.mxu1  ;;  %v3704_v43 = vadd.f32 %v3703_v48, %v3675_v39 }
 0x527   : > { %v3522_v48 = vadd.f32 %v7398_v18, %v7396_v24 }
 0x528   : > { %v3903_v38 = vmax.f32 %v3519_v51, %v3704_v43 }
 0x52d   : > { %v7400_v3 = vpop.f32.mrf.mxu2  ;;  %v7402_v29 = vpop.f32.mrf.mxu3 }
 0x52e   : > { %v7404_v22 = vpop.f32.mrf.mxu0  ;;  %v7406_v34 = vpop.f32.mrf.mxu1  ;;  %v3707_v56 = vadd.f32 %v7402_v29, %v7400_v3 }
 0x52f   : > { %v3524_v3 = vadd.f32 %v7406_v34, %v7404_v22 }
 0x530   : > { %v3904_v49 = vmax.f32 %v3522_v48, %v3707_v56 }
 0x535   : > { %v7408_v60 = vpop.f32.mrf.mxu2  ;;  %v7410_v4 = vpop.f32.mrf.mxu3 }
 0x536   : > { %v7412_v25 = vpop.f32.mrf.mxu0  ;;  %v7414_v37 = vpop.f32.mrf.mxu1  ;;  %v3709_v9 = vadd.f32 %v7410_v4, %v7408_v60 }
 0x537   : > { %v3527_v4 = vadd.f32 %v7414_v37, %v7412_v25 }
 0x538   : > { %v3905_v40 = vmax.f32 %v3524_v3, %v3709_v9 }
 0x53d   : > { %v7420_v21 = vpop.f32.mrf.mxu2  ;;  %v7422_v46 = vpop.f32.mrf.mxu3 }
 0x53e   : > { %v3500_v8 = vpop.f32.mrf.mxu0  ;;  %v3528_v20 = vpop.f32.mrf.mxu1  ;;  %v3712_v1 = vadd.f32 %v7422_v46, %v7420_v21 }
 0x545   : > { %v3685_v14 = vpop.f32.mrf.mxu2  ;;  %v3713_v30 = vpop.f32.mrf.mxu3 }
 0x546   : > { %v3853_v15 = vpop.f32.mrf.mxu0  ;;  %v3881_v31 = vpop.f32.mrf.mxu1  ;;  %v3906_v14 = vmax.f32 %v3527_v4, %v3712_v1 }
 0x547   : > { %v3882_v27 = vadd.f32 %v3881_v31, %v3853_v15 }
 0x549   : > { %v3907_v58 = vmax.f32 %v3900_v11, %v3882_v27 }
 0x54b   : > { %v3914_v10 = vpack.c.bf16 %v3907_v58, %v3907_v58 }
 0x54d   : > { %3922 = vst.msk [vmem:[#allocation2 + $0x4] sm:$0xf] %vm3921_vm13, %v3914_v10 }
 0x54e   : > { %v3855_v16 = vpop.f32.mrf.mxu0  ;;  %v3883_v55 = vpop.f32.mrf.mxu1 }
 0x54f   : > { %v3884_v0 = vadd.f32 %v3883_v55, %v3855_v16 }
 0x551   : > { %v3908_v13 = vmax.f32 %v3901_v41, %v3884_v0 }
 0x553   : > { %v3915_v50 = vpack.c.bf16 %v3908_v13, %v3908_v13 }
 0x554   : > { %v5741_v42 = vld [vmem:[#allocation2 + $0x4] sm:$0xf] }
 0x555   : > { %3923 = vst.msk [vmem:[#allocation2 + $0x14] sm:$0xf] %vm3921_vm13, %v3915_v50 }
 0x556   : > { %v3858_v28 = vpop.f32.mrf.mxu0  ;;  %v3886_v59 = vpop.f32.mrf.mxu1 }
 0x557   : > { %v3887_v62 = vadd.f32 %v3886_v59, %v3858_v28  ;;  %v5544_v28 = vld [vmem:[#allocation2 + $0x4] sm:$0xf] }
 0x559   : > { %v3909_v57 = vmax.f32 %v3902_v23, %v3887_v62  ;;  %v4301_v23 = vld [vmem:[%s7667_s6 + $0x8] sm:$0xff]  ;;  %v4300_v62 = vld [vmem:[%s7667_s6] sm:$0xff] }
 0x55b   : > { %v3916_v45 = vpack.c.bf16 %v3909_v57, %v3909_v57  ;;  %v3984_v57 = vpop.permute.xlu2 %3983 }
 0x55c   : > { %v5503_v2 = vld [vmem:[#allocation2 + $0x10] sm:$0xf0] }
 0x55d   : > { %3924 = vst.msk [vmem:[#allocation2 + $0x24] sm:$0xf] %vm3921_vm13, %v3916_v45  ;;  %v7436_v19 = vor.u32 %v5741_v42, %v5503_v2  ;;  %v3980_v45 = vpop.permute.xlu1 %3979  ;;  %v3976_v42 = vpop.permute.xlu0 %3975 }
 0x55e   : > { %v3860_v35 = vpop.f32.mrf.mxu0  ;;  %v3888_v44 = vpop.f32.mrf.mxu1 }
 0x55f   : > { %v3889_v12 = vadd.f32 %v3888_v44, %v3860_v35  ;;  %3977 = vrot.lane.b32.xlu1 %v7436_v19, %s5796_s22 }
 0x561   : > { %v3910_v52 = vmax.f32 %v3903_v38, %v3889_v12 }
 0x563   : > { %v3917_v39 = vpack.c.bf16 %v3910_v52, %v3910_v52  ;;  %v4083_v43 = vpop.permute.xlu2 %4082 }
 0x564   : > { %v5743_v8 = vld [vmem:[#allocation2 + $0x24] sm:$0xf] }
 0x565   : > { %3925 = vst.msk [vmem:[#allocation2 + $0x34] sm:$0xf] %vm3921_vm13, %v3917_v39  ;;  %v5548_v55 = vld [vmem:[#allocation2 + $0x24] sm:$0xf]  ;;  %v4032_v51 = vpop.permute.xlu0 %4031 }
 0x566   : > { %v3863_v6 = vpop.f32.mrf.mxu0  ;;  %v3891_v36 = vpop.f32.mrf.mxu1 }
 0x567   : > { %v3892_v32 = vadd.f32 %v3891_v36, %v3863_v6 }
 0x569   : > { %v3911_v5 = vmax.f32 %v3904_v49, %v3892_v32 }
 0x56b   : > { %v3918_v26 = vpack.c.bf16 %v3911_v5, %v3911_v5 }
 0x56c   : > { %v5511_v20 = vld [vmem:[#allocation2 + $0x30] sm:$0xf0] }
 0x56d   : > { %3926 = vst.msk [vmem:[#allocation2 + $0x44] sm:$0xf] %vm3921_vm13, %v3918_v26  ;;  %v5514_v29 = vor.u32 %v5743_v8, %v5511_v20  ;;  %v5751_v16 = vld [vmem:[#allocation2 + $0x30] sm:$0xf0]  ;;  %v5748_v26 = vld [vmem:[%s7666_s5 + $0x8] sm:$0xff] }
 0x56e   : > { %v3865_v24 = vpop.f32.mrf.mxu0  ;;  %v3893_v18 = vpop.f32.mrf.mxu1  ;;  %v7476_v41 = vor.u32 %v5751_v16, %v5548_v55  ;;  %v5753_v55 = vld [vmem:[%s7666_s5 + $0x18] sm:$0xff] }
 0x56f   : > { %v3894_v17 = vadd.f32 %v3893_v18, %v3865_v24  ;;  %3981 = vrot.lane.b32.xlu2 %v5514_v29, %s5796_s22 }
 0x571   : > { %v3912_v47 = vmax.f32 %v3905_v40, %v3894_v17 }
 0x573   : > { %v3919_v60 = vpack.c.bf16 %v3912_v47, %v3912_v47 }
 0x574   : > { %v5745_v11 = vld [vmem:[#allocation2 + $0x44] sm:$0xf] }
 0x575   : > { %3927 = vst.msk [vmem:[#allocation2 + $0x54] sm:$0xf] %vm3921_vm13, %v3919_v60  ;;  %v5552_v50 = vld [vmem:[#allocation2 + $0x44] sm:$0xf] }
 0x576   : > { %v3868_v22 = vpop.f32.mrf.mxu0  ;;  %v3896_v34 = vpop.f32.mrf.mxu1 }
 0x577   : > { %v3897_v30 = vadd.f32 %v3896_v34, %v3868_v22  ;;  %4029 = vrot.lane.b32.xlu2 %v5514_v29, %s5794_s20 }
 0x579   : > { %v3913_v15 = vmax.f32 %v3906_v14, %v3897_v30 }
 0x57b   : > { %v3920_v31 = vpack.c.bf16 %v3913_v15, %v3913_v15 }
 0x57c   : > { %v5519_v27 = vld [vmem:[#allocation2 + $0x50] sm:$0xf0] }
 0x57d   : > { %3928 = vst.msk [vmem:[#allocation2 + $0x64] sm:$0xf] %vm3921_vm13, %v3920_v31  ;;  %v5522_v58 = vor.u32 %v5745_v11, %v5519_v27  ;;  %v5752_v53 = vld [vmem:[#allocation2 + $0x50] sm:$0xf0]  ;;  %v5747_v27 = vld [vmem:[%s7666_s5] sm:$0xff] }
 0x57e   : > { %v3870_v21 = vpop.f32.mrf.mxu0  ;;  %v3898_v46 = vpop.f32.mrf.mxu1  ;;  %v7484_v54 = vor.u32 %v5752_v53, %v5552_v50  ;;  %v5749_v31 = vld [vmem:[%s7666_s5 + $0x10] sm:$0xff] }
 0x57f   : > { %4033 = vrot.lane.b32.xlu1 %v5522_v58, %s5794_s20  ;;  %3985 = vrot.lane.b32.xlu0 %v5522_v58, %s5796_s22 }
 0x584   : > { %v3935_v25 = vld [vmem:[#allocation2 + $0x60] sm:$0xff] }
 0x585   : > { %v3966_v37 = vunpack.c.h.b16 %v3935_v25  ;;  %v3965_v33 = vunpack.c.l.b16 %v3935_v25  ;;  %v4125_v0 = vld [vmem:[#allocation2 + $0x64] sm:$0xf] }
 0x586   : > { %v4147_v13 = vunpack.c.l.b16 %v4125_v0 }
 0x587   : > { %v3974_v10 = vpack.c.b16 %v3966_v37, %v3966_v37  ;;  %v3973_v63 = vpack.c.b16 %v3965_v33, %v3965_v33 }
 0x589   : > { %3989 = vrot.lane.b32.xlu1 %v3974_v10, %s5796_s22  ;;  %4035 = vrot.lane.b32.xlu2 %v3973_v63, %s5794_s20 }
 0x58a   : > { %3987 = vrot.lane.b32.xlu0 %v3973_v63, %s5796_s22 }
 0x591   : > { %4027 = vrot.lane.b32.xlu1 %v7416_v7, %s5794_s20  ;;  %4088 = vrot.lane.b32.xlu2 %v3974_v10, %s5797_s23 }
 0x592   : > { %4084 = vrot.lane.b32.xlu0 %v5522_v58, %s5797_s23 }
 0x599   : > { %4086 = vrot.lane.b32.xlu1 %v3973_v63, %s5797_s23  ;;  %4023 = vrot.lane.b32.xlu2 %v7424_v61, %s5794_s20 }
 0x59a   : > { %4037 = vrot.lane.b32.xlu0 %v3974_v10, %s5794_s20 }
 0x5a1   : > { %4080 = vrot.lane.b32.xlu1 %v5514_v29, %s5797_s23  ;;  %4076 = vrot.lane.b32.xlu2 %v7436_v19, %s5797_s23 }
 0x5a2   : > { %4078 = vrot.lane.b32.xlu0 %v7416_v7, %s5797_s23  ;;  %v7486_v7 = vpack.c.b16 %v4147_v13, %v4147_v13 }
 0x5a4   : > { %v4159_v58 = vsel %vm585_vm0, %v7486_v7, 0 }
 0x5a9   : > { %4074 = vrot.lane.b32.xlu1 %v7424_v61, %s5797_s23  ;;  %4187 = vrot.lane.b32.xlu2 %v7476_v41, %s5798_s24  ;;  %v5750_v61 = vld [vmem:[#allocation2 + $0x10] sm:$0xf0] }
 0x5aa   : > { %4025 = vrot.lane.b32.xlu0 %v7436_v19, %s5794_s20  ;;  %v7494_v59 = vor.u32 %v5750_v61, %v5544_v28  ;;  %v5755_v61 = vld [vmem:[%s7666_s5 + $0x28] sm:$0xff] }
 0x5b1   : > { %4189 = vrot.lane.b32.xlu1 %v7484_v54, %s5798_s24  ;;  %4273 = vrot.lane.b32.xlu2 %v7486_v7, %s5800_s17 }
 0x5b2   : > { %4191 = vrot.lane.b32.xlu0 %v7486_v7, %s5798_s24 }
 0x5b9   : > { %4232 = vrot.lane.b32.xlu1 %v7486_v7, %s7699_s13  ;;  %4228 = vrot.lane.b32.xlu2 %v7476_v41, %s7699_s13 }
 0x5ba   : > { %4185 = vrot.lane.b32.xlu0 %v7494_v59, %s5798_s24 }
 0x5c1   : > { %4271 = vrot.lane.b32.xlu1 %v7484_v54, %s5800_s17  ;;  %4267 = vrot.lane.b32.xlu2 %v7494_v59, %s5800_s17 }
 0x5c2   : > { %4230 = vrot.lane.b32.xlu0 %v7484_v54, %s7699_s13 }
 0x5c9   : > { %4226 = vrot.lane.b32.xlu1 %v7494_v59, %s7699_s13  ;;  %v3982_v2 = vpop.permute.xlu2 %3981 }
 0x5ca   : > { %4269 = vrot.lane.b32.xlu0 %v7476_v41, %s5800_s17  ;;  %v3992_v5 = vsel %vm797_vm4, %v3980_v45, %v3982_v2  ;;  %v5579_v45 = vld [vmem:[#allocation2] sm:$0xf] }
 0x5d1   : > { %4309 = vperm.xlu1 %5779, %v4301_v23   ;;  %v3978_v19 = vpop.permute.xlu1 %3977  ;;  %v4030_v35 = vpop.permute.xlu2 %4029 }
 0x5d2   : > { %4304 = vperm.xlu0 %5778, %v4300_v62   ;;  %v3991_v9 = vsel %vm797_vm4, %v3976_v42, %v3978_v19  ;;  %v5758_v42 = vld [vmem:[#allocation2 + $0xc] sm:$0xf0] }
 0x5d3   : > { %v5580_v2 = vor.u32 %v5758_v42, %v5579_v45  ;;  %v4512_v42 = vld [vmem:[%s7671_s10 + $0x38] sm:$0xff] }
 0x5d5   : > { %4334 = vrot.lane.b32.xlu2 %v5580_v2, %s5796_s22 }
 0x5d9   : > { %4357 = vrot.lane.b32.xlu1 %v5580_v2, %s5794_s20 }
 0x5e3   : > { %v4036_v12 = vpop.permute.xlu2 %4035 }
 0x5eb   : > { %v4089_v49 = vpop.permute.xlu2 %4088 }
 0x5f1   : > { %v4034_v44 = vpop.permute.xlu1 %4033  ;;  %v3986_v38 = vpop.permute.xlu0 %3985 }
 0x5f2   : > { %v3993_v6 = vsel %vm797_vm4, %v3984_v57, %v3986_v38  ;;  %v4041_v17 = vsel %vm565_vm1, %v4032_v51, %v4034_v44 }
 0x5f3   : > { %v4024_v18 = vpop.permute.xlu2 %4023 }
 0x5fb   : > { %v3990_v52 = vpop.permute.xlu1 %3989  ;;  %v4077_v34 = vpop.permute.xlu2 %4076 }
 0x5fc   : > { %v3988_v56 = vpop.permute.xlu0 %3987 }
 0x5fd   : > { %v3994_v39 = vsel %vm797_vm4, %v3988_v56, %v3990_v52 }
 0x5fe   : > { %v4002_v48 = vsel %vm585_vm0, %v3994_v39, 0 }
 0x5ff   : > { %4008 = vmatpush.bf16.msra.mxu2 %v4002_v48 }
 0x603   : > { %4009 = vmatpush.bf16.msra.mxu2 %v3993_v6  ;;  %v4028_v36 = vpop.permute.xlu1 %4027  ;;  %v4188_v21 = vpop.permute.xlu2 %4187 }
 0x604   : > { %v4085_v32 = vpop.permute.xlu0 %4084  ;;  %v4040_v22 = vsel %vm565_vm1, %v4028_v36, %v4030_v35 }
 0x605   : > { %v4092_v47 = vsel %vm930_vm5, %v4083_v43, %v4085_v32 }
 0x607   : > { %4010 = vmatpush.bf16.msra.mxu2 %v3992_v5 }
 0x60b   : > { %4011 = vmatpush.bf16.msra.mxu2 %v3991_v9  ;;  %v4087_v8 = vpop.permute.xlu1 %4086  ;;  %v4274_v10 = vpop.permute.xlu2 %4273 }
 0x60c   : > { %v4093_v20 = vsel %vm930_vm5, %v4087_v8, %v4089_v49  ;;  %v4038_v3 = vpop.permute.xlu0 %4037  ;;  %v4282_v0 = vsel %vm585_vm0, %v4274_v10, 0 }
 0x60d   : > { %v4101_v29 = vsel %vm585_vm0, %v4093_v20, 0  ;;  %v4042_v24 = vsel %vm565_vm1, %v4036_v12, %v4038_v3 }
 0x60e   : > { %v4050_v40 = vsel %vm585_vm0, %v4042_v24, 0  ;;  %5523 = vmatmul.msk.bf16.vlgmr.msra.gmra.mxu2 %vm1934_vm12, %v5748_v26 }
 0x60f   : > { %4056 = vmatpush.bf16.msra.mxu3 %v4050_v40  ;;  %4107 = vmatpush.bf16.msrb.mxu2 %v4101_v29 }
 0x613   : > { %4057 = vmatpush.bf16.msra.mxu3 %v4041_v17  ;;  %4108 = vmatpush.bf16.msrb.mxu2 %v4092_v47  ;;  %v4081_v1 = vpop.permute.xlu1 %4080  ;;  %v4229_v50 = vpop.permute.xlu2 %4228 }
 0x614   : > { %v4079_v60 = vpop.permute.xlu0 %4078 }
 0x615   : > { %v4091_v4 = vsel %vm930_vm5, %v4079_v60, %v4081_v1 }
 0x617   : > { %4058 = vmatpush.bf16.msra.mxu3 %v4040_v22  ;;  %4109 = vmatpush.bf16.msrb.mxu2 %v4091_v4 }
 0x61b   : > { %v4075_v14 = vpop.permute.xlu1 %4074  ;;  %v4268_v28 = vpop.permute.xlu2 %4267 }
 0x61c   : > { %v4026_v30 = vpop.permute.xlu0 %4025  ;;  %v4090_v15 = vsel %vm930_vm5, %v4075_v14, %v4077_v34 }
 0x61d   : > { %v4039_v11 = vsel %vm565_vm1, %v4024_v18, %v4026_v30  ;;  %4110 = vmatpush.bf16.msrb.mxu2 %v4090_v15 }
 0x61e   : > { %4059 = vmatpush.bf16.msra.mxu3 %v4039_v11 }
 0x620   : > { %5535 = vmatmul.msk.bf16.vlgmr.msrb.gmra.mxu2 %vm1934_vm12, %v5749_v31 }
 0x621   : > { %5528 = vmatmul.msk.bf16.vlgmr.msra.gmra.mxu3 %vm1934_vm12, %v5747_v27  ;;  %v4497_v27 = vld [vmem:[%s7669_s8] sm:$0xff] }
 0x622   : > { %4165 = vmatpush.bf16.msrb.mxu3 %v4159_v58 }
 0x623   : > { %v4190_v46 = vpop.permute.xlu1 %4189 }
 0x624   : > { %v4192_v25 = vpop.permute.xlu0 %4191 }
 0x625   : > { %v4200_v37 = vsel %vm585_vm0, %v4192_v25, 0  ;;  %v5589_v25 = vld [vmem:[%s7668_s7 + $0xc] sm:$0xf] }
 0x626   : > { %4166 = vmatpush.bf16.msrb.mxu3 %v7484_v54  ;;  %4206 = vmatpush.bf16.msra.mxu2 %v4200_v37 }
 0x62a   : > { %4167 = vmatpush.bf16.msrb.mxu3 %v7476_v41  ;;  %4207 = vmatpush.bf16.msra.mxu2 %v4190_v46  ;;  %v5754_v41 = vld [vmem:[%s7666_s5 + $0x20] sm:$0xff] }
 0x62b   : > { %v4233_v33 = vpop.permute.xlu1 %4232 }
 0x62c   : > { %v4241_v63 = vsel %vm585_vm0, %v4233_v33, 0  ;;  %v4186_v16 = vpop.permute.xlu0 %4185  ;;  %v4323_v33 = vld [vmem:[%s7668_s7] sm:$0xf]  ;;  %vm4521_vm0 = vcmask 1044480  }
 0x62e   : > { %4168 = vmatpush.bf16.msrb.mxu3 %v7494_v59  ;;  %4208 = vmatpush.bf16.msra.mxu2 %v4188_v21  ;;  %v5756_v59 = vld [vmem:[%s7666_s5 + $0x30] sm:$0xff] }
 0x62f   : > { %v4335_v58 = vpop.permute.xlu2 %4334 }
 0x631   : > { %5554 = vmatmul.msk.bf16.vlgmr.msrb.gmra.mxu3 %vm1934_vm12, %v5753_v55 }
 0x632   : > { %4247 = vmatpush.bf16.msra.mxu3 %v4241_v63  ;;  %4209 = vmatpush.bf16.msra.mxu2 %v4186_v16 }
 0x633   : > { %v4272_v13 = vpop.permute.xlu1 %4271 }
 0x634   : > { %v4231_v53 = vpop.permute.xlu0 %4230 }
 0x635   : > { %5561 = vmatmul.msk.bf16.vlgmr.msra.gmra.mxu2 %vm1934_vm12, %v5754_v41  ;;  %v5576_v41 = vld [vmem:[%s7668_s7 + $0x4] sm:$0xf] }
 0x636   : > { %4288 = vmatpush.bf16.msrb.mxu2 %v4282_v0  ;;  %4248 = vmatpush.bf16.msra.mxu3 %v4231_v53 }
 0x63a   : > { %4289 = vmatpush.bf16.msrb.mxu2 %v4272_v13  ;;  %4249 = vmatpush.bf16.msra.mxu3 %v4229_v50  ;;  %v5587_v50 = vld [vmem:[%s7668_s7 + $0x8] sm:$0xf] }
 0x63b   : > { %v4227_v54 = vpop.permute.xlu1 %4226 }
 0x63c   : > { %v4270_v7 = vpop.permute.xlu0 %4269 }
 0x63e   : > { %4250 = vmatpush.bf16.msra.mxu3 %v4227_v54  ;;  %4290 = vmatpush.bf16.msrb.mxu2 %v4270_v7  ;;  %v5597_v7 = vld [vmem:[%s7668_s7 + $0x14] sm:$0xf] }
 0x641   : > { %5568 = vmatmul.msk.bf16.vlgmr.msra.gmra.mxu3 %vm1934_vm12, %v5755_v61  ;;  %v5595_v61 = vld [vmem:[%s7668_s7 + $0x10] sm:$0xf] }
 0x642   : > { %4291 = vmatpush.bf16.msrb.mxu2 %v4268_v28  ;;  %v5599_v28 = vld [vmem:[%s7668_s7 + $0x18] sm:$0xf] }
 0x643   : > { %v4310_v1 = vpop.permute.xlu1 %4309 }
 0x644   : > { %v4305_v26 = vpop.permute.xlu0 %4304 }
 0x645   : > { %5575 = vmatmul.msk.bf16.vlgmr.msrb.gmra.mxu2 %vm1934_vm12, %v5756_v59 }
 0x64b   : > { %v4358_v21 = vpop.permute.xlu1 %4357 }
 0x691   : > { %v4013_v23 = vpop.f32.mrf.mxu2 }
 0x699   : > { %v4015_v62 = vpop.f32.mrf.mxu2 }
 0x6a3   : > { %v4112_v43 = vpop.f32.mrf.mxu2 }
 0x6a4   : > { %v4061_v57 = vpop.f32.mrf.mxu3 }
 0x6a5   : > { %v4062_v12 = vadd.f32 %v4061_v57, %v4013_v23  ;;  %v4515_v23 = vld [vmem:[%s7671_s10 + $0x50] sm:$0x1f]  ;;  %v4514_v57 = vld [vmem:[%s7671_s10 + $0x48] sm:$0xff] }
 0x6a7   : > { %v4117_v56 = vadd.f32 %v4112_v43, %v4062_v12  ;;  %v4513_v43 = vld [vmem:[%s7671_s10 + $0x40] sm:$0xff]  ;;  %v4506_v12 = vld [vmem:[%s7671_s10 + $0x8] sm:$0xff] }
 0x6ab   : > { %v4114_v19 = vpop.f32.mrf.mxu2 }
 0x6ac   : > { %v4063_v51 = vpop.f32.mrf.mxu3 }
 0x6ad   : > { %v4064_v6 = vadd.f32 %v4063_v51, %v4015_v62 }
 0x6af   : > { %v4118_v5 = vadd.f32 %v4114_v19, %v4064_v6  ;;  %v4510_v19 = vld [vmem:[%s7671_s10 + $0x28] sm:$0xff] }
 0x6b4   : > { %v4170_v35 = vpop.f32.mrf.mxu3 }
 0x6b5   : > { %v4175_v39 = vadd.f32 %v4170_v35, %v4117_v56  ;;  %v4509_v35 = vld [vmem:[%s7671_s10 + $0x20] sm:$0xff] }
 0x6b8   : > { %v4211_v44 = vpop.f32.mrf.mxu2 }
 0x6b9   : > { %v4216_v36 = vadd.f32 %v4211_v44, %v4175_v39  ;;  %v4508_v44 = vld [vmem:[%s7671_s10 + $0x18] sm:$0xff] }
 0x6bc   : > { %v4172_v38 = vpop.f32.mrf.mxu3 }
 0x6bd   : > { %v4176_v8 = vadd.f32 %v4172_v38, %v4118_v5  ;;  %v4507_v38 = vld [vmem:[%s7671_s10 + $0x10] sm:$0xff] }
 0x6c0   : > { %v4213_v52 = vpop.f32.mrf.mxu2 }
 0x6c1   : > { %v4217_v29 = vadd.f32 %v4213_v52, %v4176_v8  ;;  %v4505_v52 = vld [vmem:[%s7671_s10] sm:$0xff] }
 0x6c4   : > { %v4252_v48 = vpop.f32.mrf.mxu3 }
 0x6c5   : > { %v4257_v49 = vadd.f32 %v4252_v48, %v4216_v36 }
 0x6c8   : > { %v4293_v32 = vpop.f32.mrf.mxu2 }
 0x6c9   : > { %v4298_v9 = vadd.f32 %v4293_v32, %v4257_v49 }
 0x6cb   : > { %v4312_v20 = vadd.f32 %v4305_v26, %v4298_v9 }
 0x6cc   : > { %v4254_v3 = vpop.f32.mrf.mxu3 }
 0x6cd   : > { %v4314_v24 = vmax.f32 %v4312_v20, 0.0  ;;  %v4258_v40 = vadd.f32 %v4254_v3, %v4217_v29 }
 0x6cf   : > { %v4316_v18 = vpack.c.bf16 %v4314_v24, %v4314_v24 }
 0x6d0   : > { %v4295_v17 = vpop.f32.mrf.mxu2 }
 0x6d1   : > { %4319 = vst.msk [vmem:[#allocation2 + $0x4] sm:$0xf] %vm4318_vm14, %v4316_v18  ;;  %v4299_v47 = vadd.f32 %v4295_v17, %v4258_v40 }
 0x6d3   : > { %v4313_v60 = vadd.f32 %v4310_v1, %v4299_v47  ;;  %v4547_v1 = vld [vmem:[%s7673_s12 + $0x8] sm:$0x3] }
 0x6d5   : > { %v4315_v4 = vmax.f32 %v4313_v60, 0.0  ;;  %v4546_v60 = vld [vmem:[%s7673_s12] sm:$0xff] }
 0x6d7   : > { %v4317_v22 = vpack.c.bf16 %v4315_v4, %v4315_v4  ;;  %v4516_v4 = vld [vmem:[%s7672_s11] sm:$0x1] }
 0x6d8   : > { %v5592_v34 = vld [vmem:[#allocation2 + $0x4] sm:$0xf] }
 0x6d9   : > { %4320 = vst.msk [vmem:[#allocation2 + $0x14] sm:$0xf] %vm4318_vm14, %v4317_v22  ;;  %v5757_v30 = vld [vmem:[#allocation2 + $0x4] sm:$0xf] }
 0x6e0   : > { %v5759_v14 = vld [vmem:[#allocation2 + $0x10] sm:$0xf0] }
 0x6e1   : > { %v5581_v15 = vld [vmem:[#allocation2 + $0x10] sm:$0xf0]  ;;  %v5593_v31 = vor.u32 %v5759_v14, %v5592_v34 }
 0x6e2   : > { %v5584_v11 = vor.u32 %v5757_v30, %v5581_v15  ;;  %v4548_v30 = vld [vmem:[#allocation3] sm:$0x1] }
 0x6e3   : > { %4424 = vmatpush.bf16.msra.mxu2 %v5593_v31 }
 0x6e4   : > { %4383 = vrot.lane.b32.xlu1 %v5584_v11, %s5797_s23  ;;  %4359 = vrot.lane.b32.xlu2 %v5584_v11, %s5794_s20 }
 0x6e5   : > { %4336 = vrot.lane.b32.xlu0 %v5584_v11, %s5796_s22 }
 0x6e6   : > { %5594 = vmatmul.msk.bf16.vlgmr.msra.gmra.mxu2 %vm4340_vm15, %v5589_v25 }
 0x6e7   : > { %5601 = vmatpush.msk.msrb.mxu2 %vm4521_vm0, %v4515_v23 }
 0x6e9   : > { %4531 = vmatpush.msrb.mxu2 %v4514_v57 }
 0x6eb   : > { %4532 = vmatpush.msrb.mxu2 %v4513_v43 }
 0x6ec   : > { %4477 = vrot.lane.b32.xlu1 %v5593_v31, %s5800_s17  ;;  %4433 = vrot.lane.b32.xlu2 %v5593_v31, %s5798_s24 }
 0x6ed   : > { %4381 = vrot.lane.b32.xlu0 %v5580_v2, %s5797_s23  ;;  %v4511_v2 = vld [vmem:[%s7671_s10 + $0x30] sm:$0xff]  ;;  %4533 = vmatpush.msrb.mxu2 %v4512_v42 }
 0x6ef   : > { %4534 = vmatpush.msrb.mxu2 %v4511_v2 }
 0x6f1   : > { %4535 = vmatpush.msrb.mxu2 %v4510_v19 }
 0x6f3   : > { %4536 = vmatpush.msrb.mxu2 %v4509_v35 }
 0x6f4   : > { %4500 = vperm.xlu2 %5780, %v4497_v27  }
 0x6f5   : > { %4455 = vrot.lane.b32.xlu0 %v5593_v31, %s7699_s13  ;;  %4537 = vmatpush.msrb.mxu2 %v4508_v44 }
 0x6f7   : > { %4538 = vmatpush.msrb.mxu2 %v4507_v38 }
 0x6f9   : > { %4539 = vmatpush.msrb.mxu2 %v4506_v12 }
 0x6fb   : > { %4540 = vmatpush.msrb.mxu2 %v4505_v52 }
 0x73e   : > { %v4360_v46 = vpop.permute.xlu2 %4359 }
 0x73f   : > { %v4361_v37 = vsel %vm565_vm1, %v4358_v21, %v4360_v46  ;;  %vm4517_vm1 = vcmask 695296  }
 0x740   : > { %4373 = vmatpush.bf16.msrb.mxu0 %v4361_v37 }
 0x743   : > { %5586 = vmatmul.msk.bf16.vlgmr.msrb.gmra.mxu0 %vm4340_vm15, %v4323_v33 }
 0x746   : > { %v4434_v55 = vpop.permute.xlu2 %4433 }
 0x74e   : > { %v4501_v24 = vpop.permute.xlu2 %4500 }
 0x756   : > { %v4384_v10 = vpop.permute.xlu1 %4383 }
 0x757   : > { %v4337_v63 = vpop.permute.xlu0 %4336 }
 0x758   : > { %v4338_v16 = vsel %vm797_vm4, %v4335_v58, %v4337_v63  ;;  %vm4582_vm4 = vcmask 0  }
 0x759   : > { %4351 = vmatpush.bf16.msrb.mxu3 %v4338_v16 }
 0x75c   : > { %5585 = vmatmul.msk.bf16.vlgmr.msrb.gmra.mxu3 %vm4340_vm15, %v5576_v41 }
 0x75d   : > { %4446 = vmatpush.bf16.msra.mxu3 %v4434_v55 }
 0x75e   : > { %v4478_v53 = vpop.permute.xlu1 %4477 }
 0x75f   : > { %v4382_v0 = vpop.permute.xlu0 %4381 }
 0x760   : > { %v4385_v13 = vsel %vm930_vm5, %v4382_v0, %v4384_v10 }
 0x761   : > { %4397 = vmatpush.bf16.msrb.mxu1 %v4385_v13  ;;  %5603 = vmatpush.msk.msrb.mxu3 %vm4553_vm2, %v4547_v1 }
 0x763   : > { %4572 = vmatpush.msrb.mxu3 %v4546_v60 }
 0x764   : > { %5588 = vmatmul.msk.bf16.vlgmr.msrb.gmra.mxu1 %vm4340_vm15, %v5587_v50 }
 0x765   : > { %4490 = vmatpush.bf16.msra.mxu1 %v4478_v53 }
 0x767   : > { %v4456_v54 = vpop.permute.xlu0 %4455 }
 0x768   : > { %4468 = vmatpush.bf16.msra.mxu0 %v4456_v54 }
 0x769   : > { %v4426_v62 = vpop.f32.mrf.mxu2 }
 0x76b   : > { %5598 = vmatmul.msk.bf16.vlgmr.msra.gmra.mxu0 %vm4340_vm15, %v5597_v7 }
 0x76c   : > { %5596 = vmatmul.msk.bf16.vlgmr.msra.gmra.mxu3 %vm4340_vm15, %v5595_v61 }
 0x771   : > { %v4428_v51 = vpop.f32.mrf.mxu2 }
 0x774   : > { %5600 = vmatmul.msk.bf16.vlgmr.msra.gmra.mxu1 %vm4340_vm15, %v5599_v28 }
 0x7c0   : > { %v4375_v59 = vpop.f32.mrf.mxu0 }
 0x7c8   : > { %v4377_v45 = vpop.f32.mrf.mxu0 }
 0x7df   : > { %v4353_v56 = vpop.f32.mrf.mxu3 }
 0x7e0   : > { %v4376_v48 = vadd.f32 %v4375_v59, %v4353_v56 }
 0x7e1   : > { %v4399_v39 = vpop.f32.mrf.mxu1 }
 0x7e2   : > { %v4403_v32 = vadd.f32 %v4399_v39, %v4376_v48 }
 0x7e4   : > { %v4430_v5 = vadd.f32 %v4426_v62, %v4403_v32 }
 0x7e7   : > { %v4355_v6 = vpop.f32.mrf.mxu3 }
 0x7e8   : > { %v4470_v36 = vpop.f32.mrf.mxu0 }
 0x7e9   : > { %v4401_v49 = vpop.f32.mrf.mxu1 }
 0x7ef   : > { %v4448_v9 = vpop.f32.mrf.mxu3 }
 0x7f0   : > { %v4452_v26 = vadd.f32 %v4448_v9, %v4430_v5  ;;  %v4472_v8 = vpop.f32.mrf.mxu0 }
 0x7f1   : > { %v4492_v20 = vpop.f32.mrf.mxu1 }
 0x7f2   : > { %v4474_v3 = vadd.f32 %v4470_v36, %v4452_v26 }
 0x7f4   : > { %v4496_v29 = vadd.f32 %v4492_v20, %v4474_v3 }
 0x7f6   : > { %v4503_v18 = vadd.f32 %v4501_v24, %v4496_v29 }
 0x7f7   : > { %v4450_v40 = vpop.f32.mrf.mxu3 }
 0x7f8   : > { %v4504_v17 = vmax.f32 %v4503_v18, 0.0 }
 0x7f9   : > { %v4494_v47 = vpop.f32.mrf.mxu1 }
 0x7fa   : > { %5602 = vmatmul.msk.f32.vlgmr.msrb.gmra.mxu2 %vm4517_vm1, %v4504_v17 }
 0x87d   : > { %v4542_v22 = vpop.f32.mrf.mxu2 }
 0x87e   : > { %v4543_v34 = vadd.f32 %v4542_v22, %v4516_v4 }
 0x880   : > { %v4545_v14 = vmax.f32 %v4543_v34, 0.0 }
 0x882   : > { %5604 = vmatmul.msk.f32.vlgmr.msrb.gmra.mxu3 %vm4549_vm3, %v4545_v14 }
 0x905   : > { %v4574_v15 = vpop.f32.mrf.mxu3 }
 0x906   : > { %v4575_v31 = vadd.f32 %v4574_v15, %v4548_v30 }
 0x908   : > { %v4577_v11 = vsub.f32 0.0, %v4575_v31 }
 0x90a   : > { %v4578_v27 = vmul.f32 1.442695, %v4577_v11 }
 0x90c   : > { %5781 = vpow2.f32 %v4578_v27 }
 0x912   : > { %v5782_v58 = vpop.eup %5781 }
 0x913   : > { %v4580_v21 = vadd.f32 1.0, %v5782_v58 }
 0x915   : > { %5783 = vrcp.f32 %v4580_v21 }
 0x91b   : > { %v5784_v46 = vpop.eup %5783 }
 0x91c   : > { %4583 = vst.msk [vmem:[%s465_s19] sm:$0x1] %vm4582_vm4, %v5784_v46 }
 0x91d PF: > { %s26_s15 = sadd.s32 1, %s5791_s15  }
 0x91e   : > { %p23_p4 = scmp.ge.s32.totalorder %s26_s15, 4  }
 0x920   :  { %25 = sbr.rel (!%p23_p4) target bundleno = 3 (0x3), region = 136 }

</bundles_post_ra>
